<compile_context>
chip_gen: v6e
topology: v6e:2x2x1
jax: 0.10.0
libtpu: 0.0.40
codegen_flags: <defaults>
</compile_context>

<pallas_src>
import functools
import numpy as np
import jax
import jax.numpy as jnp
from jax.experimental import pallas as pl
from jax.experimental.pallas import tpu as pltpu


# ------------------------------ fused GPT kernel ----------------------------------

def _gpt_kernel(x_ref, amask_ref, hmask_ref,
                ln1_g_ref, ln1_b_ref, qkv_w_ref, qkv_b_ref,
                proj_w_ref, proj_b_ref, ln2_g_ref, ln2_b_ref,
                fc_w_ref, fc_b_ref, fcp_w_ref, fcp_b_ref,
                lnf_g_ref, lnf_b_ref, head_w_ref, o_ref,
                *, n_layer, n_head, n_tokens, batch):
    f32 = jnp.float32
    bf16 = jnp.bfloat16

    def ln(x, g, b, eps=1e-5):                     # f32 layernorm (VPU/XLU filler)
        mu = jnp.mean(x, axis=-1, keepdims=True)
        var = jnp.mean((x - mu) ** 2, axis=-1, keepdims=True)
        return (x - mu) * jax.lax.rsqrt(var + eps) * g + b

    def mm(a, w_bf16):                             # bf16 MXU matmul, f32 accumulate
        return jnp.dot(a.astype(bf16), w_bf16, preferred_element_type=f32)

    x = x_ref[...]                                 # (B*T, D) f32, pos-emb already added
    BT, D = x.shape
    amask = amask_ref[...]                         # (BT, BT) additive: 0 in-batch, -1e9 cross-batch
    hmask = hmask_ref[...]                         # (n_head, 1, D) 0/1 lane masks

    # TODO(synk): static unroll is fine at n_layer=2; switch to lax.fori_loop(unroll=True)
    # with dynamic layer indexing before scaling n_layer (vreg live-range pressure).
    for li in range(n_layer):
        # --- attention sub-block (batch folded into M; heads isolated by lane masks) ---
        h = ln(x, ln1_g_ref[li], ln1_b_ref[li])
        qkv = mm(h, qkv_w_ref[li]) + qkv_b_ref[li]             # (BT, 3D); Q pre-scaled
        q = qkv[:, 0:D]
        k = qkv[:, D:2 * D].astype(bf16)
        v = qkv[:, 2 * D:3 * D]
        attn = jnp.zeros((BT, D), f32)
        for hh in range(n_head):                               # static, 128-lane-dense operands
            m_h = hmask[hh]                                    # (1, D)
            s = jax.lax.dot_general((q * m_h).astype(bf16), k,
                                    (((1,), (1,)), ((), ())),
                                    preferred_element_type=f32) + amask     # (BT, BT)
            p = jnp.exp(s - jnp.max(s, axis=-1, keepdims=True))              # f32 exp (EUP)
            p = p * pl.reciprocal(jnp.sum(p, axis=-1, keepdims=True), approx=True)
            attn = attn + jnp.dot(p.astype(bf16), (v * m_h).astype(bf16),
                                  preferred_element_type=f32)                # head lanes only
        x = x + mm(attn, proj_w_ref[li]) + proj_b_ref[li]

        # --- MLP sub-block ---
        h2 = ln(x, ln2_g_ref[li], ln2_b_ref[li])
        # TODO(synk): tanh-approx GELU (minGPT NewGELU); swap to exact erf if the reference
        # GPT uses nn.GELU default.
        ff = jax.nn.gelu(mm(h2, fc_w_ref[li]) + fc_b_ref[li], approximate=True)
        x = x + mm(ff, fcp_w_ref[li]) + fcp_b_ref[li]

    # Only the central token (row b*T) of each batch element is consumed downstream:
    # final LN + head run on B rows only; output is lane-dense (B, 128-padded).
    cent = jnp.concatenate([x[b * n_tokens:b * n_tokens + 1, :] for b in range(batch)], axis=0)
    cent = ln(cent, lnf_g_ref[...], lnf_b_ref[...])
    o_ref[...] = mm(cent, head_w_ref[...])                     # (B, NO_padded)


def init_gpt_params(key, n_layer, n_head, d_model, n_output, block_size):
    ks = jax.random.split(key, 6)
    D = d_model

    def nrm(k, shape, s=0.02):
        return s * jax.random.normal(k, shape, jnp.float32)

    return dict(
        n_head=n_head, n_layer=n_layer, d_model=D, n_output=n_output,
        pos_emb=nrm(ks[0], (block_size, D)),
        ln1_g=jnp.ones((n_layer, 1, D), jnp.float32),
        ln1_b=jnp.zeros((n_layer, 1, D), jnp.float32),
        qkv_w=nrm(ks[1], (n_layer, D, 3 * D)),
        qkv_b=jnp.zeros((n_layer, 1, 3 * D), jnp.float32),
        proj_w=nrm(ks[2], (n_layer, D, D)),
        proj_b=jnp.zeros((n_layer, 1, D), jnp.float32),
        ln2_g=jnp.ones((n_layer, 1, D), jnp.float32),
        ln2_b=jnp.zeros((n_layer, 1, D), jnp.float32),
        fc_w=nrm(ks[3], (n_layer, D, 4 * D)),
        fc_b=jnp.zeros((n_layer, 1, 4 * D), jnp.float32),
        fc_proj_w=nrm(ks[4], (n_layer, 4 * D, D)),
        fc_proj_b=jnp.zeros((n_layer, 1, D), jnp.float32),
        ln_f_g=jnp.ones((1, D), jnp.float32),
        ln_f_b=jnp.zeros((1, D), jnp.float32),
        head_w=nrm(ks[5], (D, n_output)),
    )


def gpt_forward(gp, emb):
    """Whole GPT as ONE pallas_call (no grid): batch folded into matmul M, weights resident."""
    B, T, D = emb.shape
    L, H, NO = gp['n_layer'], gp['n_head'], gp['n_output']
    assert D == gp['d_model']
    Dh = D // H
    BT = B * T
    f32, bf16 = jnp.float32, jnp.bfloat16

    # Pos-emb add + batch-fold into a lane-dense (B*T, D) slab (wrapper-side layout plumbing;
    # XLA fuses it with the embedding assembly).
    x0 = (emb.astype(f32) + gp['pos_emb'][None, :T, :]).reshape(BT, D)

    # --- weight prep (could be hoisted/cached outside the forward) ---
    # Fold 1/sqrt(Dh) attention scale into the Q columns of the QKV weights/bias (in f32,
    # before the bf16 cast), cast MXU weights to bf16, zero-pad head to 128 output lanes.
    scale = 1.0 / float(np.sqrt(Dh))
    qkv_w = jnp.concatenate([gp['qkv_w'][:, :, :D] * scale, gp['qkv_w'][:, :, D:]], axis=-1)
    qkv_b = jnp.concatenate([gp['qkv_b'][:, :, :D] * scale, gp['qkv_b'][:, :, D:]], axis=-1)
    NOP = ((NO + 127) // 128) * 128
    head_w = jnp.zeros((D, NOP), f32).at[:, :NO].set(gp['head_w']).astype(bf16)

    # --- static masks (trace-time constants) ---
    head_mask = np.zeros((H, 1, D), np.float32)          # per-head 0/1 lane masks
    for hh in range(H):
        head_mask[hh, 0, hh * Dh:(hh + 1) * Dh] = 1.0
    bid = np.arange(BT) // T                             # batch-block-diagonal additive mask
    attn_mask = np.where(bid[:, None] == bid[None, :], 0.0, -1e9).astype(np.float32)

    vmem = pl.BlockSpec(memory_space=pltpu.MemorySpace.VMEM)
    out = pl.pallas_call(
        functools.partial(_gpt_kernel, n_layer=L, n_head=H, n_tokens=T, batch=B),
        out_shape=jax.ShapeDtypeStruct((B, NOP), f32),
        in_specs=[vmem] * 18,
        out_specs=vmem,
    )(
        x0, jnp.asarray(attn_mask), jnp.asarray(head_mask),
        gp['ln1_g'], gp['ln1_b'],
        qkv_w.astype(bf16), qkv_b,
        gp['proj_w'].astype(bf16), gp['proj_b'],
        gp['ln2_g'], gp['ln2_b'],
        gp['fc_w'].astype(bf16), gp['fc_b'],
        gp['fc_proj_w'].astype(bf16), gp['fc_proj_b'],
        gp['ln_f_g'], gp['ln_f_b'],
        head_w,
    )
    return out[:, :NO]                                   # (B, n_output)


# ------------------------------ LocalTransformer -----------------------------------

def init_local_transformer(key, vocab_size, n_output, n_seq, n_spatial, n_dihedral,
                           n_layer, n_head, n_embd, block_size):
    ks = jax.random.split(key, 5)

    def nrm(k, shape, s=0.02):
        return s * jax.random.normal(k, shape, jnp.float32)

    return dict(
        vocab_size=vocab_size, n_seq=n_seq, n_embd=n_embd,
        token_emb=nrm(ks[0], (vocab_size + 1, n_embd)),
        spatial_w=nrm(ks[1], (n_spatial, n_embd)),
        spatial_b=jnp.zeros((n_embd,), jnp.float32),
        dihedral_w=nrm(ks[2], (n_dihedral, n_embd)),
        dihedral_b=jnp.zeros((n_embd,), jnp.float32),
        sequence_emb=nrm(ks[3], (n_seq + 1, n_embd)),
        gpt=init_gpt_params(ks[4], n_layer, n_head, 4 * n_embd, n_output, block_size),
    )


def local_transformer_forward(params, cent_inf, knn_inf):
    knnAAtype = knn_inf['knnAAtype']
    B, n_node = knnAAtype.shape
    E = params['n_embd']

    nd = cent_inf['node_dihedral']
    dihedral = jnp.concatenate([nd['phi'], nd['psi'], nd['omega']], axis=1)       # (B, n_dihedral)
    knn_rep = sorted(set(knn_inf.keys()) - {'knnpos', 'knnind', 'knnAAtype', 'k_nndist'})

    # ---- central node spatial features ----
    if 'dist' in cent_inf:
        spatial_c = jnp.concatenate(
            [cent_inf['dist']] + [jnp.zeros_like(knn_inf[k])[:, 0:1] for k in knn_rep], axis=2)
    else:
        # TODO(synk): reference indexes knn_inf['dist'] here (likely a bug); fall back to k_nndist.
        base = knn_inf.get('dist', knn_inf['k_nndist'])
        spatial_c = jnp.concatenate(
            [jnp.zeros_like(base)[:, 0:1]]
            + [jnp.zeros_like(knn_inf[k])[:, 0:1] for k in knn_rep], axis=2)
    spatial_c = spatial_c[:, 0]                                                   # (B, n_spatial)

    # ---- embedding assembly: gathers + tiny projections + concat, plain JAX (XLA fuses it) ----
    tok_c = jnp.broadcast_to(params['token_emb'][params['vocab_size']][None, :], (B, E))
    seq_c = jnp.broadcast_to(params['sequence_emb'][0][None, :], (B, E))
    sp_c = spatial_c @ params['spatial_w'] + params['spatial_b']                  # (B, E)
    dh_c = dihedral @ params['dihedral_w'] + params['dihedral_b']                 # (B, E)
    cent = jnp.concatenate([tok_c, sp_c, dh_c, seq_c], axis=-1)                   # (B, 4E)

    tok_k = jnp.take(params['token_emb'], knnAAtype, axis=0)                      # (B, N, E)
    spatial_k = jnp.concatenate([knn_inf['k_nndist']] + [knn_inf[k] for k in knn_rep], axis=2)
    sp_k = spatial_k @ params['spatial_w'] + params['spatial_b']                  # (B, N, E)
    # Reference applies dihedral_emb to exact zeros -> result is just the bias (algebraic identity).
    dh_k = jnp.broadcast_to(params['dihedral_b'][None, None, :], (B, n_node, E))
    seq_k = jnp.take(params['sequence_emb'],
                     knn_inf['knnind'] + params['n_seq'] // 2, axis=0)            # (B, N, E)
    knn = jnp.concatenate([tok_k, sp_k, dh_k, seq_k], axis=-1)                    # (B, N, 4E)

    embeddings = jnp.concatenate([cent[:, None, :], knn], axis=1)                 # (B, N+1, 4E)

    # ---- fused GPT: single pallas_call, returns only the central-token logits ----
    return gpt_forward(params['gpt'], embeddings)                                 # (B, n_output)


# ----------------------------------- main -------------------------------------------

if __name__ == "__main__":
    B, n_node = 2, 8
    vocab_size, n_output = 20, 8
    n_seq, n_spatial, n_dihedral = 16, 7, 15
    n_layer, n_head, n_embd = 2, 4, 32            # transformer width = 4*n_embd = 128

    key = jax.random.PRNGKey(0)
    kp, k1, k2, k3, k4, k5, k6, k7, k8, k9 = jax.random.split(key, 10)

    params = init_local_transformer(kp, vocab_size, n_output, n_seq, n_spatial,
                                    n_dihedral, n_layer, n_head, n_embd,
                                    block_size=n_node + 1)

    knn_inf = {
        'knnAAtype': jax.random.randint(k1, (B, n_node), 0, vocab_size, jnp.int32),
        'knnind':    jax.random.randint(k2, (B, n_node), -(n_seq // 4), n_seq // 4 + 1, jnp.int32),
        'k_nndist':  jax.random.normal(k3, (B, n_node, 3), jnp.float32),
        'knnpos':    jax.random.normal(k4, (B, n_node, 3), jnp.float32),
        'knnori':    jax.random.normal(k5, (B, n_node, 4), jnp.float32),   # -> knn_rep feature
    }
    cent_inf = {
        'dist': jax.random.normal(k6, (B, 1, 3), jnp.float32),
        'node_dihedral': {
            'phi':   jax.random.normal(k7, (B, 5), jnp.float32),
            'psi':   jax.random.normal(k8, (B, 5), jnp.float32),
            'omega': jax.random.normal(k9, (B, 5), jnp.float32),
        },
    }

    out = local_transformer_forward(params, cent_inf, knn_inf)
    out = jax.block_until_ready(out)
    assert out.shape == (B, n_output), out.shape
    assert bool(jnp.all(jnp.isfinite(out)))
    print("KERNEL_OK")
</pallas_src>

<mosaic_0001>
module attributes {stable_mosaic.version = 11 : i64} {
  func.func @_gpt_kernel(%arg0: memref<18x128xf32, #tpu.memory_space<vmem>>, %arg1: memref<18x18xf32, #tpu.memory_space<vmem>>, %arg2: memref<4x1x128xf32, #tpu.memory_space<vmem>>, %arg3: memref<2x1x128xf32, #tpu.memory_space<vmem>>, %arg4: memref<2x1x128xf32, #tpu.memory_space<vmem>>, %arg5: memref<2x128x384xbf16, #tpu.memory_space<vmem>>, %arg6: memref<2x1x384xf32, #tpu.memory_space<vmem>>, %arg7: memref<2x128x128xbf16, #tpu.memory_space<vmem>>, %arg8: memref<2x1x128xf32, #tpu.memory_space<vmem>>, %arg9: memref<2x1x128xf32, #tpu.memory_space<vmem>>, %arg10: memref<2x1x128xf32, #tpu.memory_space<vmem>>, %arg11: memref<2x128x512xbf16, #tpu.memory_space<vmem>>, %arg12: memref<2x1x512xf32, #tpu.memory_space<vmem>>, %arg13: memref<2x512x128xbf16, #tpu.memory_space<vmem>>, %arg14: memref<2x1x128xf32, #tpu.memory_space<vmem>>, %arg15: memref<1x128xf32, #tpu.memory_space<vmem>>, %arg16: memref<1x128xf32, #tpu.memory_space<vmem>>, %arg17: memref<128x128xbf16, #tpu.memory_space<vmem>>, %arg18: memref<2x128xf32, #tpu.memory_space<vmem>>) attributes {dimension_semantics = [], scalar_prefetch = 0 : i64, scratch_operands = 0 : i64, tpu.core_type = #tpu.core_type<tc>} {
    %c0 = arith.constant 0 : index
    %c0_0 = arith.constant 0 : index
    %0 = vector.load %arg0[%c0, %c0_0] : memref<18x128xf32, #tpu.memory_space<vmem>>, vector<18x128xf32>
    %c0_1 = arith.constant 0 : index
    %c0_2 = arith.constant 0 : index
    %1 = vector.load %arg1[%c0_1, %c0_2] : memref<18x18xf32, #tpu.memory_space<vmem>>, vector<18x18xf32>
    %c0_3 = arith.constant 0 : index
    %c0_4 = arith.constant 0 : index
    %c0_5 = arith.constant 0 : index
    %2 = vector.load %arg2[%c0_3, %c0_4, %c0_5] : memref<4x1x128xf32, #tpu.memory_space<vmem>>, vector<4x1x128xf32>
    %c0_6 = arith.constant 0 : index
    %c0_7 = arith.constant 0 : index
    %c0_8 = arith.constant 0 : index
    %3 = vector.load %arg3[%c0_6, %c0_7, %c0_8] : memref<2x1x128xf32, #tpu.memory_space<vmem>>, vector<1x1x128xf32>
    %4 = vector.shape_cast %3 : vector<1x1x128xf32> to vector<1x128xf32>
    %c0_9 = arith.constant 0 : index
    %c0_10 = arith.constant 0 : index
    %c0_11 = arith.constant 0 : index
    %5 = vector.load %arg4[%c0_9, %c0_10, %c0_11] : memref<2x1x128xf32, #tpu.memory_space<vmem>>, vector<1x1x128xf32>
    %6 = vector.shape_cast %5 : vector<1x1x128xf32> to vector<1x128xf32>
    %cst = arith.constant dense<0.000000e+00> : vector<18xf32>
    %7 = vector.multi_reduction <add>, %0, %cst [1] : vector<18x128xf32> to vector<18xf32>
    %8 = vector.shape_cast %7 : vector<18xf32> to vector<18x1xf32>
    %cst_12 = arith.constant 1.280000e+02 : f32
    %9 = vector.broadcast %cst_12 : f32 to vector<18x1xf32>
    %10 = arith.divf %8, %9 : vector<18x1xf32>
    %11 = vector.broadcast %10 : vector<18x1xf32> to vector<18x128xf32>
    %12 = arith.subf %0, %11 : vector<18x128xf32>
    %13 = arith.mulf %12, %12 : vector<18x128xf32>
    %cst_13 = arith.constant dense<0.000000e+00> : vector<18xf32>
    %14 = vector.multi_reduction <add>, %13, %cst_13 [1] : vector<18x128xf32> to vector<18xf32>
    %15 = vector.shape_cast %14 : vector<18xf32> to vector<18x1xf32>
    %cst_14 = arith.constant 1.280000e+02 : f32
    %16 = vector.broadcast %cst_14 : f32 to vector<18x1xf32>
    %17 = arith.divf %15, %16 : vector<18x1xf32>
    %18 = vector.broadcast %10 : vector<18x1xf32> to vector<18x128xf32>
    %19 = arith.subf %0, %18 : vector<18x128xf32>
    %cst_15 = arith.constant 9.99999974E-6 : f32
    %20 = vector.broadcast %cst_15 : f32 to vector<18x1xf32>
    %21 = arith.addf %17, %20 : vector<18x1xf32>
    %22 = math.rsqrt %21 : vector<18x1xf32>
    %23 = vector.broadcast %22 : vector<18x1xf32> to vector<18x128xf32>
    %24 = arith.mulf %19, %23 : vector<18x128xf32>
    %25 = vector.broadcast %4 : vector<1x128xf32> to vector<18x128xf32>
    %26 = arith.mulf %24, %25 : vector<18x128xf32>
    %27 = vector.broadcast %6 : vector<1x128xf32> to vector<18x128xf32>
    %28 = arith.addf %26, %27 : vector<18x128xf32>
    %c0_16 = arith.constant 0 : index
    %c0_17 = arith.constant 0 : index
    %c0_18 = arith.constant 0 : index
    %29 = vector.load %arg5[%c0_16, %c0_17, %c0_18] : memref<2x128x384xbf16, #tpu.memory_space<vmem>>, vector<1x128x384xbf16>
    %30 = vector.shape_cast %29 : vector<1x128x384xbf16> to vector<128x384xbf16>
    %31 = arith.truncf %28 : vector<18x128xf32> to vector<18x128xbf16>
    %cst_19 = arith.constant dense<0.000000e+00> : vector<18x384xf32>
    %32 = tpu.matmul %31, %30, %cst_19 {dimension_numbers = #tpu.dot_dimension_numbers<[1], [0], [0], [1], [0, 0, 1, 1], [], []>} : vector<18x128xbf16>, vector<128x384xbf16>, vector<18x384xf32> -> vector<18x384xf32>
    %c0_20 = arith.constant 0 : index
    %c0_21 = arith.constant 0 : index
    %c0_22 = arith.constant 0 : index
    %33 = vector.load %arg6[%c0_20, %c0_21, %c0_22] : memref<2x1x384xf32, #tpu.memory_space<vmem>>, vector<1x1x384xf32>
    %34 = vector.shape_cast %33 : vector<1x1x384xf32> to vector<1x384xf32>
    %35 = vector.broadcast %34 : vector<1x384xf32> to vector<18x384xf32>
    %36 = arith.addf %32, %35 : vector<18x384xf32>
    %37 = vector.extract_strided_slice %36 {offsets = [0, 0], sizes = [18, 128], strides = [1, 1]} : vector<18x384xf32> to vector<18x128xf32>
    %38 = vector.extract_strided_slice %36 {offsets = [0, 128], sizes = [18, 128], strides = [1, 1]} : vector<18x384xf32> to vector<18x128xf32>
    %39 = arith.truncf %38 : vector<18x128xf32> to vector<18x128xbf16>
    %40 = vector.extract_strided_slice %36 {offsets = [0, 256], sizes = [18, 128], strides = [1, 1]} : vector<18x384xf32> to vector<18x128xf32>
    %cst_23 = arith.constant 0.000000e+00 : f32
    %41 = vector.broadcast %cst_23 : f32 to vector<18x128xf32>
    %42 = vector.extract_strided_slice %2 {offsets = [0, 0, 0], sizes = [1, 1, 128], strides = [1, 1, 1]} : vector<4x1x128xf32> to vector<1x1x128xf32>
    %43 = vector.shape_cast %42 : vector<1x1x128xf32> to vector<1x128xf32>
    %44 = vector.broadcast %43 : vector<1x128xf32> to vector<18x128xf32>
    %45 = arith.mulf %37, %44 : vector<18x128xf32>
    %46 = arith.truncf %45 : vector<18x128xf32> to vector<18x128xbf16>
    %cst_24 = arith.constant dense<0.000000e+00> : vector<18x18xf32>
    %47 = tpu.matmul %46, %39, %cst_24 {dimension_numbers = #tpu.dot_dimension_numbers<[1], [1], [0], [0], [0, 0, 1, 0], [], []>} : vector<18x128xbf16>, vector<18x128xbf16>, vector<18x18xf32> -> vector<18x18xf32>
    %48 = arith.addf %47, %1 : vector<18x18xf32>
    %cst_25 = arith.constant dense<0xFF800000> : vector<18xf32>
    %49 = vector.multi_reduction <maximumf>, %48, %cst_25 [1] : vector<18x18xf32> to vector<18xf32>
    %50 = vector.shape_cast %49 : vector<18xf32> to vector<18x1xf32>
    %51 = vector.broadcast %50 : vector<18x1xf32> to vector<18x18xf32>
    %52 = arith.subf %48, %51 : vector<18x18xf32>
    %53 = math.exp %52 : vector<18x18xf32>
    %cst_26 = arith.constant dense<0.000000e+00> : vector<18xf32>
    %54 = vector.multi_reduction <add>, %53, %cst_26 [1] : vector<18x18xf32> to vector<18xf32>
    %55 = vector.shape_cast %54 : vector<18xf32> to vector<18x1xf32>
    %56 = tpu.reciprocal %55 {approx = true} : vector<18x1xf32> -> vector<18x1xf32>
    %57 = vector.broadcast %56 : vector<18x1xf32> to vector<18x18xf32>
    %58 = arith.mulf %53, %57 : vector<18x18xf32>
    %59 = arith.truncf %58 : vector<18x18xf32> to vector<18x18xbf16>
    %60 = vector.broadcast %43 : vector<1x128xf32> to vector<18x128xf32>
    %61 = arith.mulf %40, %60 : vector<18x128xf32>
    %62 = arith.truncf %61 : vector<18x128xf32> to vector<18x128xbf16>
    %cst_27 = arith.constant dense<0.000000e+00> : vector<18x128xf32>
    %63 = tpu.matmul %59, %62, %cst_27 {dimension_numbers = #tpu.dot_dimension_numbers<[1], [0], [0], [1], [0, 0, 1, 1], [], []>} : vector<18x18xbf16>, vector<18x128xbf16>, vector<18x128xf32> -> vector<18x128xf32>
    %64 = arith.addf %41, %63 : vector<18x128xf32>
    %65 = vector.extract_strided_slice %2 {offsets = [1, 0, 0], sizes = [1, 1, 128], strides = [1, 1, 1]} : vector<4x1x128xf32> to vector<1x1x128xf32>
    %66 = vector.shape_cast %65 : vector<1x1x128xf32> to vector<1x128xf32>
    %67 = vector.broadcast %66 : vector<1x128xf32> to vector<18x128xf32>
    %68 = arith.mulf %37, %67 : vector<18x128xf32>
    %69 = arith.truncf %68 : vector<18x128xf32> to vector<18x128xbf16>
    %cst_28 = arith.constant dense<0.000000e+00> : vector<18x18xf32>
    %70 = tpu.matmul %69, %39, %cst_28 {dimension_numbers = #tpu.dot_dimension_numbers<[1], [1], [0], [0], [0, 0, 1, 0], [], []>} : vector<18x128xbf16>, vector<18x128xbf16>, vector<18x18xf32> -> vector<18x18xf32>
    %71 = arith.addf %70, %1 : vector<18x18xf32>
    %cst_29 = arith.constant dense<0xFF800000> : vector<18xf32>
    %72 = vector.multi_reduction <maximumf>, %71, %cst_29 [1] : vector<18x18xf32> to vector<18xf32>
    %73 = vector.shape_cast %72 : vector<18xf32> to vector<18x1xf32>
    %74 = vector.broadcast %73 : vector<18x1xf32> to vector<18x18xf32>
    %75 = arith.subf %71, %74 : vector<18x18xf32>
    %76 = math.exp %75 : vector<18x18xf32>
    %cst_30 = arith.constant dense<0.000000e+00> : vector<18xf32>
    %77 = vector.multi_reduction <add>, %76, %cst_30 [1] : vector<18x18xf32> to vector<18xf32>
    %78 = vector.shape_cast %77 : vector<18xf32> to vector<18x1xf32>
    %79 = tpu.reciprocal %78 {approx = true} : vector<18x1xf32> -> vector<18x1xf32>
    %80 = vector.broadcast %79 : vector<18x1xf32> to vector<18x18xf32>
    %81 = arith.mulf %76, %80 : vector<18x18xf32>
    %82 = arith.truncf %81 : vector<18x18xf32> to vector<18x18xbf16>
    %83 = vector.broadcast %66 : vector<1x128xf32> to vector<18x128xf32>
    %84 = arith.mulf %40, %83 : vector<18x128xf32>
    %85 = arith.truncf %84 : vector<18x128xf32> to vector<18x128xbf16>
    %cst_31 = arith.constant dense<0.000000e+00> : vector<18x128xf32>
    %86 = tpu.matmul %82, %85, %cst_31 {dimension_numbers = #tpu.dot_dimension_numbers<[1], [0], [0], [1], [0, 0, 1, 1], [], []>} : vector<18x18xbf16>, vector<18x128xbf16>, vector<18x128xf32> -> vector<18x128xf32>
    %87 = arith.addf %64, %86 : vector<18x128xf32>
    %88 = vector.extract_strided_slice %2 {offsets = [2, 0, 0], sizes = [1, 1, 128], strides = [1, 1, 1]} : vector<4x1x128xf32> to vector<1x1x128xf32>
    %89 = vector.shape_cast %88 : vector<1x1x128xf32> to vector<1x128xf32>
    %90 = vector.broadcast %89 : vector<1x128xf32> to vector<18x128xf32>
    %91 = arith.mulf %37, %90 : vector<18x128xf32>
    %92 = arith.truncf %91 : vector<18x128xf32> to vector<18x128xbf16>
    %cst_32 = arith.constant dense<0.000000e+00> : vector<18x18xf32>
    %93 = tpu.matmul %92, %39, %cst_32 {dimension_numbers = #tpu.dot_dimension_numbers<[1], [1], [0], [0], [0, 0, 1, 0], [], []>} : vector<18x128xbf16>, vector<18x128xbf16>, vector<18x18xf32> -> vector<18x18xf32>
    %94 = arith.addf %93, %1 : vector<18x18xf32>
    %cst_33 = arith.constant dense<0xFF800000> : vector<18xf32>
    %95 = vector.multi_reduction <maximumf>, %94, %cst_33 [1] : vector<18x18xf32> to vector<18xf32>
    %96 = vector.shape_cast %95 : vector<18xf32> to vector<18x1xf32>
    %97 = vector.broadcast %96 : vector<18x1xf32> to vector<18x18xf32>
    %98 = arith.subf %94, %97 : vector<18x18xf32>
    %99 = math.exp %98 : vector<18x18xf32>
    %cst_34 = arith.constant dense<0.000000e+00> : vector<18xf32>
    %100 = vector.multi_reduction <add>, %99, %cst_34 [1] : vector<18x18xf32> to vector<18xf32>
    %101 = vector.shape_cast %100 : vector<18xf32> to vector<18x1xf32>
    %102 = tpu.reciprocal %101 {approx = true} : vector<18x1xf32> -> vector<18x1xf32>
    %103 = vector.broadcast %102 : vector<18x1xf32> to vector<18x18xf32>
    %104 = arith.mulf %99, %103 : vector<18x18xf32>
    %105 = arith.truncf %104 : vector<18x18xf32> to vector<18x18xbf16>
    %106 = vector.broadcast %89 : vector<1x128xf32> to vector<18x128xf32>
    %107 = arith.mulf %40, %106 : vector<18x128xf32>
    %108 = arith.truncf %107 : vector<18x128xf32> to vector<18x128xbf16>
    %cst_35 = arith.constant dense<0.000000e+00> : vector<18x128xf32>
    %109 = tpu.matmul %105, %108, %cst_35 {dimension_numbers = #tpu.dot_dimension_numbers<[1], [0], [0], [1], [0, 0, 1, 1], [], []>} : vector<18x18xbf16>, vector<18x128xbf16>, vector<18x128xf32> -> vector<18x128xf32>
    %110 = arith.addf %87, %109 : vector<18x128xf32>
    %111 = vector.extract_strided_slice %2 {offsets = [3, 0, 0], sizes = [1, 1, 128], strides = [1, 1, 1]} : vector<4x1x128xf32> to vector<1x1x128xf32>
    %112 = vector.shape_cast %111 : vector<1x1x128xf32> to vector<1x128xf32>
    %113 = vector.broadcast %112 : vector<1x128xf32> to vector<18x128xf32>
    %114 = arith.mulf %37, %113 : vector<18x128xf32>
    %115 = arith.truncf %114 : vector<18x128xf32> to vector<18x128xbf16>
    %cst_36 = arith.constant dense<0.000000e+00> : vector<18x18xf32>
    %116 = tpu.matmul %115, %39, %cst_36 {dimension_numbers = #tpu.dot_dimension_numbers<[1], [1], [0], [0], [0, 0, 1, 0], [], []>} : vector<18x128xbf16>, vector<18x128xbf16>, vector<18x18xf32> -> vector<18x18xf32>
    %117 = arith.addf %116, %1 : vector<18x18xf32>
    %cst_37 = arith.constant dense<0xFF800000> : vector<18xf32>
    %118 = vector.multi_reduction <maximumf>, %117, %cst_37 [1] : vector<18x18xf32> to vector<18xf32>
    %119 = vector.shape_cast %118 : vector<18xf32> to vector<18x1xf32>
    %120 = vector.broadcast %119 : vector<18x1xf32> to vector<18x18xf32>
    %121 = arith.subf %117, %120 : vector<18x18xf32>
    %122 = math.exp %121 : vector<18x18xf32>
    %cst_38 = arith.constant dense<0.000000e+00> : vector<18xf32>
    %123 = vector.multi_reduction <add>, %122, %cst_38 [1] : vector<18x18xf32> to vector<18xf32>
    %124 = vector.shape_cast %123 : vector<18xf32> to vector<18x1xf32>
    %125 = tpu.reciprocal %124 {approx = true} : vector<18x1xf32> -> vector<18x1xf32>
    %126 = vector.broadcast %125 : vector<18x1xf32> to vector<18x18xf32>
    %127 = arith.mulf %122, %126 : vector<18x18xf32>
    %128 = arith.truncf %127 : vector<18x18xf32> to vector<18x18xbf16>
    %129 = vector.broadcast %112 : vector<1x128xf32> to vector<18x128xf32>
    %130 = arith.mulf %40, %129 : vector<18x128xf32>
    %131 = arith.truncf %130 : vector<18x128xf32> to vector<18x128xbf16>
    %cst_39 = arith.constant dense<0.000000e+00> : vector<18x128xf32>
    %132 = tpu.matmul %128, %131, %cst_39 {dimension_numbers = #tpu.dot_dimension_numbers<[1], [0], [0], [1], [0, 0, 1, 1], [], []>} : vector<18x18xbf16>, vector<18x128xbf16>, vector<18x128xf32> -> vector<18x128xf32>
    %133 = arith.addf %110, %132 : vector<18x128xf32>
    %c0_40 = arith.constant 0 : index
    %c0_41 = arith.constant 0 : index
    %c0_42 = arith.constant 0 : index
    %134 = vector.load %arg7[%c0_40, %c0_41, %c0_42] : memref<2x128x128xbf16, #tpu.memory_space<vmem>>, vector<1x128x128xbf16>
    %135 = vector.shape_cast %134 : vector<1x128x128xbf16> to vector<128x128xbf16>
    %136 = arith.truncf %133 : vector<18x128xf32> to vector<18x128xbf16>
    %cst_43 = arith.constant dense<0.000000e+00> : vector<18x128xf32>
    %137 = tpu.matmul %136, %135, %cst_43 {dimension_numbers = #tpu.dot_dimension_numbers<[1], [0], [0], [1], [0, 0, 1, 1], [], []>} : vector<18x128xbf16>, vector<128x128xbf16>, vector<18x128xf32> -> vector<18x128xf32>
    %138 = arith.addf %0, %137 : vector<18x128xf32>
    %c0_44 = arith.constant 0 : index
    %c0_45 = arith.constant 0 : index
    %c0_46 = arith.constant 0 : index
    %139 = vector.load %arg8[%c0_44, %c0_45, %c0_46] : memref<2x1x128xf32, #tpu.memory_space<vmem>>, vector<1x1x128xf32>
    %140 = vector.shape_cast %139 : vector<1x1x128xf32> to vector<1x128xf32>
    %141 = vector.broadcast %140 : vector<1x128xf32> to vector<18x128xf32>
    %142 = arith.addf %138, %141 : vector<18x128xf32>
    %c0_47 = arith.constant 0 : index
    %c0_48 = arith.constant 0 : index
    %c0_49 = arith.constant 0 : index
    %143 = vector.load %arg9[%c0_47, %c0_48, %c0_49] : memref<2x1x128xf32, #tpu.memory_space<vmem>>, vector<1x1x128xf32>
    %144 = vector.shape_cast %143 : vector<1x1x128xf32> to vector<1x128xf32>
    %c0_50 = arith.constant 0 : index
    %c0_51 = arith.constant 0 : index
    %c0_52 = arith.constant 0 : index
    %145 = vector.load %arg10[%c0_50, %c0_51, %c0_52] : memref<2x1x128xf32, #tpu.memory_space<vmem>>, vector<1x1x128xf32>
    %146 = vector.shape_cast %145 : vector<1x1x128xf32> to vector<1x128xf32>
    %cst_53 = arith.constant dense<0.000000e+00> : vector<18xf32>
    %147 = vector.multi_reduction <add>, %142, %cst_53 [1] : vector<18x128xf32> to vector<18xf32>
    %148 = vector.shape_cast %147 : vector<18xf32> to vector<18x1xf32>
    %cst_54 = arith.constant 1.280000e+02 : f32
    %149 = vector.broadcast %cst_54 : f32 to vector<18x1xf32>
    %150 = arith.divf %148, %149 : vector<18x1xf32>
    %151 = vector.broadcast %150 : vector<18x1xf32> to vector<18x128xf32>
    %152 = arith.subf %142, %151 : vector<18x128xf32>
    %153 = arith.mulf %152, %152 : vector<18x128xf32>
    %cst_55 = arith.constant dense<0.000000e+00> : vector<18xf32>
    %154 = vector.multi_reduction <add>, %153, %cst_55 [1] : vector<18x128xf32> to vector<18xf32>
    %155 = vector.shape_cast %154 : vector<18xf32> to vector<18x1xf32>
    %cst_56 = arith.constant 1.280000e+02 : f32
    %156 = vector.broadcast %cst_56 : f32 to vector<18x1xf32>
    %157 = arith.divf %155, %156 : vector<18x1xf32>
    %158 = vector.broadcast %150 : vector<18x1xf32> to vector<18x128xf32>
    %159 = arith.subf %142, %158 : vector<18x128xf32>
    %cst_57 = arith.constant 9.99999974E-6 : f32
    %160 = vector.broadcast %cst_57 : f32 to vector<18x1xf32>
    %161 = arith.addf %157, %160 : vector<18x1xf32>
    %162 = math.rsqrt %161 : vector<18x1xf32>
    %163 = vector.broadcast %162 : vector<18x1xf32> to vector<18x128xf32>
    %164 = arith.mulf %159, %163 : vector<18x128xf32>
    %165 = vector.broadcast %144 : vector<1x128xf32> to vector<18x128xf32>
    %166 = arith.mulf %164, %165 : vector<18x128xf32>
    %167 = vector.broadcast %146 : vector<1x128xf32> to vector<18x128xf32>
    %168 = arith.addf %166, %167 : vector<18x128xf32>
    %c0_58 = arith.constant 0 : index
    %c0_59 = arith.constant 0 : index
    %c0_60 = arith.constant 0 : index
    %169 = vector.load %arg11[%c0_58, %c0_59, %c0_60] : memref<2x128x512xbf16, #tpu.memory_space<vmem>>, vector<1x128x512xbf16>
    %170 = vector.shape_cast %169 : vector<1x128x512xbf16> to vector<128x512xbf16>
    %171 = arith.truncf %168 : vector<18x128xf32> to vector<18x128xbf16>
    %cst_61 = arith.constant dense<0.000000e+00> : vector<18x512xf32>
    %172 = tpu.matmul %171, %170, %cst_61 {dimension_numbers = #tpu.dot_dimension_numbers<[1], [0], [0], [1], [0, 0, 1, 1], [], []>} : vector<18x128xbf16>, vector<128x512xbf16>, vector<18x512xf32> -> vector<18x512xf32>
    %c0_62 = arith.constant 0 : index
    %c0_63 = arith.constant 0 : index
    %c0_64 = arith.constant 0 : index
    %173 = vector.load %arg12[%c0_62, %c0_63, %c0_64] : memref<2x1x512xf32, #tpu.memory_space<vmem>>, vector<1x1x512xf32>
    %174 = vector.shape_cast %173 : vector<1x1x512xf32> to vector<1x512xf32>
    %175 = vector.broadcast %174 : vector<1x512xf32> to vector<18x512xf32>
    %176 = arith.addf %172, %175 : vector<18x512xf32>
    %177 = arith.mulf %176, %176 : vector<18x512xf32>
    %178 = arith.mulf %176, %177 : vector<18x512xf32>
    %cst_65 = arith.constant 4.471500e-02 : f32
    %179 = vector.broadcast %cst_65 : f32 to vector<18x512xf32>
    %180 = arith.mulf %179, %178 : vector<18x512xf32>
    %181 = arith.addf %176, %180 : vector<18x512xf32>
    %cst_66 = arith.constant 0.797884583 : f32
    %182 = vector.broadcast %cst_66 : f32 to vector<18x512xf32>
    %183 = arith.mulf %182, %181 : vector<18x512xf32>
    %184 = math.tanh %183 : vector<18x512xf32>
    %cst_67 = arith.constant 1.000000e+00 : f32
    %185 = vector.broadcast %cst_67 : f32 to vector<18x512xf32>
    %186 = arith.addf %185, %184 : vector<18x512xf32>
    %cst_68 = arith.constant 5.000000e-01 : f32
    %187 = vector.broadcast %cst_68 : f32 to vector<18x512xf32>
    %188 = arith.mulf %187, %186 : vector<18x512xf32>
    %189 = arith.mulf %176, %188 : vector<18x512xf32>
    %c0_69 = arith.constant 0 : index
    %c0_70 = arith.constant 0 : index
    %c0_71 = arith.constant 0 : index
    %190 = vector.load %arg13[%c0_69, %c0_70, %c0_71] : memref<2x512x128xbf16, #tpu.memory_space<vmem>>, vector<1x512x128xbf16>
    %191 = vector.shape_cast %190 : vector<1x512x128xbf16> to vector<512x128xbf16>
    %192 = arith.truncf %189 : vector<18x512xf32> to vector<18x512xbf16>
    %cst_72 = arith.constant dense<0.000000e+00> : vector<18x128xf32>
    %193 = tpu.matmul %192, %191, %cst_72 {dimension_numbers = #tpu.dot_dimension_numbers<[1], [0], [0], [1], [0, 0, 1, 1], [], []>} : vector<18x512xbf16>, vector<512x128xbf16>, vector<18x128xf32> -> vector<18x128xf32>
    %194 = arith.addf %142, %193 : vector<18x128xf32>
    %c0_73 = arith.constant 0 : index
    %c0_74 = arith.constant 0 : index
    %c0_75 = arith.constant 0 : index
    %195 = vector.load %arg14[%c0_73, %c0_74, %c0_75] : memref<2x1x128xf32, #tpu.memory_space<vmem>>, vector<1x1x128xf32>
    %196 = vector.shape_cast %195 : vector<1x1x128xf32> to vector<1x128xf32>
    %197 = vector.broadcast %196 : vector<1x128xf32> to vector<18x128xf32>
    %198 = arith.addf %194, %197 : vector<18x128xf32>
    %c1 = arith.constant 1 : index
    %c0_76 = arith.constant 0 : index
    %c0_77 = arith.constant 0 : index
    %199 = vector.load %arg3[%c1, %c0_76, %c0_77] : memref<2x1x128xf32, #tpu.memory_space<vmem>>, vector<1x1x128xf32>
    %200 = vector.shape_cast %199 : vector<1x1x128xf32> to vector<1x128xf32>
    %c1_78 = arith.constant 1 : index
    %c0_79 = arith.constant 0 : index
    %c0_80 = arith.constant 0 : index
    %201 = vector.load %arg4[%c1_78, %c0_79, %c0_80] : memref<2x1x128xf32, #tpu.memory_space<vmem>>, vector<1x1x128xf32>
    %202 = vector.shape_cast %201 : vector<1x1x128xf32> to vector<1x128xf32>
    %cst_81 = arith.constant dense<0.000000e+00> : vector<18xf32>
    %203 = vector.multi_reduction <add>, %198, %cst_81 [1] : vector<18x128xf32> to vector<18xf32>
    %204 = vector.shape_cast %203 : vector<18xf32> to vector<18x1xf32>
    %cst_82 = arith.constant 1.280000e+02 : f32
    %205 = vector.broadcast %cst_82 : f32 to vector<18x1xf32>
    %206 = arith.divf %204, %205 : vector<18x1xf32>
    %207 = vector.broadcast %206 : vector<18x1xf32> to vector<18x128xf32>
    %208 = arith.subf %198, %207 : vector<18x128xf32>
    %209 = arith.mulf %208, %208 : vector<18x128xf32>
    %cst_83 = arith.constant dense<0.000000e+00> : vector<18xf32>
    %210 = vector.multi_reduction <add>, %209, %cst_83 [1] : vector<18x128xf32> to vector<18xf32>
    %211 = vector.shape_cast %210 : vector<18xf32> to vector<18x1xf32>
    %cst_84 = arith.constant 1.280000e+02 : f32
    %212 = vector.broadcast %cst_84 : f32 to vector<18x1xf32>
    %213 = arith.divf %211, %212 : vector<18x1xf32>
    %214 = vector.broadcast %206 : vector<18x1xf32> to vector<18x128xf32>
    %215 = arith.subf %198, %214 : vector<18x128xf32>
    %cst_85 = arith.constant 9.99999974E-6 : f32
    %216 = vector.broadcast %cst_85 : f32 to vector<18x1xf32>
    %217 = arith.addf %213, %216 : vector<18x1xf32>
    %218 = math.rsqrt %217 : vector<18x1xf32>
    %219 = vector.broadcast %218 : vector<18x1xf32> to vector<18x128xf32>
    %220 = arith.mulf %215, %219 : vector<18x128xf32>
    %221 = vector.broadcast %200 : vector<1x128xf32> to vector<18x128xf32>
    %222 = arith.mulf %220, %221 : vector<18x128xf32>
    %223 = vector.broadcast %202 : vector<1x128xf32> to vector<18x128xf32>
    %224 = arith.addf %222, %223 : vector<18x128xf32>
    %c1_86 = arith.constant 1 : index
    %c0_87 = arith.constant 0 : index
    %c0_88 = arith.constant 0 : index
    %225 = vector.load %arg5[%c1_86, %c0_87, %c0_88] : memref<2x128x384xbf16, #tpu.memory_space<vmem>>, vector<1x128x384xbf16>
    %226 = vector.shape_cast %225 : vector<1x128x384xbf16> to vector<128x384xbf16>
    %227 = arith.truncf %224 : vector<18x128xf32> to vector<18x128xbf16>
    %cst_89 = arith.constant dense<0.000000e+00> : vector<18x384xf32>
    %228 = tpu.matmul %227, %226, %cst_89 {dimension_numbers = #tpu.dot_dimension_numbers<[1], [0], [0], [1], [0, 0, 1, 1], [], []>} : vector<18x128xbf16>, vector<128x384xbf16>, vector<18x384xf32> -> vector<18x384xf32>
    %c1_90 = arith.constant 1 : index
    %c0_91 = arith.constant 0 : index
    %c0_92 = arith.constant 0 : index
    %229 = vector.load %arg6[%c1_90, %c0_91, %c0_92] : memref<2x1x384xf32, #tpu.memory_space<vmem>>, vector<1x1x384xf32>
    %230 = vector.shape_cast %229 : vector<1x1x384xf32> to vector<1x384xf32>
    %231 = vector.broadcast %230 : vector<1x384xf32> to vector<18x384xf32>
    %232 = arith.addf %228, %231 : vector<18x384xf32>
    %233 = vector.extract_strided_slice %232 {offsets = [0, 0], sizes = [18, 128], strides = [1, 1]} : vector<18x384xf32> to vector<18x128xf32>
    %234 = vector.extract_strided_slice %232 {offsets = [0, 128], sizes = [18, 128], strides = [1, 1]} : vector<18x384xf32> to vector<18x128xf32>
    %235 = arith.truncf %234 : vector<18x128xf32> to vector<18x128xbf16>
    %236 = vector.extract_strided_slice %232 {offsets = [0, 256], sizes = [18, 128], strides = [1, 1]} : vector<18x384xf32> to vector<18x128xf32>
    %cst_93 = arith.constant 0.000000e+00 : f32
    %237 = vector.broadcast %cst_93 : f32 to vector<18x128xf32>
    %238 = vector.extract_strided_slice %2 {offsets = [0, 0, 0], sizes = [1, 1, 128], strides = [1, 1, 1]} : vector<4x1x128xf32> to vector<1x1x128xf32>
    %239 = vector.shape_cast %238 : vector<1x1x128xf32> to vector<1x128xf32>
    %240 = vector.broadcast %239 : vector<1x128xf32> to vector<18x128xf32>
    %241 = arith.mulf %233, %240 : vector<18x128xf32>
    %242 = arith.truncf %241 : vector<18x128xf32> to vector<18x128xbf16>
    %cst_94 = arith.constant dense<0.000000e+00> : vector<18x18xf32>
    %243 = tpu.matmul %242, %235, %cst_94 {dimension_numbers = #tpu.dot_dimension_numbers<[1], [1], [0], [0], [0, 0, 1, 0], [], []>} : vector<18x128xbf16>, vector<18x128xbf16>, vector<18x18xf32> -> vector<18x18xf32>
    %244 = arith.addf %243, %1 : vector<18x18xf32>
    %cst_95 = arith.constant dense<0xFF800000> : vector<18xf32>
    %245 = vector.multi_reduction <maximumf>, %244, %cst_95 [1] : vector<18x18xf32> to vector<18xf32>
    %246 = vector.shape_cast %245 : vector<18xf32> to vector<18x1xf32>
    %247 = vector.broadcast %246 : vector<18x1xf32> to vector<18x18xf32>
    %248 = arith.subf %244, %247 : vector<18x18xf32>
    %249 = math.exp %248 : vector<18x18xf32>
    %cst_96 = arith.constant dense<0.000000e+00> : vector<18xf32>
    %250 = vector.multi_reduction <add>, %249, %cst_96 [1] : vector<18x18xf32> to vector<18xf32>
    %251 = vector.shape_cast %250 : vector<18xf32> to vector<18x1xf32>
    %252 = tpu.reciprocal %251 {approx = true} : vector<18x1xf32> -> vector<18x1xf32>
    %253 = vector.broadcast %252 : vector<18x1xf32> to vector<18x18xf32>
    %254 = arith.mulf %249, %253 : vector<18x18xf32>
    %255 = arith.truncf %254 : vector<18x18xf32> to vector<18x18xbf16>
    %256 = vector.broadcast %239 : vector<1x128xf32> to vector<18x128xf32>
    %257 = arith.mulf %236, %256 : vector<18x128xf32>
    %258 = arith.truncf %257 : vector<18x128xf32> to vector<18x128xbf16>
    %cst_97 = arith.constant dense<0.000000e+00> : vector<18x128xf32>
    %259 = tpu.matmul %255, %258, %cst_97 {dimension_numbers = #tpu.dot_dimension_numbers<[1], [0], [0], [1], [0, 0, 1, 1], [], []>} : vector<18x18xbf16>, vector<18x128xbf16>, vector<18x128xf32> -> vector<18x128xf32>
    %260 = arith.addf %237, %259 : vector<18x128xf32>
    %261 = vector.extract_strided_slice %2 {offsets = [1, 0, 0], sizes = [1, 1, 128], strides = [1, 1, 1]} : vector<4x1x128xf32> to vector<1x1x128xf32>
    %262 = vector.shape_cast %261 : vector<1x1x128xf32> to vector<1x128xf32>
    %263 = vector.broadcast %262 : vector<1x128xf32> to vector<18x128xf32>
    %264 = arith.mulf %233, %263 : vector<18x128xf32>
    %265 = arith.truncf %264 : vector<18x128xf32> to vector<18x128xbf16>
    %cst_98 = arith.constant dense<0.000000e+00> : vector<18x18xf32>
    %266 = tpu.matmul %265, %235, %cst_98 {dimension_numbers = #tpu.dot_dimension_numbers<[1], [1], [0], [0], [0, 0, 1, 0], [], []>} : vector<18x128xbf16>, vector<18x128xbf16>, vector<18x18xf32> -> vector<18x18xf32>
    %267 = arith.addf %266, %1 : vector<18x18xf32>
    %cst_99 = arith.constant dense<0xFF800000> : vector<18xf32>
    %268 = vector.multi_reduction <maximumf>, %267, %cst_99 [1] : vector<18x18xf32> to vector<18xf32>
    %269 = vector.shape_cast %268 : vector<18xf32> to vector<18x1xf32>
    %270 = vector.broadcast %269 : vector<18x1xf32> to vector<18x18xf32>
    %271 = arith.subf %267, %270 : vector<18x18xf32>
    %272 = math.exp %271 : vector<18x18xf32>
    %cst_100 = arith.constant dense<0.000000e+00> : vector<18xf32>
    %273 = vector.multi_reduction <add>, %272, %cst_100 [1] : vector<18x18xf32> to vector<18xf32>
    %274 = vector.shape_cast %273 : vector<18xf32> to vector<18x1xf32>
    %275 = tpu.reciprocal %274 {approx = true} : vector<18x1xf32> -> vector<18x1xf32>
    %276 = vector.broadcast %275 : vector<18x1xf32> to vector<18x18xf32>
    %277 = arith.mulf %272, %276 : vector<18x18xf32>
    %278 = arith.truncf %277 : vector<18x18xf32> to vector<18x18xbf16>
    %279 = vector.broadcast %262 : vector<1x128xf32> to vector<18x128xf32>
    %280 = arith.mulf %236, %279 : vector<18x128xf32>
    %281 = arith.truncf %280 : vector<18x128xf32> to vector<18x128xbf16>
    %cst_101 = arith.constant dense<0.000000e+00> : vector<18x128xf32>
    %282 = tpu.matmul %278, %281, %cst_101 {dimension_numbers = #tpu.dot_dimension_numbers<[1], [0], [0], [1], [0, 0, 1, 1], [], []>} : vector<18x18xbf16>, vector<18x128xbf16>, vector<18x128xf32> -> vector<18x128xf32>
    %283 = arith.addf %260, %282 : vector<18x128xf32>
    %284 = vector.extract_strided_slice %2 {offsets = [2, 0, 0], sizes = [1, 1, 128], strides = [1, 1, 1]} : vector<4x1x128xf32> to vector<1x1x128xf32>
    %285 = vector.shape_cast %284 : vector<1x1x128xf32> to vector<1x128xf32>
    %286 = vector.broadcast %285 : vector<1x128xf32> to vector<18x128xf32>
    %287 = arith.mulf %233, %286 : vector<18x128xf32>
    %288 = arith.truncf %287 : vector<18x128xf32> to vector<18x128xbf16>
    %cst_102 = arith.constant dense<0.000000e+00> : vector<18x18xf32>
    %289 = tpu.matmul %288, %235, %cst_102 {dimension_numbers = #tpu.dot_dimension_numbers<[1], [1], [0], [0], [0, 0, 1, 0], [], []>} : vector<18x128xbf16>, vector<18x128xbf16>, vector<18x18xf32> -> vector<18x18xf32>
    %290 = arith.addf %289, %1 : vector<18x18xf32>
    %cst_103 = arith.constant dense<0xFF800000> : vector<18xf32>
    %291 = vector.multi_reduction <maximumf>, %290, %cst_103 [1] : vector<18x18xf32> to vector<18xf32>
    %292 = vector.shape_cast %291 : vector<18xf32> to vector<18x1xf32>
    %293 = vector.broadcast %292 : vector<18x1xf32> to vector<18x18xf32>
    %294 = arith.subf %290, %293 : vector<18x18xf32>
    %295 = math.exp %294 : vector<18x18xf32>
    %cst_104 = arith.constant dense<0.000000e+00> : vector<18xf32>
    %296 = vector.multi_reduction <add>, %295, %cst_104 [1] : vector<18x18xf32> to vector<18xf32>
    %297 = vector.shape_cast %296 : vector<18xf32> to vector<18x1xf32>
    %298 = tpu.reciprocal %297 {approx = true} : vector<18x1xf32> -> vector<18x1xf32>
    %299 = vector.broadcast %298 : vector<18x1xf32> to vector<18x18xf32>
    %300 = arith.mulf %295, %299 : vector<18x18xf32>
    %301 = arith.truncf %300 : vector<18x18xf32> to vector<18x18xbf16>
    %302 = vector.broadcast %285 : vector<1x128xf32> to vector<18x128xf32>
    %303 = arith.mulf %236, %302 : vector<18x128xf32>
    %304 = arith.truncf %303 : vector<18x128xf32> to vector<18x128xbf16>
    %cst_105 = arith.constant dense<0.000000e+00> : vector<18x128xf32>
    %305 = tpu.matmul %301, %304, %cst_105 {dimension_numbers = #tpu.dot_dimension_numbers<[1], [0], [0], [1], [0, 0, 1, 1], [], []>} : vector<18x18xbf16>, vector<18x128xbf16>, vector<18x128xf32> -> vector<18x128xf32>
    %306 = arith.addf %283, %305 : vector<18x128xf32>
    %307 = vector.extract_strided_slice %2 {offsets = [3, 0, 0], sizes = [1, 1, 128], strides = [1, 1, 1]} : vector<4x1x128xf32> to vector<1x1x128xf32>
    %308 = vector.shape_cast %307 : vector<1x1x128xf32> to vector<1x128xf32>
    %309 = vector.broadcast %308 : vector<1x128xf32> to vector<18x128xf32>
    %310 = arith.mulf %233, %309 : vector<18x128xf32>
    %311 = arith.truncf %310 : vector<18x128xf32> to vector<18x128xbf16>
    %cst_106 = arith.constant dense<0.000000e+00> : vector<18x18xf32>
    %312 = tpu.matmul %311, %235, %cst_106 {dimension_numbers = #tpu.dot_dimension_numbers<[1], [1], [0], [0], [0, 0, 1, 0], [], []>} : vector<18x128xbf16>, vector<18x128xbf16>, vector<18x18xf32> -> vector<18x18xf32>
    %313 = arith.addf %312, %1 : vector<18x18xf32>
    %cst_107 = arith.constant dense<0xFF800000> : vector<18xf32>
    %314 = vector.multi_reduction <maximumf>, %313, %cst_107 [1] : vector<18x18xf32> to vector<18xf32>
    %315 = vector.shape_cast %314 : vector<18xf32> to vector<18x1xf32>
    %316 = vector.broadcast %315 : vector<18x1xf32> to vector<18x18xf32>
    %317 = arith.subf %313, %316 : vector<18x18xf32>
    %318 = math.exp %317 : vector<18x18xf32>
    %cst_108 = arith.constant dense<0.000000e+00> : vector<18xf32>
    %319 = vector.multi_reduction <add>, %318, %cst_108 [1] : vector<18x18xf32> to vector<18xf32>
    %320 = vector.shape_cast %319 : vector<18xf32> to vector<18x1xf32>
    %321 = tpu.reciprocal %320 {approx = true} : vector<18x1xf32> -> vector<18x1xf32>
    %322 = vector.broadcast %321 : vector<18x1xf32> to vector<18x18xf32>
    %323 = arith.mulf %318, %322 : vector<18x18xf32>
    %324 = arith.truncf %323 : vector<18x18xf32> to vector<18x18xbf16>
    %325 = vector.broadcast %308 : vector<1x128xf32> to vector<18x128xf32>
    %326 = arith.mulf %236, %325 : vector<18x128xf32>
    %327 = arith.truncf %326 : vector<18x128xf32> to vector<18x128xbf16>
    %cst_109 = arith.constant dense<0.000000e+00> : vector<18x128xf32>
    %328 = tpu.matmul %324, %327, %cst_109 {dimension_numbers = #tpu.dot_dimension_numbers<[1], [0], [0], [1], [0, 0, 1, 1], [], []>} : vector<18x18xbf16>, vector<18x128xbf16>, vector<18x128xf32> -> vector<18x128xf32>
    %329 = arith.addf %306, %328 : vector<18x128xf32>
    %c1_110 = arith.constant 1 : index
    %c0_111 = arith.constant 0 : index
    %c0_112 = arith.constant 0 : index
    %330 = vector.load %arg7[%c1_110, %c0_111, %c0_112] : memref<2x128x128xbf16, #tpu.memory_space<vmem>>, vector<1x128x128xbf16>
    %331 = vector.shape_cast %330 : vector<1x128x128xbf16> to vector<128x128xbf16>
    %332 = arith.truncf %329 : vector<18x128xf32> to vector<18x128xbf16>
    %cst_113 = arith.constant dense<0.000000e+00> : vector<18x128xf32>
    %333 = tpu.matmul %332, %331, %cst_113 {dimension_numbers = #tpu.dot_dimension_numbers<[1], [0], [0], [1], [0, 0, 1, 1], [], []>} : vector<18x128xbf16>, vector<128x128xbf16>, vector<18x128xf32> -> vector<18x128xf32>
    %334 = arith.addf %198, %333 : vector<18x128xf32>
    %c1_114 = arith.constant 1 : index
    %c0_115 = arith.constant 0 : index
    %c0_116 = arith.constant 0 : index
    %335 = vector.load %arg8[%c1_114, %c0_115, %c0_116] : memref<2x1x128xf32, #tpu.memory_space<vmem>>, vector<1x1x128xf32>
    %336 = vector.shape_cast %335 : vector<1x1x128xf32> to vector<1x128xf32>
    %337 = vector.broadcast %336 : vector<1x128xf32> to vector<18x128xf32>
    %338 = arith.addf %334, %337 : vector<18x128xf32>
    %c1_117 = arith.constant 1 : index
    %c0_118 = arith.constant 0 : index
    %c0_119 = arith.constant 0 : index
    %339 = vector.load %arg9[%c1_117, %c0_118, %c0_119] : memref<2x1x128xf32, #tpu.memory_space<vmem>>, vector<1x1x128xf32>
    %340 = vector.shape_cast %339 : vector<1x1x128xf32> to vector<1x128xf32>
    %c1_120 = arith.constant 1 : index
    %c0_121 = arith.constant 0 : index
    %c0_122 = arith.constant 0 : index
    %341 = vector.load %arg10[%c1_120, %c0_121, %c0_122] : memref<2x1x128xf32, #tpu.memory_space<vmem>>, vector<1x1x128xf32>
    %342 = vector.shape_cast %341 : vector<1x1x128xf32> to vector<1x128xf32>
    %cst_123 = arith.constant dense<0.000000e+00> : vector<18xf32>
    %343 = vector.multi_reduction <add>, %338, %cst_123 [1] : vector<18x128xf32> to vector<18xf32>
    %344 = vector.shape_cast %343 : vector<18xf32> to vector<18x1xf32>
    %cst_124 = arith.constant 1.280000e+02 : f32
    %345 = vector.broadcast %cst_124 : f32 to vector<18x1xf32>
    %346 = arith.divf %344, %345 : vector<18x1xf32>
    %347 = vector.broadcast %346 : vector<18x1xf32> to vector<18x128xf32>
    %348 = arith.subf %338, %347 : vector<18x128xf32>
    %349 = arith.mulf %348, %348 : vector<18x128xf32>
    %cst_125 = arith.constant dense<0.000000e+00> : vector<18xf32>
    %350 = vector.multi_reduction <add>, %349, %cst_125 [1] : vector<18x128xf32> to vector<18xf32>
    %351 = vector.shape_cast %350 : vector<18xf32> to vector<18x1xf32>
    %cst_126 = arith.constant 1.280000e+02 : f32
    %352 = vector.broadcast %cst_126 : f32 to vector<18x1xf32>
    %353 = arith.divf %351, %352 : vector<18x1xf32>
    %354 = vector.broadcast %346 : vector<18x1xf32> to vector<18x128xf32>
    %355 = arith.subf %338, %354 : vector<18x128xf32>
    %cst_127 = arith.constant 9.99999974E-6 : f32
    %356 = vector.broadcast %cst_127 : f32 to vector<18x1xf32>
    %357 = arith.addf %353, %356 : vector<18x1xf32>
    %358 = math.rsqrt %357 : vector<18x1xf32>
    %359 = vector.broadcast %358 : vector<18x1xf32> to vector<18x128xf32>
    %360 = arith.mulf %355, %359 : vector<18x128xf32>
    %361 = vector.broadcast %340 : vector<1x128xf32> to vector<18x128xf32>
    %362 = arith.mulf %360, %361 : vector<18x128xf32>
    %363 = vector.broadcast %342 : vector<1x128xf32> to vector<18x128xf32>
    %364 = arith.addf %362, %363 : vector<18x128xf32>
    %c1_128 = arith.constant 1 : index
    %c0_129 = arith.constant 0 : index
    %c0_130 = arith.constant 0 : index
    %365 = vector.load %arg11[%c1_128, %c0_129, %c0_130] : memref<2x128x512xbf16, #tpu.memory_space<vmem>>, vector<1x128x512xbf16>
    %366 = vector.shape_cast %365 : vector<1x128x512xbf16> to vector<128x512xbf16>
    %367 = arith.truncf %364 : vector<18x128xf32> to vector<18x128xbf16>
    %cst_131 = arith.constant dense<0.000000e+00> : vector<18x512xf32>
    %368 = tpu.matmul %367, %366, %cst_131 {dimension_numbers = #tpu.dot_dimension_numbers<[1], [0], [0], [1], [0, 0, 1, 1], [], []>} : vector<18x128xbf16>, vector<128x512xbf16>, vector<18x512xf32> -> vector<18x512xf32>
    %c1_132 = arith.constant 1 : index
    %c0_133 = arith.constant 0 : index
    %c0_134 = arith.constant 0 : index
    %369 = vector.load %arg12[%c1_132, %c0_133, %c0_134] : memref<2x1x512xf32, #tpu.memory_space<vmem>>, vector<1x1x512xf32>
    %370 = vector.shape_cast %369 : vector<1x1x512xf32> to vector<1x512xf32>
    %371 = vector.broadcast %370 : vector<1x512xf32> to vector<18x512xf32>
    %372 = arith.addf %368, %371 : vector<18x512xf32>
    %373 = arith.mulf %372, %372 : vector<18x512xf32>
    %374 = arith.mulf %372, %373 : vector<18x512xf32>
    %cst_135 = arith.constant 4.471500e-02 : f32
    %375 = vector.broadcast %cst_135 : f32 to vector<18x512xf32>
    %376 = arith.mulf %375, %374 : vector<18x512xf32>
    %377 = arith.addf %372, %376 : vector<18x512xf32>
    %cst_136 = arith.constant 0.797884583 : f32
    %378 = vector.broadcast %cst_136 : f32 to vector<18x512xf32>
    %379 = arith.mulf %378, %377 : vector<18x512xf32>
    %380 = math.tanh %379 : vector<18x512xf32>
    %cst_137 = arith.constant 1.000000e+00 : f32
    %381 = vector.broadcast %cst_137 : f32 to vector<18x512xf32>
    %382 = arith.addf %381, %380 : vector<18x512xf32>
    %cst_138 = arith.constant 5.000000e-01 : f32
    %383 = vector.broadcast %cst_138 : f32 to vector<18x512xf32>
    %384 = arith.mulf %383, %382 : vector<18x512xf32>
    %385 = arith.mulf %372, %384 : vector<18x512xf32>
    %c1_139 = arith.constant 1 : index
    %c0_140 = arith.constant 0 : index
    %c0_141 = arith.constant 0 : index
    %386 = vector.load %arg13[%c1_139, %c0_140, %c0_141] : memref<2x512x128xbf16, #tpu.memory_space<vmem>>, vector<1x512x128xbf16>
    %387 = vector.shape_cast %386 : vector<1x512x128xbf16> to vector<512x128xbf16>
    %388 = arith.truncf %385 : vector<18x512xf32> to vector<18x512xbf16>
    %cst_142 = arith.constant dense<0.000000e+00> : vector<18x128xf32>
    %389 = tpu.matmul %388, %387, %cst_142 {dimension_numbers = #tpu.dot_dimension_numbers<[1], [0], [0], [1], [0, 0, 1, 1], [], []>} : vector<18x512xbf16>, vector<512x128xbf16>, vector<18x128xf32> -> vector<18x128xf32>
    %390 = arith.addf %338, %389 : vector<18x128xf32>
    %c1_143 = arith.constant 1 : index
    %c0_144 = arith.constant 0 : index
    %c0_145 = arith.constant 0 : index
    %391 = vector.load %arg14[%c1_143, %c0_144, %c0_145] : memref<2x1x128xf32, #tpu.memory_space<vmem>>, vector<1x1x128xf32>
    %392 = vector.shape_cast %391 : vector<1x1x128xf32> to vector<1x128xf32>
    %393 = vector.broadcast %392 : vector<1x128xf32> to vector<18x128xf32>
    %394 = arith.addf %390, %393 : vector<18x128xf32>
    %395 = vector.extract_strided_slice %394 {offsets = [0, 0], sizes = [1, 128], strides = [1, 1]} : vector<18x128xf32> to vector<1x128xf32>
    %396 = vector.extract_strided_slice %394 {offsets = [9, 0], sizes = [1, 128], strides = [1, 1]} : vector<18x128xf32> to vector<1x128xf32>
    %397 = tpu.concatenate %395, %396 in 0 : vector<1x128xf32>, vector<1x128xf32> -> vector<2x128xf32>
    %c0_146 = arith.constant 0 : index
    %c0_147 = arith.constant 0 : index
    %398 = vector.load %arg15[%c0_146, %c0_147] : memref<1x128xf32, #tpu.memory_space<vmem>>, vector<1x128xf32>
    %c0_148 = arith.constant 0 : index
    %c0_149 = arith.constant 0 : index
    %399 = vector.load %arg16[%c0_148, %c0_149] : memref<1x128xf32, #tpu.memory_space<vmem>>, vector<1x128xf32>
    %cst_150 = arith.constant dense<0.000000e+00> : vector<2xf32>
    %400 = vector.multi_reduction <add>, %397, %cst_150 [1] : vector<2x128xf32> to vector<2xf32>
    %401 = vector.shape_cast %400 : vector<2xf32> to vector<2x1xf32>
    %cst_151 = arith.constant 1.280000e+02 : f32
    %402 = vector.broadcast %cst_151 : f32 to vector<2x1xf32>
    %403 = arith.divf %401, %402 : vector<2x1xf32>
    %404 = vector.broadcast %403 : vector<2x1xf32> to vector<2x128xf32>
    %405 = arith.subf %397, %404 : vector<2x128xf32>
    %406 = arith.mulf %405, %405 : vector<2x128xf32>
    %cst_152 = arith.constant dense<0.000000e+00> : vector<2xf32>
    %407 = vector.multi_reduction <add>, %406, %cst_152 [1] : vector<2x128xf32> to vector<2xf32>
    %408 = vector.shape_cast %407 : vector<2xf32> to vector<2x1xf32>
    %cst_153 = arith.constant 1.280000e+02 : f32
    %409 = vector.broadcast %cst_153 : f32 to vector<2x1xf32>
    %410 = arith.divf %408, %409 : vector<2x1xf32>
    %411 = vector.broadcast %403 : vector<2x1xf32> to vector<2x128xf32>
    %412 = arith.subf %397, %411 : vector<2x128xf32>
    %cst_154 = arith.constant 9.99999974E-6 : f32
    %413 = vector.broadcast %cst_154 : f32 to vector<2x1xf32>
    %414 = arith.addf %410, %413 : vector<2x1xf32>
    %415 = math.rsqrt %414 : vector<2x1xf32>
    %416 = vector.broadcast %415 : vector<2x1xf32> to vector<2x128xf32>
    %417 = arith.mulf %412, %416 : vector<2x128xf32>
    %418 = vector.broadcast %398 : vector<1x128xf32> to vector<2x128xf32>
    %419 = arith.mulf %417, %418 : vector<2x128xf32>
    %420 = vector.broadcast %399 : vector<1x128xf32> to vector<2x128xf32>
    %421 = arith.addf %419, %420 : vector<2x128xf32>
    %c0_155 = arith.constant 0 : index
    %c0_156 = arith.constant 0 : index
    %422 = vector.load %arg17[%c0_155, %c0_156] : memref<128x128xbf16, #tpu.memory_space<vmem>>, vector<128x128xbf16>
    %423 = arith.truncf %421 : vector<2x128xf32> to vector<2x128xbf16>
    %cst_157 = arith.constant dense<0.000000e+00> : vector<2x128xf32>
    %424 = tpu.matmul %423, %422, %cst_157 {dimension_numbers = #tpu.dot_dimension_numbers<[1], [0], [0], [1], [0, 0, 1, 1], [], []>} : vector<2x128xbf16>, vector<128x128xbf16>, vector<2x128xf32> -> vector<2x128xf32>
    %c0_158 = arith.constant 0 : index
    %c0_159 = arith.constant 0 : index
    %425 = vector.load %arg18[%c0_158, %c0_159] : memref<2x128xf32, #tpu.memory_space<vmem>>, vector<2x128xf32>
    tpu.vector_store %arg18[%c0_158, %c0_159], %424 {strides = array<i32>} : memref<2x128xf32, #tpu.memory_space<vmem>>, vector<2x128xf32>,
    return
  }
}

</mosaic_0001>

<bundles_post_ra>
// kernel: tpu_custom_call.1
= control target key start
LH: loop header
LB: loop body
LE: loop exit
PB: predicated region body
PF: predicated region fallthrough
CT: control target
= control target key end

     0   :  { %s6560_s0 = inlined_call_operand.hbm [shape: f32[18,128], index: 0, kind: input, shape index: {}]   ;;  %s6561_s1 = inlined_call_operand.hbm [shape: f32[18,18], index: 1, kind: input, shape index: {}]   ;;  %s6562_s2 = inlined_call_operand.hbm [shape: f32[4,1,128], index: 2, kind: input, shape index: {}]   ;;  %s6563_s3 = inlined_call_operand.vmem [shape: f32[2,1,128], index: 3, kind: input, shape index: {}]   ;;  %s6564_s4 = inlined_call_operand.hbm [shape: f32[2,1,128], index: 4, kind: input, shape index: {}]   ;;  %s6565_s5 = inlined_call_operand.hbm [shape: bf16[2,128,384], index: 5, kind: input, shape index: {}]   ;;  %s6566_s6 = inlined_call_operand.vmem [shape: f32[2,1,384], index: 6, kind: input, shape index: {}]   ;;  %s6567_s7 = inlined_call_operand.hbm [shape: bf16[2,128,128], index: 7, kind: input, shape index: {}]   ;;  %s6568_s8 = inlined_call_operand.hbm [shape: f32[2,1,128], index: 8, kind: input, shape index: {}]   ;;  %s6569_s9 = inlined_call_operand.hbm [shape: f32[2,1,128], index: 9, kind: input, shape index: {}]   ;;  %s6570_s10 = inlined_call_operand.vmem [shape: f32[2,1,128], index: 10, kind: input, shape index: {}]   ;;  %s6571_s11 = inlined_call_operand.hbm [shape: bf16[2,128,512], index: 11, kind: input, shape index: {}]   ;;  %s6572_s12 = inlined_call_operand.vmem [shape: f32[2,1,512], index: 12, kind: input, shape index: {}]   ;;  %s6573_s13 = inlined_call_operand.hbm [shape: bf16[2,512,128], index: 13, kind: input, shape index: {}]   ;;  %s6574_s14 = inlined_call_operand.vmem [shape: f32[2,1,128], index: 14, kind: input, shape index: {}]   ;;  %s6575_s15 = inlined_call_operand.vmem [shape: f32[1,128], index: 15, kind: input, shape index: {}]   ;;  %s6576_s16 = inlined_call_operand.vmem [shape: f32[1,128], index: 16, kind: input, shape index: {}]   ;;  %s6577_s17 = inlined_call_operand.hbm [shape: bf16[128,128], index: 17, kind: input, shape index: {}]   ;;  %s6578_s18 = inlined_call_operand.hbm [shape: f32[2,128], index: 18, kind: output, shape index: {}]  }
   0x1   :  { %6579 = sst [smem:[#allocation28_spill]] %s6560_s0 }
   0x2   :  { %6580 = sst [smem:[#allocation29_spill]] %s6561_s1 }
   0x3   :  { %6581 = sst [smem:[#allocation30_spill]] %s6562_s2 }
   0x4   :  { %23 = vsyncpa [#allocation3], 0 }
   0x5   :  { %24 = vsyncpa [#allocation6], 0 }
   0x6   :  { %25 = vsyncpa [#allocation9], 0 }
   0x7   :  { %26 = vsyncpa [#allocation12], 0 }
   0x8   :  { %27 = vsyncpa [#allocation15], 0 }
   0x9   :  { %28 = vsyncpa [#allocation18], 0 }
   0xa   :  { %29 = vsyncpa [#allocation4], 0  ;;  %s5663_s27 = smov [#allocation5]  }
   0xb   :  { %s47_s28 = sshll.u32 %s5663_s27, 4  ;;  %s48_s28 = int_to_ptr.vmem [resolvable:$true] %s47_s28 }
   0xc   :  { %s5417_s29 = scalar_lea.vmem %s48_s28, 384  ;;  %p5422_p1 = scmp.lt.s32.totalorder %s48_s28, %s48_s28 }
   0xd   :  { %p5418_p0 = scmp.ne.s32.totalorder %s48_s28, %s5417_s29  ;;  %p5423_p2 = scmp.lt.s32.totalorder %s5417_s29, %s5417_s29 }
   0xf   :  { %p5424_p3 = por %p5423_p2, %p5422_p1 }
  0x11   :  { %p5425_p4 = pnand %p5424_p3, %p5418_p0 }
  0x13   :  { %5428 = shalt.err (!%p5425_p4)
}
  0x14   :  { %s5664_s30 = smov 128   ;;  %s5665_s0 = smov 8  }
  0x15   :  { %s6582_s20 = sld [smem:[#allocation29_spill]]  ;;  %s5666_s21 = smov [#allocation8]  }
  0x16   :  { %s73_s22 = sshll.u32 %s5666_s21, 4  ;;  %s5667_s2 = smov [#allocation11]   ;;  %s74_s22 = int_to_ptr.vmem [resolvable:$true] %s73_s22 }
  0x17   :  { %s99_s23 = sshll.u32 %s5667_s2, 4  ;;  %s5437_s24 = scalar_lea.vmem %s74_s22, 32  ;;  %s100_s23 = int_to_ptr.vmem [resolvable:$true] %s99_s23 }
  0x18   :  { %p5438_p5 = scmp.ne.s32.totalorder %s74_s22, %s5437_s24  ;;  %p5442_p6 = scmp.lt.s32.totalorder %s74_s22, %s74_s22 }
  0x19   :  { %p5443_p7 = scmp.lt.s32.totalorder %s5437_s24, %s5437_s24 }
  0x1b   :  { %53 = dma.hbm_to_vmem [thread:$0]  %s6582_s20, 384, %s48_s28, [#allocation6], %s5664_s30, %s5664_s30, %s5665_s0  }
  0x1c   :  { %p5444_p8 = por %p5443_p7, %p5442_p6 }
  0x1e   :  { %p5445_p9 = pnand %p5444_p8, %p5438_p5 }
  0x20   :  { %5448 = shalt.err (!%p5445_p9)
}
  0x21   :  { %s5668_s25 = smov 16   ;;  %s5669_s26 = smov 1  }
  0x22   :  { %79 = dma.hbm_to_vmem [thread:$0]  %s6564_s4, 32, %s74_s22, [#allocation9], %s5668_s25, %s5668_s25, %s5669_s26  }
  0x23   :  { %s5457_s28 = scalar_lea.vmem %s100_s23, 2048  ;;  %p5462_p11 = scmp.lt.s32.totalorder %s100_s23, %s100_s23 }
  0x24   :  { %p5458_p10 = scmp.ne.s32.totalorder %s100_s23, %s5457_s28  ;;  %p5463_p12 = scmp.lt.s32.totalorder %s5457_s28, %s5457_s28 }
  0x26   :  { %p5464_p13 = por %p5463_p12, %p5462_p11 }
  0x28   :  { %p5465_p0 = pnand %p5464_p13, %p5458_p10 }
  0x2a   :  { %5468 = shalt.err (!%p5465_p0)
}
  0x2b   :  { %s5670_s19 = smov 64   ;;  %s5671_s1 = smov 4  }
  0x2c   :  { %105 = dma.hbm_to_vmem [thread:$0]  %s6567_s7, 2048, %s100_s23, [#allocation12], %s5670_s19, %s5670_s19, %s5671_s1  }
  0x2d   :  { %s5672_s2 = smov [#allocation14]   ;;  %s5673_s4 = smov [#allocation17]  }
  0x2e   :  { %s123_s24 = sshll.u32 %s5672_s2, 4  ;;  %s151_s22 = sshll.u32 %s5673_s4, 4  ;;  %s124_s24 = int_to_ptr.vmem [resolvable:$true] %s123_s24  ;;  %s152_s22 = int_to_ptr.vmem [resolvable:$true] %s151_s22 }
  0x2f   :  { %s5477_s27 = scalar_lea.vmem %s124_s24, 32  ;;  %p5482_p2 = scmp.lt.s32.totalorder %s124_s24, %s124_s24 }
  0x30   :  { %p5478_p1 = scmp.ne.s32.totalorder %s124_s24, %s5477_s27  ;;  %p5483_p3 = scmp.lt.s32.totalorder %s5477_s27, %s5477_s27 }
  0x32   :  { %p5484_p4 = por %p5483_p3, %p5482_p2 }
  0x34   :  { %p5485_p5 = pnand %p5484_p4, %p5478_p1 }
  0x36   :  { %5488 = shalt.err (!%p5485_p5)
}
  0x37   :  { %129 = dma.hbm_to_vmem [thread:$0]  %s6569_s9, 32, %s124_s24, [#allocation15], %s5668_s25, %s5668_s25, %s5669_s26  }
  0x38   :  { %s5497_s7 = scalar_lea.vmem %s152_s22, 8192  ;;  %p5502_p7 = scmp.lt.s32.totalorder %s152_s22, %s152_s22 }
  0x39   :  { %p5498_p6 = scmp.ne.s32.totalorder %s152_s22, %s5497_s7  ;;  %p5503_p8 = scmp.lt.s32.totalorder %s5497_s7, %s5497_s7 }
  0x3b   :  { %p5504_p9 = por %p5503_p8, %p5502_p7 }
  0x3d   :  { %p5505_p10 = pnand %p5504_p9, %p5498_p6 }
  0x3f   :  { %5508 = shalt.err (!%p5505_p10)
}
  0x40   :  { %157 = dma.hbm_to_vmem [thread:$0]  %s6573_s13, 8192, %s152_s22, [#allocation18], %s5670_s19, %s5670_s19, %s5671_s1  }
  0x41   :  { %s5674_s21 = smov [#allocation2]   ;;  %s5675_s4 = smov [#allocation7]  }
  0x42   :  { %s35_s2 = sshll.u32 %s5674_s21, 4  ;;  %s59_s9 = sshll.u32 %s5675_s4, 4  ;;  %s36_s2 = int_to_ptr.vmem [resolvable:$true] %s35_s2  ;;  %s60_s9 = int_to_ptr.vmem [resolvable:$true] %s59_s9 }
  0x43   :  { %s5517_s24 = scalar_lea.vmem %s36_s2, 384  ;;  %p5522_p12 = scmp.lt.s32.totalorder %s36_s2, %s36_s2 }
  0x44   :  { %p5518_p11 = scmp.ne.s32.totalorder %s36_s2, %s5517_s24  ;;  %p5523_p13 = scmp.lt.s32.totalorder %s5517_s24, %s5517_s24 }
  0x46   :  { %p5524_p0 = por %p5523_p13, %p5522_p12 }
  0x48   :  { %p5525_p1 = pnand %p5524_p0, %p5518_p11 }
  0x4a   :  { %5528 = shalt.err (!%p5525_p1)
}
  0x4b   :  { %s6583_s28 = sld [smem:[#allocation28_spill]]  ;;  %s5537_s13 = scalar_lea.vmem %s60_s9, 64 }
  0x4c   :  { %p5538_p2 = scmp.ne.s32.totalorder %s60_s9, %s5537_s13  ;;  %p5542_p3 = scmp.lt.s32.totalorder %s60_s9, %s60_s9 }
  0x4d   :  { %p5543_p4 = scmp.lt.s32.totalorder %s5537_s13, %s5537_s13 }
  0x4f   :  { %p5544_p5 = por %p5543_p4, %p5542_p3 }
  0x51   :  { %41 = dma.hbm_to_vmem [thread:$0]  %s6583_s28, 384, %s36_s2, [#allocation3], %s5664_s30, %s5664_s30, %s5665_s0  }
  0x52   :  { %p5545_p6 = pnand %p5544_p5, %p5538_p2 }
  0x54   :  { %5548 = shalt.err (!%p5545_p6)
}
  0x55   :  { %s6584_s23 = sld [smem:[#allocation30_spill]]  ;;  %s5676_s20 = smov [#allocation10]  }
  0x56   :  { %s85_s21 = sshll.u32 %s5676_s20, 4  ;;  %s86_s21 = int_to_ptr.vmem [resolvable:$true] %s85_s21 }
  0x57   :  { %s5557_s4 = scalar_lea.vmem %s86_s21, 6144  ;;  %p5562_p8 = scmp.lt.s32.totalorder %s86_s21, %s86_s21 }
  0x58   :  { %p5558_p7 = scmp.ne.s32.totalorder %s86_s21, %s5557_s4  ;;  %p5563_p9 = scmp.lt.s32.totalorder %s5557_s4, %s5557_s4 }
  0x5a   :  { %p5564_p10 = por %p5563_p9, %p5562_p8 }
  0x5b   :  { %65 = dma.hbm_to_vmem [thread:$0]  %s6584_s23, 64, %s60_s9, [#allocation6], %s5668_s25, %s5668_s25, %s5669_s26  }
  0x5c   :  { %p5565_p11 = pnand %p5564_p10, %p5558_p7 }
  0x5e   :  { %5568 = shalt.err (!%p5565_p11)
}
  0x5f   :  { %s5677_s30 = smov 192   ;;  %s5678_s0 = smov 12  }
  0x60   :  { %91 = dma.hbm_to_vmem [thread:$0]  %s6565_s5, 6144, %s86_s21, [#allocation9], %s5677_s30, %s5677_s30, %s5678_s0  }
  0x61   :  { %s5679_s27 = smov [#allocation13]   ;;  %s5680_s28 = smov [#allocation16]  }
  0x62   :  { %s111_s29 = sshll.u32 %s5679_s27, 4  ;;  %s137_s9 = sshll.u32 %s5680_s28, 4  ;;  %s112_s29 = int_to_ptr.vmem [resolvable:$true] %s111_s29  ;;  %s138_s9 = int_to_ptr.vmem [resolvable:$true] %s137_s9 }
  0x63   :  { %s5577_s13 = scalar_lea.vmem %s112_s29, 32  ;;  %p5582_p13 = scmp.lt.s32.totalorder %s112_s29, %s112_s29 }
  0x64   :  { %p5578_p12 = scmp.ne.s32.totalorder %s112_s29, %s5577_s13  ;;  %p5583_p0 = scmp.lt.s32.totalorder %s5577_s13, %s5577_s13 }
  0x66   :  { %p5584_p1 = por %p5583_p0, %p5582_p13 }
  0x68   :  { %p5585_p2 = pnand %p5584_p1, %p5578_p12 }
  0x6a   :  { %5588 = shalt.err (!%p5585_p2)
}
  0x6b   :  { %117 = dma.hbm_to_vmem [thread:$0]  %s6568_s8, 32, %s112_s29, [#allocation12], %s5668_s25, %s5668_s25, %s5669_s26  }
  0x6c   :  { %s5597_s5 = scalar_lea.vmem %s138_s9, 8192  ;;  %p5602_p4 = scmp.lt.s32.totalorder %s138_s9, %s138_s9 }
  0x6d   :  { %p5598_p3 = scmp.ne.s32.totalorder %s138_s9, %s5597_s5  ;;  %p5603_p5 = scmp.lt.s32.totalorder %s5597_s5, %s5597_s5 }
  0x6f   :  { %p5604_p6 = por %p5603_p5, %p5602_p4 }
  0x71   :  { %p5605_p7 = pnand %p5604_p6, %p5598_p3 }
  0x73   :  { %5608 = shalt.err (!%p5605_p7)
}
  0x74   :  { %s5681_s23 = smov 256   ;;  %s5682_s4 = smov [#allocation19]  }
  0x75   :  { %143 = dma.hbm_to_vmem [thread:$0]  %s6571_s11, 8192, %s138_s9, [#allocation15], %s5681_s23, %s5681_s23, %s5668_s25  }
  0x76   :  { %s169_s30 = sshll.u32 %s5682_s4, 4  ;;  %s170_s30 = int_to_ptr.vmem [resolvable:$true] %s169_s30 }
  0x77   :  { %s5617_s0 = scalar_lea.vmem %s170_s30, 1024  ;;  %p5622_p9 = scmp.lt.s32.totalorder %s170_s30, %s170_s30 }
  0x78   :  { %p5618_p8 = scmp.ne.s32.totalorder %s170_s30, %s5617_s0  ;;  %p5623_p10 = scmp.lt.s32.totalorder %s5617_s0, %s5617_s0 }
  0x7a   :  { %p5624_p11 = por %p5623_p10, %p5622_p9 }
  0x7c   :  { %p5625_p12 = pnand %p5624_p11, %p5618_p8 }
  0x7e   :  { %5628 = shalt.err (!%p5625_p12)
}
  0x7f   :  { %175 = dma.hbm_to_vmem [thread:$0]  %s6577_s17, 1024, %s170_s30, [#allocation18], %s5670_s19, %s5670_s19, %s5671_s1  }
  0x80   :  { %5649 = dma.done.wait [#allocation3], 384  }
  0x81   :  { %5650 = vsyncadd [#allocation3], 4294966912 }
  0x82   :  { %5651 = dma.done.wait [#allocation6], 448  }
  0x83   :  { %5652 = vsyncadd [#allocation6], 4294966848 }
  0x84   :  { %5653 = dma.done.wait [#allocation9], 6176  }
  0x85   :  { %5654 = vsyncadd [#allocation9], 4294961120 }
  0x86   :  { %5655 = dma.done.wait [#allocation12], 2080  }
  0x87   :  { %5656 = vsyncadd [#allocation12], 4294965216 }
  0x88   :  { %5657 = dma.done.wait [#allocation15], 8224  }
  0x89   :  { %5658 = vsyncadd [#allocation15], 4294959072 }
  0x8a   :  { %5659 = dma.done.wait [#allocation18], 9216  }
  0x8b   :  { %5660 = vsyncadd [#allocation18], 4294958080  ;;  %vm226_vm0 = vcmask 1041408   ;;  %v210_v0 = vld [vmem:[#allocation2] sm:$0xff]  ;;  %v212_v1 = vld [vmem:[#allocation2 + $0x10] sm:$0x3] }
  0x8c   :  { %v211_v2 = vld [vmem:[#allocation2 + $0x8] sm:$0xff]  ;;  %222 = vadd.xlane.f32.xlu0 %v210_v0  ;;  %v227_v3 = vsel %vm226_vm0, %v212_v1, 0.0  ;;  %v4989_v23 = vld [vmem:[#allocation10 + $0x7c] ss:$12 sps:$4 sm:$0xff]   ;;  %v4992_v25 = vld [vmem:[#allocation10 + $0x80] ss:$12 sps:$4 sm:$0xff]  }
  0x8d   :  { %228 = vadd.xlane.f32.xlu1 %v227_v3  ;;  %v4981_v4 = vld [vmem:[#allocation10 + $0xac] ss:$12 sps:$4 sm:$0xff]   ;;  %v4983_v5 = vld [vmem:[#allocation10 + $0xa8] ss:$12 sps:$4 sm:$0xff]   ;;  %v4984_v6 = vld [vmem:[#allocation10 + $0xb0] ss:$12 sps:$4 sm:$0xff]   ;;  %v313_v3 = vlaneseq }
  0x8e   :  { %456 = vmatprep.subr.bf16.mxu0 %v4981_v4  ;;  %4721 = vmatprep.subr.bf16.mxu1 %v4984_v6  ;;  %v4985_v20 = vld [vmem:[#allocation10 + $0x94] ss:$12 sps:$4 sm:$0xff]   ;;  %v4987_v21 = vld [vmem:[#allocation10 + $0x90] ss:$12 sps:$4 sm:$0xff]   ;;  %v4988_v22 = vld [vmem:[#allocation10 + $0x98] ss:$12 sps:$4 sm:$0xff]  }
  0x8f   :  { %457 = vmatpush1.bf16.msra.mxu0 %v4983_v5  ;;  %4722 = vmatpush3.bf16.msra.mxu1 %v4984_v6  ;;  %v4991_v24 = vld [vmem:[#allocation10 + $0x78] ss:$12 sps:$4 sm:$0xff]   ;;  %v4995_v27 = vld [vmem:[#allocation10 + $0x60] ss:$12 sps:$4 sm:$0xff]   ;;  %v4996_v28 = vld [vmem:[#allocation10 + $0x68] ss:$12 sps:$4 sm:$0xff]  }
  0x90   :  { %224 = vadd.xlane.f32.xlu0 %v211_v2  ;;  %458 = vmatprep.subr.bf16.mxu0 %v4985_v20  ;;  %v4993_v26 = vld [vmem:[#allocation10 + $0x64] ss:$12 sps:$4 sm:$0xff]   ;;  %v4997_v29 = vld [vmem:[#allocation10 + $0x4c] ss:$12 sps:$4 sm:$0xff]   ;;  %v4999_v31 = vld [vmem:[#allocation10 + $0x48] ss:$12 sps:$4 sm:$0xff]  }
  0x91   :  { %4723 = vmatprep.subr.bf16.mxu1 %v4988_v22  ;;  %v5000_v30 = vld [vmem:[#allocation10 + $0x50] ss:$12 sps:$4 sm:$0xff]   ;;  %v5001_v32 = vld [vmem:[#allocation10 + $0x34] ss:$12 sps:$4 sm:$0xff]   ;;  %v5004_v33 = vld [vmem:[#allocation10 + $0x38] ss:$12 sps:$4 sm:$0xff]  }
  0x92   :  { %v5683_v34 = vmov 0   ;;  %v5003_v35 = vld [vmem:[#allocation10 + $0x30] ss:$12 sps:$4 sm:$0xff]   ;;  %v5008_v37 = vld [vmem:[#allocation10 + $0x20] ss:$12 sps:$4 sm:$0xff]   ;;  %v5865_v4 = vshrl.u32 %v313_v3, 7 }
  0x93   :  { %459 = vmatpush1.bf16.msra.mxu0 %v4987_v21  ;;  %4724 = vmatpush3.bf16.msra.mxu1 %v4988_v22  ;;  %v5005_v36 = vld [vmem:[#allocation10 + $0x1c] ss:$12 sps:$4 sm:$0xff]   ;;  %v5007_v38 = vld [vmem:[#allocation10 + $0x18] ss:$12 sps:$4 sm:$0xff]   ;;  %v5011_v41 = vld [vmem:[#allocation10] ss:$12 sps:$4 sm:$0xff]  }
  0x94   :  { %460 = vmatprep.subr.bf16.mxu0 %v4989_v23  ;;  %4725 = vmatprep.subr.bf16.mxu1 %v4992_v25  ;;  %v5009_v39 = vld [vmem:[#allocation10 + $0x4] ss:$12 sps:$4 sm:$0xff]   ;;  %v5012_v40 = vld [vmem:[#allocation10 + $0x8] ss:$12 sps:$4 sm:$0xff]   ;;  %v4258_v59 = vld [vmem:[#allocation8] ss:$0 sm:$0xff] }
  0x95   :  { %488 = vmatprep.mubr.bf16.mxu0 %v5683_v34  ;;  %v4257_v53 = vld [vmem:[%s6563_s3] ss:$0 sm:$0xff]  ;;  %v5868_v5 = vsub.s32 0, %v5865_v4  ;;  %v5884_v20 = vld [vmem:[#allocation7 + $0x2] ss:$0 sm:$0xff]  ;;  %vm763_vm1 = vcmask 1040384  }
  0x96   :  { %v311_v6 = vld [vmem:[%s6566_s6] sm:$0x7]  ;;  %vm616_vm2 = vcmask 146432   ;;  %vm623_vm3 = vcmask 140288   ;;  %vm5685_vm4 = vmmov 0   ;;  %s5686_s30 = smov [#allocation20]  }
  0x97   :  { %461 = vmatpush1.bf16.msra.mxu0 %v4991_v24  ;;  %4726 = vmatpush3.bf16.msra.mxu1 %v4992_v25  ;;  %s4243_s0 = sshll.u32 %s5686_s30, 4  ;;  %s4244_s0 = int_to_ptr.vmem [resolvable:$true] %s4243_s0 }
  0x98   :  { %462 = vmatprep.subr.bf16.mxu0 %v4993_v26  ;;  %4727 = vmatprep.subr.bf16.mxu1 %v4996_v28  ;;  %s5629_s8 = scalar_lea.vmem %s4244_s0, 32  ;;  %p5634_p0 = scmp.lt.s32.totalorder %s4244_s0, %s4244_s0 }
  0x99   :  { %p5630_p13 = scmp.ne.s32.totalorder %s4244_s0, %s5629_s8  ;;  %p5635_p1 = scmp.lt.s32.totalorder %s5629_s8, %s5629_s8 }
  0x9b   :  { %463 = vmatpush1.bf16.msra.mxu0 %v4995_v27  ;;  %4728 = vmatpush3.bf16.msra.mxu1 %v4996_v28  ;;  %p5636_p2 = por %p5635_p1, %p5634_p0 }
  0x9c   :  { %464 = vmatprep.subr.bf16.mxu0 %v4997_v29  ;;  %4729 = vmatprep.subr.bf16.mxu1 %v5000_v30 }
  0x9d   :  { %p5637_p3 = pnand %p5636_p2, %p5630_p13 }
  0x9f   :  { %465 = vmatpush1.bf16.msra.mxu0 %v4999_v31  ;;  %4730 = vmatpush3.bf16.msra.mxu1 %v5000_v30 }
  0xa0   :  { %466 = vmatprep.subr.bf16.mxu0 %v5001_v32  ;;  %4731 = vmatprep.subr.bf16.mxu1 %v5004_v33 }
  0xa3   :  { %467 = vmatpush1.bf16.msra.mxu0 %v5003_v35  ;;  %4732 = vmatpush3.bf16.msra.mxu1 %v5004_v33 }
  0xa4   :  { %468 = vmatprep.subr.bf16.mxu0 %v5005_v36  ;;  %4733 = vmatprep.subr.bf16.mxu1 %v5008_v37 }
  0xa7   :  { %469 = vmatpush1.bf16.msra.mxu0 %v5007_v38  ;;  %4734 = vmatpush3.bf16.msra.mxu1 %v5008_v37 }
  0xa8   :  { %470 = vmatprep.subr.bf16.mxu0 %v5009_v39  ;;  %4735 = vmatprep.subr.bf16.mxu1 %v5012_v40 }
  0xab   :  { %471 = vmatpush1.bf16.msra.mxu0 %v5011_v41  ;;  %4736 = vmatpush3.bf16.msra.mxu1 %v5012_v40 }
 0x115   :  { %v223_v7 = vpop.xlane.xlu0 %222 }
 0x116   :  { %v231_v8 = vmul.f32 0.0078125, %v223_v7  ;;  %v229_v9 = vpop.xlane.xlu1 %228  ;;  %v316_v7 = vrot.slane %v311_v6, %v5868_v5 }
 0x117   :  { %v233_v10 = vmul.f32 0.0078125, %v229_v9 }
 0x118   :  { %v5844_v11 = vsub.f32 %v210_v0, %v231_v8 }
 0x119   :  { %v5846_v12 = vsub.f32 %v212_v1, %v233_v10  ;;  %v225_v13 = vpop.xlane.xlu0 %224 }
 0x11a   :  { %v232_v14 = vmul.f32 0.0078125, %v225_v13  ;;  %v237_v15 = vmul.f32 %v5844_v11, %v5844_v11  ;;  %v5875_v13 = vsub.s32 2, %v5865_v4 }
 0x11b   :  { %v239_v16 = vmul.f32 %v5846_v12, %v5846_v12 }
 0x11c   :  { %v5852_v17 = vsub.f32 %v211_v2, %v232_v14  ;;  %240 = vadd.xlane.f32.xlu1 %v237_v15  ;;  %v5877_v15 = vld [vmem:[#allocation7] ss:$0 sm:$0xff]  ;;  %v324_v27 = vrot.slane %v311_v6, %v5875_v13 }
 0x11d   :  { %v244_v18 = vsel %vm226_vm0, %v239_v16, 0.0  ;;  %v5879_v16 = vld [vmem:[#allocation7 + $0x1] ss:$0 sm:$0xff] }
 0x11e   :  { %v238_v19 = vmul.f32 %v5852_v17, %v5852_v17 }
 0x120   :  { %245 = vadd.xlane.f32.xlu1 %v244_v18  ;;  %242 = vadd.xlane.f32.xlu0 %v238_v19 }
 0x1a5   :  { %v241_v42 = vpop.xlane.xlu1 %240 }
 0x1a6   :  { %v247_v43 = vmul.f32 0.0078125, %v241_v42  ;;  %v5900_v42 = vld [vmem:[#allocation7 + $0x3] ss:$0 sm:$0xff] }
 0x1a8   :  { %v250_v44 = vadd.f32 1e-05, %v247_v43 }
 0x1a9   :  { %v246_v45 = vpop.xlane.xlu1 %245  ;;  %v243_v46 = vpop.xlane.xlu0 %242 }
 0x1aa   :  { %5229 = vrsqrt.f32 %v250_v44  ;;  %v249_v47 = vmul.f32 0.0078125, %v246_v45  ;;  %v248_v48 = vmul.f32 0.0078125, %v243_v46 }
 0x1ac   :  { %v252_v49 = vadd.f32 1e-05, %v249_v47  ;;  %v251_v50 = vadd.f32 1e-05, %v248_v48 }
 0x1ae   :  { %5231 = vrsqrt.f32 %v252_v49 }
 0x1af   :  { %5233 = vrsqrt.f32 %v251_v50 }
 0x1b7   :  { %v5230_v51 = vpop.eup %5229 }
 0x1b8   :  { %v256_v52 = vmul.f32 %v5230_v51, %v5844_v11 }
 0x1ba   :  { %v265_v58 = vmul.f32 %v4257_v53, %v256_v52 }
 0x1bb   :  { %v5232_v54 = vpop.eup %5231 }
 0x1bc   :  { %v5234_v55 = vpop.eup %5233  ;;  %v258_v56 = vmul.f32 %v5232_v54, %v5846_v12  ;;  %v274_v63 = vadd.f32 %v4258_v59, %v265_v58 }
 0x1bd   :  { %v257_v57 = vmul.f32 %v5234_v55, %v5852_v17  ;;  %v5882_v17 = vsub.s32 1, %v5865_v4 }
 0x1be   :  { %v267_v60 = vmul.f32 %v4257_v53, %v258_v56 }
 0x1bf   :  { %v266_v61 = vmul.f32 %v4257_v53, %v257_v57  ;;  %v320_v31 = vrot.slane %v311_v6, %v5882_v17 }
 0x1c0   :  { %v276_v62 = vadd.f32 %v4258_v59, %v267_v60 }
 0x1c1   :  { %v275_v0 = vadd.f32 %v4258_v59, %v266_v61 }
 0x1c2   :  { %v310_v1 = vpack.c.bf16 %v276_v62, %v276_v62 }
 0x1c3   :  { %v309_v2 = vpack.c.bf16 %v275_v0, %v274_v63 }
 0x1c5   :  { %489 = vmatmul.mubr.bf16.vlgmr.msra.gmra.mxu0 %v309_v2  ;;  %4737 = vmatprep.mubr.bf16.mxu1 %v309_v2 }
 0x1c6   :  { %4738 = vmatmul.mubr.bf16.vlgmr.msra.gmra.mxu1 %v310_v1  ;;  %498 = vmatprep.mubr.bf16.mxu0 %v5683_v34 }
 0x1cd   :  { %499 = vmatmul.mubr.bf16.gmra.mxu0 %v310_v1 }
 0x285   :  { %v490_v8 = vpop.f32.mrf.mxu0 }
 0x286   :  { %v4739_v9 = vpop.f32.mrf.mxu1  ;;  %v491_v11 = vadd.f32 %v490_v8, %v316_v7 }
 0x287   :  { %v492_v10 = vpop.f32.mrf.mxu0  ;;  %v5902_v43 = vadd.f32 %v4739_v9, %v324_v27 }
 0x288   :  { %v541_v12 = vpop.f32.mrf.mxu1  ;;  %v563_v23 = vmul.f32 %v5877_v15, %v491_v11  ;;  %v664_v25 = vmul.f32 %v5879_v16, %v491_v11  ;;  %v5892_v29 = vmul.f32 %v5884_v20, %v491_v11  ;;  %v493_v44 = vadd.f32 %v492_v10, %v320_v31 }
 0x289   :  { %v494_v14 = vpop.f32.mrf.mxu0  ;;  %v542_v35 = vadd.f32 %v541_v12, %v324_v27  ;;  %v5915_v52 = vmul.f32 %v5900_v42, %v491_v11  ;;  %v754_v57 = vmul.f32 %v5879_v16, %v5902_v43  ;;  %v655_v58 = vmul.f32 %v5877_v15, %v5902_v43 }
 0x28a   :  { %v495_v18 = vadd.f32 %v494_v14, %v316_v7  ;;  %v4740_v19 = vpop.f32.mrf.mxu1  ;;  %v968_v8 = vmul.f32 %v5884_v20, %v5902_v43 }
 0x28b   :  { %v496_v21 = vpop.f32.mrf.mxu0  ;;  %v1125_v47 = vmul.f32 %v5900_v42, %v542_v35  ;;  %v966_v49 = vmul.f32 %v5884_v20, %v542_v35  ;;  %v756_v60 = vpack.c.bf16 %v754_v57, %v754_v57  ;;  %v657_v61 = vpack.c.bf16 %v655_v58, %v655_v58  ;;  %v5959_v19 = vld [vmem:[#allocation5 + $0x10] sm:$0x3] }
 0x28c   :  { %v544_v22 = vpop.f32.mrf.mxu1  ;;  %v564_v24 = vmul.f32 %v5877_v15, %v495_v18  ;;  %v665_v26 = vmul.f32 %v5879_v16, %v495_v18  ;;  %v5895_v30 = vmul.f32 %v5884_v20, %v495_v18  ;;  %v497_v39 = vadd.f32 %v496_v21, %v320_v31 }
 0x28d   :  { %v500_v28 = vpop.f32.mrf.mxu0  ;;  %v545_v36 = vadd.f32 %v544_v22, %v324_v27  ;;  %v5918_v53 = vmul.f32 %v5900_v42, %v495_v18  ;;  %v752_v6 = vmul.f32 %v5879_v16, %v542_v35  ;;  %v765_v9 = vsel %vm763_vm1, %v756_v60, 0  ;;  %v5957_v18 = vld [vmem:[#allocation5] sm:$0xff] }
 0x28e   :  { %v566_v32 = vpack.c.bf16 %v564_v24, %v563_v23  ;;  %v667_v33 = vpack.c.bf16 %v665_v26, %v664_v25  ;;  %v881_v38 = vpack.c.bf16 %v5895_v30, %v5892_v29  ;;  %v5910_v51 = vpack.c.bf16 %v497_v39, %v493_v44  ;;  %v5962_v26 = vld [vmem:[#allocation5 + $0x8] sm:$0xff] }
 0x28f   :  { %v502_v37 = vpop.f32.mrf.mxu0  ;;  %v1126_v48 = vmul.f32 %v5900_v42, %v545_v36  ;;  %v967_v50 = vmul.f32 %v5884_v20, %v545_v36  ;;  %v1040_v56 = vpack.c.bf16 %v5918_v53, %v5915_v52  ;;  %v5934_v59 = vadd.f32 %v500_v28, %v316_v7 }
 0x290   :  { %v503_v40 = vadd.f32 %v502_v37, %v320_v31  ;;  %4745 = vmatprep.mubr.bf16.mxu0 %v566_v32  ;;  %4753 = vmatprep.mubr.bf16.mxu1 %v667_v33  ;;  %v753_v0 = vmul.f32 %v5879_v16, %v545_v36  ;;  %v654_v1 = vmul.f32 %v5877_v15, %v545_v36  ;;  %v822_v10 = vsel %vm763_vm1, %v657_v61, 0 }
 0x291   :  { %v504_v41 = vpop.f32.mrf.mxu0  ;;  %v5922_v54 = vpack.c.bf16 %v1126_v48, %v1125_v47  ;;  %v5924_v55 = vpack.c.bf16 %v967_v50, %v966_v49  ;;  %v565_v62 = vmul.f32 %v5877_v15, %v5934_v59  ;;  %v666_v63 = vmul.f32 %v5879_v16, %v5934_v59 }
 0x292   :  { %v5904_v45 = vpack.c.bf16 %v503_v40, %v503_v40  ;;  %v653_v7 = vmul.f32 %v5877_v15, %v542_v35  ;;  %v755_v11 = vpack.c.bf16 %v753_v0, %v752_v6  ;;  %v5952_v14 = vpack.c.bf16 %v968_v8, %v968_v8 }
 0x293   :  { %v505_v46 = vpop.f32.mrf.mxu0  ;;  %v567_v2 = vpack.c.bf16 %v565_v62, %v565_v62  ;;  %v668_v3 = vpack.c.bf16 %v666_v63, %v666_v63 }
 0x294   :  { %4741 = vmatprep.subr.bf16.mxu0 %v5904_v45  ;;  %4749 = vmatprep.subr.bf16.mxu1 %v5904_v45  ;;  %v656_v12 = vpack.c.bf16 %v654_v1, %v653_v7 }
 0x295   :  { %4742 = vmatpush3.bf16.xpose.msra.mxu0 %v5904_v45  ;;  %4750 = vmatpush3.bf16.xpose.msra.mxu1 %v5904_v45 }
 0x296   :  { %4743 = vmatprep.subr.bf16.mxu0 %v5910_v51  ;;  %4751 = vmatprep.subr.bf16.mxu1 %v5910_v51 }
 0x29d   :  { %4744 = vmatpush3.bf16.xpose.msra.mxu0 %v5910_v51  ;;  %4752 = vmatpush3.bf16.xpose.msra.mxu1 %v5910_v51 }
 0x29e   :  { %4949 = vmatprep.subr.msk.bf16.mxu0 %vm763_vm1, %v756_v60  ;;  %4950 = vmatprep.subr.msk.bf16.mxu1 %vm763_vm1, %v657_v61 }
 0x2a4   :  { %4746 = vmatmul.mubr.bf16.vlgmr.msra.gmra.mxu0 %v567_v2  ;;  %4754 = vmatmul.mubr.bf16.vlgmr.msra.gmra.mxu1 %v668_v3 }
 0x2a5   :  { %4758 = vmatpush3.bf16.msra.mxu0 %v765_v9  ;;  %4766 = vmatpush3.bf16.msra.mxu1 %v822_v10 }
 0x2a6   :  { %4759 = vmatprep.subr.bf16.mxu0 %v755_v11  ;;  %4767 = vmatprep.subr.bf16.mxu1 %v656_v12 }
 0x2a9   :  { %4760 = vmatpush3.bf16.msra.mxu0 %v755_v11  ;;  %4768 = vmatpush3.bf16.msra.mxu1 %v656_v12 }
 0x2aa   :  { %4773 = vmatprep.subr.bf16.mxu0 %v5904_v45  ;;  %4951 = vmatprep.subr.msk.bf16.mxu1 %vm763_vm1, %v5952_v14 }
 0x364   :  { %v4747_v15 = vpop.f32.mrf.mxu0  ;;  %v4755_v16 = vpop.f32.mrf.mxu1 }
 0x365   :  { %v712_v27 = vadd.f32 %v4755_v16, %v5959_v19  ;;  %v611_v1 = vadd.f32 %v4747_v15, %v5959_v19 }
 0x366   :  { %v602_v21 = vpop.f32.mrf.mxu0  ;;  %v703_v22 = vpop.f32.mrf.mxu1 }
 0x367   :  { %v704_v23 = vadd.f32 %v703_v22, %v5957_v18  ;;  %v723_v35 = vsel %vm623_vm3, %v712_v27, -inf  ;;  %v603_v61 = vadd.f32 %v602_v21, %v5957_v18  ;;  %v624_v6 = vsel %vm623_vm3, %v611_v1, -inf }
 0x368   :  { %v4748_v24 = vpop.f32.mrf.mxu0  ;;  %v4756_v25 = vpop.f32.mrf.mxu1 }
 0x369   :  { %v717_v28 = vsel %vm616_vm2, %v704_v23, -inf  ;;  %v617_v2 = vsel %vm616_vm2, %v603_v61, -inf  ;;  %v1127_v24 = vmul.f32 %v5900_v42, %v5902_v43 }
 0x36a   :  { %v706_v31 = vpop.f32.mrf.mxu1  ;;  %718 = vmax.xlane.f32.xlu0 %v717_v28  ;;  %v605_v57 = vpop.f32.mrf.mxu0 }
 0x36b   :  { %v707_v32 = vadd.f32 %v706_v31, %v5962_v26  ;;  %v606_v63 = vadd.f32 %v605_v57, %v5962_v26  ;;  %v1129_v25 = vpack.c.bf16 %v1127_v24, %v1127_v24 }
 0x36d   :  { %v720_v33 = vsel %vm616_vm2, %v707_v32, -inf  ;;  %v620_v3 = vsel %vm616_vm2, %v606_v63, -inf  ;;  %v1137_v31 = vsel %vm763_vm1, %v1129_v25, 0 }
 0x36e   :  { %721 = vmax.xlane.f32.xlu1 %v720_v33  ;;  %724 = vmax.xlane.f32.xlu0 %v723_v35 }
 0x3f3   :  { %v719_v36 = vpop.xlane.xlu0 %718 }
 0x3f4   :  { %v726_v37 = vsub.f32 %v704_v23, %v719_v36 }
 0x3f6   :  { %v729_v39 = vmul.f32 1.442695, %v726_v37 }
 0x3f7   :  { %v722_v40 = vpop.xlane.xlu1 %721  ;;  %v725_v41 = vpop.xlane.xlu0 %724 }
 0x3f8   :  { %5235 = vpow2.f32 %v729_v39  ;;  %v727_v44 = vsub.f32 %v707_v32, %v722_v40  ;;  %v728_v46 = vsub.f32 %v712_v27, %v725_v41  ;;  %v880_v27 = vmul.f32 %v5884_v20, %v5934_v59 }
 0x3fa   :  { %v731_v47 = vmul.f32 1.442695, %v727_v44  ;;  %v733_v48 = vmul.f32 1.442695, %v728_v46  ;;  %v882_v28 = vpack.c.bf16 %v880_v27, %v880_v27 }
 0x3fc   :  { %5237 = vpow2.f32 %v731_v47 }
 0x3fd   :  { %5239 = vpow2.f32 %v733_v48 }
 0x405   :  { %v5236_v49 = vpop.eup %5235 }
 0x406   :  { %v735_v50 = vsel %vm616_vm2, %v5236_v49, 0.0 }
 0x407   :  { %736 = vadd.xlane.f32.xlu1 %v735_v50 }
 0x409   :  { %v5238_v58 = vpop.eup %5237 }
 0x40a   :  { %v5240_v60 = vpop.eup %5239  ;;  %v738_v62 = vsel %vm616_vm2, %v5238_v58, 0.0 }
 0x40b   :  { %739 = vadd.xlane.f32.xlu0 %v738_v62  ;;  %v741_v0 = vsel %vm623_vm3, %v5240_v60, 0.0 }
 0x40c   :  { %742 = vadd.xlane.f32.xlu1 %v741_v0 }
 0x40f   :  { %618 = vmax.xlane.f32.xlu0 %v617_v2 }
 0x410   :  { %621 = vmax.xlane.f32.xlu1 %v620_v3 }
 0x413   :  { %625 = vmax.xlane.f32.xlu0 %v624_v6 }
 0x490   :  { %v737_v7 = vpop.xlane.xlu1 %736 }
 0x491   :  { %5241 = vrcp.f32 %v737_v7 }
 0x494   :  { %v740_v8 = vpop.xlane.xlu0 %739 }
 0x495   :  { %v743_v9 = vpop.xlane.xlu1 %742  ;;  %5243 = vrcp.f32 %v740_v8 }
 0x496   :  { %5245 = vrcp.f32 %v743_v9 }
 0x498   :  { %v619_v29 = vpop.xlane.xlu0 %618 }
 0x499   :  { %v627_v32 = vsub.f32 %v603_v61, %v619_v29 }
 0x49b   :  { %v630_v20 = vmul.f32 1.442695, %v627_v32 }
 0x49c   :  { %v626_v36 = vpop.xlane.xlu0 %625 }
 0x49d   :  { %v629_v39 = vsub.f32 %v611_v1, %v626_v36  ;;  %5247 = vpow2.f32 %v630_v20 }
 0x49e   :  { %v5242_v10 = vpop.eup %5241 }
 0x49f   :  { %v747_v16 = vmul.f32 %v5242_v10, %v5236_v49  ;;  %v634_v40 = vmul.f32 1.442695, %v629_v39  ;;  %v978_v39 = vsel %vm763_vm1, %v5952_v14, 0 }
 0x4a2   :  { %v5244_v11 = vpop.eup %5243 }
 0x4a3   :  { %v5246_v12 = vpop.eup %5245  ;;  %v748_v15 = vmul.f32 %v5244_v11, %v5238_v58 }
 0x4a4   :  { %v749_v21 = vmul.f32 %v5246_v12, %v5240_v60 }
 0x4a5   :  { %v750_v22 = vpack.c.bf16 %v748_v15, %v747_v16 }
 0x4a6   :  { %v751_v23 = vpack.c.bf16 %v749_v21, %v749_v21 }
 0x4a7   :  { %4761 = vmatprep.mubr.msk.bf16.mxu0 %vm616_vm2, %v750_v22 }
 0x4a8   :  { %4762 = vmatmul.mubr.msk.bf16.vlgmr.msra.gmra.mxu0 %vm616_vm2, %v751_v23 }
 0x4a9   :  { %4774 = vmatpush3.bf16.xpose.msra.mxu0 %v5904_v45  ;;  %4777 = vmatprep.mubr.bf16.mxu0 %v881_v38  ;;  %v622_v38 = vpop.xlane.xlu1 %621 }
 0x4aa   :  { %4775 = vmatprep.subr.bf16.mxu0 %v5910_v51  ;;  %v628_v35 = vsub.f32 %v606_v63, %v622_v38  ;;  %v5248_v58 = vpop.eup %5247 }
 0x4ab   :  { %v636_v0 = vsel %vm616_vm2, %v5248_v58, 0.0 }
 0x4ac   :  { %v632_v37 = vmul.f32 1.442695, %v628_v35 }
 0x4ae   :  { %5249 = vpow2.f32 %v632_v37 }
 0x4af   :  { %5251 = vpow2.f32 %v634_v40 }
 0x4b1   :  { %4776 = vmatpush3.bf16.xpose.msra.mxu0 %v5910_v51 }
 0x4b2   :  { %4952 = vmatprep.subr.msk.bf16.mxu0 %vm763_vm1, %v1129_v25 }
 0x4b8   :  { %4778 = vmatmul.mubr.bf16.vlgmr.msra.gmra.mxu0 %v882_v28 }
 0x4b9   :  { %4798 = vmatpush3.bf16.msra.mxu0 %v1137_v31 }
 0x4ba   :  { %4799 = vmatprep.subr.bf16.mxu0 %v5922_v54 }
 0x4bb   :  { %v5250_v62 = vpop.eup %5249 }
 0x4bc   :  { %v639_v63 = vsel %vm616_vm2, %v5250_v62, 0.0  ;;  %v5252_v1 = vpop.eup %5251 }
 0x4bd   :  { %4800 = vmatpush3.bf16.msra.mxu0 %v5922_v54  ;;  %v642_v2 = vsel %vm623_vm3, %v5252_v1, 0.0 }
 0x568   :  { %v5994_v30 = vpop.f32.mrf.mxu0 }
 0x56a   :  { %v5996_v43 = vpop.f32.mrf.mxu0 }
 0x56c   :  { %v4764_v33 = vpop.f32.mrf.mxu0 }
 0x56e   :  { %v5998_v41 = vpop.f32.mrf.mxu0 }
 0x578   :  { %v4779_v44 = vpop.f32.mrf.mxu0 }
 0x579   :  { %v926_v48 = vadd.f32 %v4779_v44, %v5959_v19 }
 0x57a   :  { %v917_v54 = vpop.f32.mrf.mxu0 }
 0x57b   :  { %v918_v46 = vadd.f32 %v917_v54, %v5957_v18  ;;  %v937_v60 = vsel %vm623_vm3, %v926_v48, -inf }
 0x57c   :  { %v4780_v47 = vpop.f32.mrf.mxu0 }
 0x57d   :  { %v931_v49 = vsel %vm616_vm2, %v918_v46, -inf }
 0x57e   :  { %v920_v50 = vpop.f32.mrf.mxu0  ;;  %932 = vmax.xlane.f32.xlu1 %v931_v49 }
 0x57f   :  { %v921_v57 = vadd.f32 %v920_v50, %v5962_v26 }
 0x581   :  { %v934_v61 = vsel %vm616_vm2, %v921_v57, -inf }
 0x582   :  { %938 = vmax.xlane.f32.xlu1 %v937_v60  ;;  %935 = vmax.xlane.f32.xlu0 %v934_v61 }
 0x586   :  { %640 = vadd.xlane.f32.xlu1 %v639_v63  ;;  %637 = vadd.xlane.f32.xlu0 %v636_v0 }
 0x58a   :  { %643 = vadd.xlane.f32.xlu0 %v642_v2 }
 0x607   :  { %v933_v3 = vpop.xlane.xlu1 %932 }
 0x608   :  { %v940_v6 = vsub.f32 %v918_v46, %v933_v3 }
 0x60a   :  { %v943_v7 = vmul.f32 1.442695, %v940_v6 }
 0x60b   :  { %v939_v8 = vpop.xlane.xlu1 %938  ;;  %v936_v9 = vpop.xlane.xlu0 %935 }
 0x60c   :  { %5253 = vpow2.f32 %v943_v7  ;;  %v942_v10 = vsub.f32 %v926_v48, %v939_v8  ;;  %v941_v11 = vsub.f32 %v921_v57, %v936_v9 }
 0x60e   :  { %v947_v12 = vmul.f32 1.442695, %v942_v10  ;;  %v945_v16 = vmul.f32 1.442695, %v941_v11 }
 0x60f   :  { %v641_v15 = vpop.xlane.xlu1 %640  ;;  %v638_v21 = vpop.xlane.xlu0 %637 }
 0x610   :  { %5255 = vpow2.f32 %v947_v12 }
 0x611   :  { %5257 = vpow2.f32 %v945_v16 }
 0x612   :  { %5259 = vrcp.f32 %v641_v15 }
 0x613   :  { %5261 = vrcp.f32 %v638_v21  ;;  %v644_v22 = vpop.xlane.xlu0 %643 }
 0x614   :  { %5263 = vrcp.f32 %v644_v22 }
 0x619   :  { %v5254_v23 = vpop.eup %5253 }
 0x61a   :  { %v949_v24 = vsel %vm616_vm2, %v5254_v23, 0.0 }
 0x61b   :  { %950 = vadd.xlane.f32.xlu1 %v949_v24 }
 0x61d   :  { %v5256_v25 = vpop.eup %5255 }
 0x61e   :  { %v5258_v27 = vpop.eup %5257  ;;  %v955_v28 = vsel %vm623_vm3, %v5256_v25, 0.0 }
 0x61f   :  { %v5260_v31 = vpop.eup %5259  ;;  %956 = vadd.xlane.f32.xlu1 %v955_v28  ;;  %v952_v29 = vsel %vm616_vm2, %v5258_v27, 0.0 }
 0x620   :  { %v5262_v38 = vpop.eup %5261  ;;  %953 = vadd.xlane.f32.xlu0 %v952_v29  ;;  %v649_v32 = vmul.f32 %v5260_v31, %v5250_v62 }
 0x621   :  { %v5264_v33 = vpop.eup %5263  ;;  %v648_v35 = vmul.f32 %v5262_v38, %v5248_v58  ;;  %v5013_v38 = vld [vmem:[#allocation11 + $0x38] sm:$0xff]  }
 0x622   :  { %v650_v36 = vmul.f32 %v5264_v33, %v5252_v1  ;;  %4805 = vmatprep.subr.bf16.mxu0 %v5013_v38 }
 0x623   :  { %v651_v20 = vpack.c.bf16 %v649_v32, %v648_v35 }
 0x624   :  { %v652_v37 = vpack.c.bf16 %v650_v36, %v650_v36 }
 0x625   :  { %4769 = vmatprep.mubr.msk.bf16.mxu1 %vm616_vm2, %v651_v20 }
 0x626   :  { %4770 = vmatmul.mubr.msk.bf16.vlgmr.msra.gmra.mxu1 %vm616_vm2, %v652_v37 }
 0x627   :  { %4782 = vmatpush3.bf16.msra.mxu1 %v978_v39 }
 0x628   :  { %4783 = vmatprep.subr.bf16.mxu1 %v5924_v55 }
 0x62b   :  { %4784 = vmatpush3.bf16.msra.mxu1 %v5924_v55  ;;  %v1039_v55 = vmul.f32 %v5900_v42, %v5934_v59 }
 0x62c   :  { %4789 = vmatprep.subr.bf16.mxu1 %v5904_v45 }
 0x62d   :  { %v1041_v60 = vpack.c.bf16 %v1039_v55, %v1039_v55 }
 0x6a4   :  { %v951_v40 = vpop.xlane.xlu1 %950 }
 0x6a5   :  { %5265 = vrcp.f32 %v951_v40 }
 0x6a8   :  { %v957_v44 = vpop.xlane.xlu1 %956 }
 0x6a9   :  { %5267 = vrcp.f32 %v957_v44  ;;  %v954_v54 = vpop.xlane.xlu0 %953 }
 0x6aa   :  { %5269 = vrcp.f32 %v954_v54 }
 0x6b2   :  { %v5266_v46 = vpop.eup %5265 }
 0x6b3   :  { %v961_v50 = vmul.f32 %v5266_v46, %v5254_v23 }
 0x6b6   :  { %v5268_v47 = vpop.eup %5267 }
 0x6b7   :  { %v5270_v48 = vpop.eup %5269  ;;  %v963_v49 = vmul.f32 %v5268_v47, %v5256_v25  ;;  %v5014_v47 = vld [vmem:[#allocation11 + $0x30] sm:$0xff]  }
 0x6b8   :  { %v962_v57 = vmul.f32 %v5270_v48, %v5258_v27  ;;  %v5015_v48 = vld [vmem:[#allocation11 + $0x28] sm:$0xff]  }
 0x6b9   :  { %v965_v14 = vpack.c.bf16 %v963_v49, %v963_v49  ;;  %v5016_v49 = vld [vmem:[#allocation11 + $0x20] sm:$0xff]  }
 0x6ba   :  { %v964_v58 = vpack.c.bf16 %v962_v57, %v961_v50  ;;  %v5017_v50 = vld [vmem:[#allocation11 + $0x18] sm:$0xff]   ;;  %v5018_v57 = vld [vmem:[#allocation11 + $0x10] sm:$0xff]  }
 0x6bc   :  { %4785 = vmatprep.mubr.msk.bf16.mxu1 %vm616_vm2, %v964_v58  ;;  %v5020_v58 = vld [vmem:[#allocation11] sm:$0xff]  }
 0x6bd   :  { %4786 = vmatmul.mubr.msk.bf16.vlgmr.msra.gmra.mxu1 %vm616_vm2, %v965_v14  ;;  %v5019_v14 = vld [vmem:[#allocation11 + $0x8] sm:$0xff]  }
 0x6be   :  { %4790 = vmatpush3.bf16.xpose.msra.mxu1 %v5904_v45  ;;  %4793 = vmatprep.mubr.bf16.mxu1 %v1040_v56 }
 0x6bf   :  { %4791 = vmatprep.subr.bf16.mxu1 %v5910_v51 }
 0x6c6   :  { %4792 = vmatpush3.bf16.xpose.msra.mxu1 %v5910_v51 }
 0x6cd   :  { %4794 = vmatmul.mubr.bf16.vlgmr.msra.gmra.mxu1 %v1041_v60 }
 0x6ce   :  { %1620 = vmatprep.mubr.bf16.mxu1 %v5683_v34 }
 0x6e6   :  { %v4771_v61 = vpop.f32.mrf.mxu1 }
 0x6e7   :  { %v867_v45 = vadd.f32 %v4771_v61, %v5994_v30 }
 0x6e8   :  { %v858_v62 = vpop.f32.mrf.mxu1 }
 0x6e9   :  { %v859_v53 = vadd.f32 %v858_v62, %v5996_v43 }
 0x6ea   :  { %v4772_v63 = vpop.f32.mrf.mxu1 }
 0x6ec   :  { %v6030_v0 = vpop.f32.mrf.mxu1 }
 0x6ed   :  { %v862_v61 = vadd.f32 %v6030_v0, %v5998_v41  ;;  %v4303_v41 = vld [vmem:[#allocation13] ss:$0 sm:$0xff]  ;;  %v5400_v0 = vld [vmem:[#allocation2] sm:$0xff] }
 0x77d   :  { %v4787_v52 = vpop.f32.mrf.mxu1 }
 0x77e   :  { %v6034_v56 = vadd.f32 %v4787_v52, %v867_v45 }
 0x77f   :  { %v1014_v51 = vpop.f32.mrf.mxu1 }
 0x780   :  { %v6036_v1 = vadd.f32 %v1014_v51, %v859_v53 }
 0x781   :  { %v4788_v42 = vpop.f32.mrf.mxu1 }
 0x783   :  { %v6038_v59 = vpop.f32.mrf.mxu1 }
 0x784   :  { %v1029_v63 = vadd.f32 %v6038_v59, %v862_v61  ;;  %v5051_v61 = vld [vmem:[#allocation16 + $0x40] ss:$16 sps:$4 sm:$0xff]  }
 0x78d   :  { %v4795_v2 = vpop.f32.mrf.mxu1 }
 0x78e   :  { %v1085_v8 = vadd.f32 %v4795_v2, %v5959_v19 }
 0x78f   :  { %v1076_v3 = vpop.f32.mrf.mxu1 }
 0x790   :  { %v1077_v6 = vadd.f32 %v1076_v3, %v5957_v18  ;;  %v1096_v11 = vsel %vm623_vm3, %v1085_v8, -inf }
 0x791   :  { %v4796_v7 = vpop.f32.mrf.mxu1 }
 0x792   :  { %v1090_v30 = vsel %vm616_vm2, %v1077_v6, -inf }
 0x793   :  { %v1079_v9 = vpop.f32.mrf.mxu1  ;;  %1091 = vmax.xlane.f32.xlu0 %v1090_v30 }
 0x794   :  { %v1080_v43 = vadd.f32 %v1079_v9, %v5962_v26 }
 0x796   :  { %v1093_v10 = vsel %vm616_vm2, %v1080_v43, -inf }
 0x797   :  { %1094 = vmax.xlane.f32.xlu1 %v1093_v10  ;;  %1097 = vmax.xlane.f32.xlu0 %v1096_v11 }
 0x81c   :  { %v1092_v12 = vpop.xlane.xlu0 %1091 }
 0x81d   :  { %v1099_v16 = vsub.f32 %v1077_v6, %v1092_v12  ;;  %v5399_v6 = vld [vmem:[#allocation2 + $0x10] sm:$0x3] }
 0x81f   :  { %v1102_v15 = vmul.f32 1.442695, %v1099_v16  ;;  %v5021_v16 = vld [vmem:[#allocation16 + $0xe0] ss:$16 sps:$4 sm:$0xff]  }
 0x820   :  { %v1095_v21 = vpop.xlane.xlu1 %1094  ;;  %v1098_v18 = vpop.xlane.xlu0 %1097 }
 0x821   :  { %5271 = vpow2.f32 %v1102_v15  ;;  %v1100_v22 = vsub.f32 %v1080_v43, %v1095_v21  ;;  %v1101_v19 = vsub.f32 %v1085_v8, %v1098_v18  ;;  %v5401_v43 = vld [vmem:[#allocation2 + $0x8] sm:$0xff]  ;;  %v5024_v21 = vld [vmem:[#allocation16 + $0xe8] ss:$16 sps:$4 sm:$0xff]  }
 0x822   :  { %v5023_v15 = vld [vmem:[#allocation16 + $0xe4] ss:$16 sps:$4 sm:$0xff]   ;;  %v5026_v18 = vld [vmem:[#allocation16 + $0xec] ss:$16 sps:$4 sm:$0xff]  }
 0x823   :  { %v1104_v23 = vmul.f32 1.442695, %v1100_v22  ;;  %v1106_v24 = vmul.f32 1.442695, %v1101_v19  ;;  %1588 = vmatprep.subr.bf16.mxu1 %v5023_v15 }
 0x824   :  { %1589 = vmatpush1.bf16.msra.mxu1 %v5021_v16  ;;  %v4304_v16 = vld [vmem:[#allocation14] ss:$0 sm:$0xff] }
 0x825   :  { %5273 = vpow2.f32 %v1104_v23 }
 0x826   :  { %5275 = vpow2.f32 %v1106_v24 }
 0x82e   :  { %v5272_v25 = vpop.eup %5271 }
 0x82f   :  { %v1108_v26 = vsel %vm616_vm2, %v5272_v25, 0.0 }
 0x830   :  { %1109 = vadd.xlane.f32.xlu1 %v1108_v26 }
 0x832   :  { %v5274_v27 = vpop.eup %5273 }
 0x833   :  { %v5276_v28 = vpop.eup %5275  ;;  %v1111_v31 = vsel %vm616_vm2, %v5274_v27, 0.0 }
 0x834   :  { %1112 = vadd.xlane.f32.xlu0 %v1111_v31  ;;  %v1114_v29 = vsel %vm623_vm3, %v5276_v28, 0.0 }
 0x835   :  { %1115 = vadd.xlane.f32.xlu1 %v1114_v29 }
 0x8b9   :  { %v1110_v32 = vpop.xlane.xlu1 %1109 }
 0x8ba   :  { %5277 = vrcp.f32 %v1110_v32 }
 0x8bd   :  { %v1113_v33 = vpop.xlane.xlu0 %1112 }
 0x8be   :  { %v1116_v35 = vpop.xlane.xlu1 %1115  ;;  %5279 = vrcp.f32 %v1113_v33 }
 0x8bf   :  { %5281 = vrcp.f32 %v1116_v35  ;;  %v5027_v35 = vld [vmem:[#allocation16 + $0xc0] ss:$16 sps:$4 sm:$0xff]  }
 0x8c7   :  { %v5278_v36 = vpop.eup %5277 }
 0x8c8   :  { %v1120_v39 = vmul.f32 %v5278_v36, %v5272_v25  ;;  %v5029_v36 = vld [vmem:[#allocation16 + $0xc4] ss:$16 sps:$4 sm:$0xff]  }
 0x8c9   :  { %1590 = vmatprep.subr.bf16.mxu1 %v5029_v36  ;;  %v5072_v36 = vld [vmem:[#allocation17 + $0xb8] sm:$0xff]  }
 0x8ca   :  { %1591 = vmatpush1.bf16.msra.mxu1 %v5027_v35  ;;  %v5071_v35 = vld [vmem:[#allocation17 + $0x38] sm:$0xff]  }
 0x8cb   :  { %v5280_v20 = vpop.eup %5279 }
 0x8cc   :  { %v5282_v37 = vpop.eup %5281  ;;  %v1121_v40 = vmul.f32 %v5280_v20, %v5274_v27  ;;  %v5030_v20 = vld [vmem:[#allocation16 + $0xc8] ss:$16 sps:$4 sm:$0xff]  }
 0x8cd   :  { %v1122_v44 = vmul.f32 %v5282_v37, %v5276_v28  ;;  %v5032_v37 = vld [vmem:[#allocation16 + $0xcc] ss:$16 sps:$4 sm:$0xff]  }
 0x8ce   :  { %v1123_v54 = vpack.c.bf16 %v1121_v40, %v1120_v39  ;;  %v5033_v39 = vld [vmem:[#allocation16 + $0xa0] ss:$16 sps:$4 sm:$0xff]   ;;  %v5035_v40 = vld [vmem:[#allocation16 + $0xa4] ss:$16 sps:$4 sm:$0xff]  }
 0x8cf   :  { %v1124_v46 = vpack.c.bf16 %v1122_v44, %v1122_v44  ;;  %v5036_v44 = vld [vmem:[#allocation16 + $0xa8] ss:$16 sps:$4 sm:$0xff]   ;;  %1592 = vmatprep.subr.bf16.mxu1 %v5035_v40 }
 0x8d0   :  { %4801 = vmatprep.mubr.msk.bf16.mxu0 %vm616_vm2, %v1123_v54  ;;  %v5038_v54 = vld [vmem:[#allocation16 + $0xac] ss:$16 sps:$4 sm:$0xff]   ;;  %1593 = vmatpush1.bf16.msra.mxu1 %v5033_v39  ;;  %v5076_v39 = vld [vmem:[#allocation17 + $0xb0] sm:$0xff]  }
 0x8d1   :  { %4802 = vmatmul.mubr.msk.bf16.vlgmr.msra.gmra.mxu0 %vm616_vm2, %v1124_v46  ;;  %v5041_v46 = vld [vmem:[#allocation16 + $0x84] ss:$16 sps:$4 sm:$0xff]   ;;  %v5077_v40 = vld [vmem:[#allocation17 + $0x68] sm:$0xff]  }
 0x8d2   :  { %4806 = vmatpush3.bf16.msra.mxu0 %v5013_v38  ;;  %1594 = vmatprep.subr.bf16.mxu1 %v5041_v46  ;;  %v5080_v46 = vld [vmem:[#allocation17 + $0xa8] sm:$0xff]  }
 0x8d3   :  { %4807 = vmatprep.subr.bf16.mxu0 %v5014_v47 }
 0x8d6   :  { %4808 = vmatpush3.bf16.msra.mxu0 %v5014_v47  ;;  %v5044_v47 = vld [vmem:[#allocation16 + $0x8c] ss:$16 sps:$4 sm:$0xff]  }
 0x8d7   :  { %4809 = vmatprep.subr.bf16.mxu0 %v5015_v48 }
 0x8da   :  { %4810 = vmatpush3.bf16.msra.mxu0 %v5015_v48  ;;  %v5039_v48 = vld [vmem:[#allocation16 + $0x80] ss:$16 sps:$4 sm:$0xff]  }
 0x8db   :  { %4811 = vmatprep.subr.bf16.mxu0 %v5016_v49  ;;  %1595 = vmatpush1.bf16.msra.mxu1 %v5039_v48  ;;  %v5082_v48 = vld [vmem:[#allocation17 + $0xe0] sm:$0xff]  }
 0x8de   :  { %4812 = vmatpush3.bf16.msra.mxu0 %v5016_v49  ;;  %v5042_v49 = vld [vmem:[#allocation16 + $0x88] ss:$16 sps:$4 sm:$0xff]  }
 0x8df   :  { %4813 = vmatprep.subr.bf16.mxu0 %v5017_v50 }
 0x8e2   :  { %4814 = vmatpush3.bf16.msra.mxu0 %v5017_v50  ;;  %v5047_v50 = vld [vmem:[#allocation16 + $0x64] ss:$16 sps:$4 sm:$0xff]  }
 0x8e3   :  { %4815 = vmatprep.subr.bf16.mxu0 %v5018_v57  ;;  %1596 = vmatprep.subr.bf16.mxu1 %v5047_v50  ;;  %v5084_v50 = vld [vmem:[#allocation17 + $0xa0] sm:$0xff]  }
 0x8e6   :  { %4816 = vmatpush3.bf16.msra.mxu0 %v5018_v57  ;;  %v5050_v57 = vld [vmem:[#allocation16 + $0x6c] ss:$16 sps:$4 sm:$0xff]  }
 0x8e7   :  { %4817 = vmatprep.subr.bf16.mxu0 %v5019_v14 }
 0x8ea   :  { %4818 = vmatpush3.bf16.msra.mxu0 %v5019_v14  ;;  %v5045_v14 = vld [vmem:[#allocation16 + $0x60] ss:$16 sps:$4 sm:$0xff]  }
 0x8eb   :  { %4819 = vmatprep.subr.bf16.mxu0 %v5020_v58  ;;  %1597 = vmatpush1.bf16.msra.mxu1 %v5045_v14  ;;  %v5086_v14 = vld [vmem:[#allocation17 + $0xd8] sm:$0xff]  }
 0x8ee   :  { %4820 = vmatpush3.bf16.msra.mxu0 %v5020_v58  ;;  %v5048_v58 = vld [vmem:[#allocation16 + $0x68] ss:$16 sps:$4 sm:$0xff]  }
 0x8ef   :  { %1639 = vmatprep.subr.bf16.mxu0 %v5026_v18 }
 0x991   :  { %v4803_v55 = vpop.f32.mrf.mxu0 }
 0x992   :  { %v1189_v45 = vadd.f32 %v4803_v55, %v6034_v56  ;;  %v5053_v55 = vld [vmem:[#allocation16 + $0x44] ss:$16 sps:$4 sm:$0xff]  }
 0x993   :  { %v1173_v60 = vpop.f32.mrf.mxu0  ;;  %1598 = vmatprep.subr.bf16.mxu1 %v5053_v55  ;;  %v5088_v55 = vld [vmem:[#allocation17 + $0x98] sm:$0xff]  }
 0x994   :  { %v1187_v53 = vadd.f32 %v1173_v60, %v6036_v1  ;;  %v1207_v2 = vpack.c.bf16 %v1189_v45, %v1189_v45  ;;  %v5056_v60 = vld [vmem:[#allocation16 + $0x4c] ss:$16 sps:$4 sm:$0xff]   ;;  %1599 = vmatpush1.bf16.msra.mxu1 %v5051_v61  ;;  %v5090_v61 = vld [vmem:[#allocation17 + $0xd0] sm:$0xff]  }
 0x995   :  { %v4804_v62 = vpop.f32.mrf.mxu0  ;;  %v5062_v45 = vld [vmem:[#allocation16 + $0x2c] ss:$16 sps:$4 sm:$0xff]  }
 0x996   :  { %v5054_v62 = vld [vmem:[#allocation16 + $0x48] ss:$16 sps:$4 sm:$0xff]  }
 0x997   :  { %v1176_v52 = vpop.f32.mrf.mxu0 }
 0x998   :  { %v1188_v51 = vadd.f32 %v1176_v52, %v1029_v63  ;;  %v5059_v63 = vld [vmem:[#allocation16 + $0x24] ss:$16 sps:$4 sm:$0xff]   ;;  %v5057_v52 = vld [vmem:[#allocation16 + $0x20] ss:$16 sps:$4 sm:$0xff]  }
 0x999   :  { %1600 = vmatprep.subr.bf16.mxu1 %v5059_v63  ;;  %v5092_v63 = vld [vmem:[#allocation17 + $0x90] sm:$0xff]  }
 0x99a   :  { %v1206_v42 = vpack.c.bf16 %v1188_v51, %v1187_v53  ;;  %v5060_v53 = vld [vmem:[#allocation16 + $0x28] ss:$16 sps:$4 sm:$0xff]   ;;  %v5065_v51 = vld [vmem:[#allocation16 + $0x4] ss:$16 sps:$4 sm:$0xff]   ;;  %1601 = vmatpush1.bf16.msra.mxu1 %v5057_v52 }
 0x99b   :  { %1602 = vmatprep.subr.bf16.mxu1 %v5065_v51  ;;  %v5094_v52 = vld [vmem:[#allocation17 + $0xc8] sm:$0xff]  }
 0x99c   :  { %4821 = vmatprep.mubr.bf16.mxu0 %v1206_v42  ;;  %v5068_v42 = vld [vmem:[#allocation16 + $0xc] ss:$16 sps:$4 sm:$0xff]  }
 0x99d   :  { %4822 = vmatmul.mubr.bf16.vlgmr.msra.gmra.mxu0 %v1207_v2  ;;  %v5063_v2 = vld [vmem:[#allocation16] ss:$16 sps:$4 sm:$0xff]   ;;  %v5096_v51 = vld [vmem:[#allocation17 + $0x88] sm:$0xff]  }
 0x99e   :  { %1671 = vmatprep.mubr.bf16.mxu0 %v5683_v34  ;;  %1640 = vmatpush1.bf16.msra.mxu0 %v5024_v21 }
 0x99f   :  { %1641 = vmatprep.subr.bf16.mxu0 %v5032_v37  ;;  %1603 = vmatpush1.bf16.msra.mxu1 %v5063_v2  ;;  %v5075_v37 = vld [vmem:[#allocation17 + $0x30] sm:$0xff]   ;;  %v5098_v2 = vld [vmem:[#allocation17 + $0xc0] sm:$0xff]  }
 0x9a2   :  { %1642 = vmatpush1.bf16.msra.mxu0 %v5030_v20  ;;  %v5074_v20 = vld [vmem:[#allocation17 + $0xf0] sm:$0xff]  }
 0x9a3   :  { %1643 = vmatprep.subr.bf16.mxu0 %v5038_v54  ;;  %v5079_v54 = vld [vmem:[#allocation17 + $0x28] sm:$0xff]  }
 0x9a6   :  { %1644 = vmatpush1.bf16.msra.mxu0 %v5036_v44  ;;  %v5078_v44 = vld [vmem:[#allocation17 + $0xe8] sm:$0xff]  }
 0x9a7   :  { %1645 = vmatprep.subr.bf16.mxu0 %v5044_v47  ;;  %v5081_v47 = vld [vmem:[#allocation17 + $0x60] sm:$0xff]  }
 0x9aa   :  { %1646 = vmatpush1.bf16.msra.mxu0 %v5042_v49  ;;  %v5083_v49 = vld [vmem:[#allocation17 + $0x20] sm:$0xff]  }
 0x9ab   :  { %1647 = vmatprep.subr.bf16.mxu0 %v5050_v57  ;;  %v5085_v57 = vld [vmem:[#allocation17 + $0x58] sm:$0xff]  }
 0x9ae   :  { %1648 = vmatpush1.bf16.msra.mxu0 %v5048_v58  ;;  %v5087_v58 = vld [vmem:[#allocation17 + $0x18] sm:$0xff]  }
 0x9af   :  { %1649 = vmatprep.subr.bf16.mxu0 %v5056_v60  ;;  %v5089_v60 = vld [vmem:[#allocation17 + $0x50] sm:$0xff]  }
 0x9b2   :  { %1650 = vmatpush1.bf16.msra.mxu0 %v5054_v62  ;;  %v5091_v62 = vld [vmem:[#allocation17 + $0x10] sm:$0xff]  }
 0x9b3   :  { %1651 = vmatprep.subr.bf16.mxu0 %v5062_v45  ;;  %v5093_v45 = vld [vmem:[#allocation17 + $0x48] sm:$0xff]  }
 0x9b6   :  { %1652 = vmatpush1.bf16.msra.mxu0 %v5060_v53  ;;  %v5095_v53 = vld [vmem:[#allocation17 + $0x8] sm:$0xff]  }
 0x9b7   :  { %1653 = vmatprep.subr.bf16.mxu0 %v5068_v42  ;;  %v5097_v42 = vld [vmem:[#allocation17 + $0x40] sm:$0xff]  }
 0xa5d   :  { %v4823_v3 = vpop.f32.mrf.mxu0 }
 0xa5e   :  { %v1306_v7 = vadd.f32 %v5399_v6, %v4823_v3  ;;  %v5066_v3 = vld [vmem:[#allocation16 + $0x8] ss:$16 sps:$4 sm:$0xff]  }
 0xa5f   :  { %v1290_v8 = vpop.f32.mrf.mxu0  ;;  %1654 = vmatpush1.bf16.msra.mxu0 %v5066_v3  ;;  %v5099_v3 = vld [vmem:[#allocation17] sm:$0xff]  }
 0xa60   :  { %v1304_v30 = vadd.f32 %v5400_v0, %v1290_v8  ;;  %v6059_v56 = vadd.f32 %v4303_v41, %v1306_v7 }
 0xa61   :  { %v4824_v59 = vpop.f32.mrf.mxu0 }
 0xa62   :  { %v6057_v9 = vadd.f32 %v4303_v41, %v1304_v30  ;;  %v1323_v12 = vsel %vm226_vm0, %v6059_v56, 0.0 }
 0xa63   :  { %v1293_v1 = vpop.f32.mrf.mxu0 }
 0xa64   :  { %v1305_v10 = vadd.f32 %v5401_v43, %v1293_v1  ;;  %1319 = vadd.xlane.f32.xlu0 %v6057_v9 }
 0xa66   :  { %v6062_v11 = vadd.f32 %v4303_v41, %v1305_v10 }
 0xa68   :  { %1324 = vadd.xlane.f32.xlu0 %v1323_v12  ;;  %1321 = vadd.xlane.f32.xlu1 %v6062_v11 }
 0xaed   :  { %v1320_v22 = vpop.xlane.xlu0 %1319 }
 0xaee   :  { %v1326_v19 = vmul.f32 0.0078125, %v1320_v22 }
 0xaf0   :  { %v6068_v23 = vsub.f32 %v6057_v9, %v1326_v19  ;;  %v4305_v19 = vld [vmem:[%s6570_s10] ss:$0 sm:$0xff] }
 0xaf1   :  { %v1325_v24 = vpop.xlane.xlu0 %1324  ;;  %v1322_v25 = vpop.xlane.xlu1 %1321 }
 0xaf2   :  { %v1328_v26 = vmul.f32 0.0078125, %v1325_v24  ;;  %v1327_v27 = vmul.f32 0.0078125, %v1322_v25  ;;  %v1332_v28 = vmul.f32 %v6068_v23, %v6068_v23 }
 0xaf4   :  { %v6073_v31 = vsub.f32 %v6059_v56, %v1328_v26  ;;  %v6076_v29 = vsub.f32 %v6062_v11, %v1327_v27  ;;  %1335 = vadd.xlane.f32.xlu1 %v1332_v28 }
 0xaf6   :  { %v1333_v38 = vmul.f32 %v6076_v29, %v6076_v29  ;;  %v1334_v32 = vmul.f32 %v6073_v31, %v6073_v31 }
 0xaf8   :  { %1337 = vadd.xlane.f32.xlu0 %v1333_v38  ;;  %v1339_v33 = vsel %vm226_vm0, %v1334_v32, 0.0  ;;  %v5069_v32 = vld [vmem:[#allocation17 + $0x78] sm:$0xff]  }
 0xaf9   :  { %1340 = vadd.xlane.f32.xlu1 %v1339_v33  ;;  %v5070_v33 = vld [vmem:[#allocation17 + $0xf8] sm:$0xff]   ;;  %4548 = vmatprep.subr.bf16.mxu1 %v5069_v32 }
 0xafa   :  { %4576 = vmatprep.subr.bf16.mxu0 %v5070_v33 }
 0xb7d   :  { %v1336_v6 = vpop.xlane.xlu1 %1335 }
 0xb7e   :  { %v1342_v7 = vmul.f32 0.0078125, %v1336_v6  ;;  %v5100_v6 = vld [vmem:[#allocation17 + $0x80] sm:$0xff]  }
 0xb80   :  { %v1345_v8 = vadd.f32 1e-05, %v1342_v7  ;;  %v1406_v7 = vld [vmem:[%s6572_s12] sm:$0xf] }
 0xb81   :  { %v1338_v41 = vpop.xlane.xlu0 %1337 }
 0xb82   :  { %5283 = vrsqrt.f32 %v1345_v8  ;;  %v1343_v0 = vmul.f32 0.0078125, %v1338_v41  ;;  %v1341_v30 = vpop.xlane.xlu1 %1340  ;;  %v1422_v8 = vsub.s32 3, %v5865_v4  ;;  %v1411_v41 = vrot.slane %v1406_v7, %v5868_v5 }
 0xb83   :  { %v1344_v59 = vmul.f32 0.0078125, %v1341_v30  ;;  %v6100_v30 = vrot.slane %v1406_v7, %v5882_v17 }
 0xb84   :  { %v1346_v1 = vadd.f32 1e-05, %v1343_v0  ;;  %v6097_v0 = vrot.slane %v1406_v7, %v5875_v13 }
 0xb85   :  { %v1347_v43 = vadd.f32 1e-05, %v1344_v59  ;;  %v6104_v59 = vrot.slane %v1406_v7, %v1422_v8 }
 0xb86   :  { %5285 = vrsqrt.f32 %v1346_v1 }
 0xb87   :  { %5287 = vrsqrt.f32 %v1347_v43 }
 0xb8f   :  { %v5284_v10 = vpop.eup %5283 }
 0xb90   :  { %v1351_v12 = vmul.f32 %v5284_v10, %v6068_v23 }
 0xb92   :  { %v1360_v22 = vmul.f32 %v4304_v16, %v1351_v12 }
 0xb93   :  { %v5286_v15 = vpop.eup %5285 }
 0xb94   :  { %v5288_v21 = vpop.eup %5287  ;;  %v1352_v18 = vmul.f32 %v5286_v15, %v6076_v29  ;;  %v1369_v26 = vadd.f32 %v4305_v19, %v1360_v22 }
 0xb95   :  { %v1353_v25 = vmul.f32 %v5288_v21, %v6073_v31  ;;  %v5073_v31 = vld [vmem:[#allocation17 + $0x70] sm:$0xff]  }
 0xb96   :  { %v1361_v24 = vmul.f32 %v4304_v16, %v1352_v18 }
 0xb97   :  { %v1362_v38 = vmul.f32 %v4304_v16, %v1353_v25 }
 0xb98   :  { %v1370_v27 = vadd.f32 %v4305_v19, %v1361_v24 }
 0xb99   :  { %v1371_v23 = vadd.f32 %v4305_v19, %v1362_v38 }
 0xb9a   :  { %v1404_v28 = vpack.c.bf16 %v1370_v27, %v1369_v26 }
 0xb9b   :  { %v1405_v29 = vpack.c.bf16 %v1371_v23, %v1371_v23 }
 0xb9c   :  { %1621 = vmatmul.mubr.bf16.vlgmr.msra.gmra.mxu1 %v1404_v28  ;;  %1672 = vmatmul.mubr.bf16.vlgmr.msra.gmra.mxu0 %v1404_v28 }
 0xb9d   :  { %1630 = vmatprep.mubr.bf16.mxu1 %v5683_v34  ;;  %1681 = vmatprep.mubr.bf16.mxu0 %v5683_v34 }
 0xb9e   :  { %4549 = vmatpush3.bf16.msra.mxu1 %v5071_v35  ;;  %4577 = vmatpush3.bf16.msra.mxu0 %v5072_v36 }
 0xb9f   :  { %4550 = vmatprep.subr.bf16.mxu1 %v5073_v31  ;;  %4578 = vmatprep.subr.bf16.mxu0 %v5074_v20 }
 0xba2   :  { %4551 = vmatpush3.bf16.msra.mxu1 %v5075_v37  ;;  %4579 = vmatpush3.bf16.msra.mxu0 %v5076_v39 }
 0xba3   :  { %4552 = vmatprep.subr.bf16.mxu1 %v5077_v40  ;;  %4580 = vmatprep.subr.bf16.mxu0 %v5078_v44 }
 0xba4   :  { %1631 = vmatmul.mubr.bf16.gmra.mxu1 %v1405_v29  ;;  %1682 = vmatmul.mubr.bf16.gmra.mxu0 %v1405_v29 }
 0xba6   :  { %4553 = vmatpush3.bf16.msra.mxu1 %v5079_v54  ;;  %4581 = vmatpush3.bf16.msra.mxu0 %v5080_v46 }
 0xba7   :  { %4554 = vmatprep.subr.bf16.mxu1 %v5081_v47  ;;  %4582 = vmatprep.subr.bf16.mxu0 %v5082_v48 }
 0xbaa   :  { %4555 = vmatpush3.bf16.msra.mxu1 %v5083_v49  ;;  %4583 = vmatpush3.bf16.msra.mxu0 %v5084_v50 }
 0xbab   :  { %4556 = vmatprep.subr.bf16.mxu1 %v5085_v57  ;;  %4584 = vmatprep.subr.bf16.mxu0 %v5086_v14 }
 0xbae   :  { %4557 = vmatpush3.bf16.msra.mxu1 %v5087_v58  ;;  %4585 = vmatpush3.bf16.msra.mxu0 %v5088_v55 }
 0xbaf   :  { %4558 = vmatprep.subr.bf16.mxu1 %v5089_v60  ;;  %4586 = vmatprep.subr.bf16.mxu0 %v5090_v61 }
 0xbb2   :  { %4559 = vmatpush3.bf16.msra.mxu1 %v5091_v62  ;;  %4587 = vmatpush3.bf16.msra.mxu0 %v5092_v63 }
 0xbb3   :  { %4560 = vmatprep.subr.bf16.mxu1 %v5093_v45  ;;  %4588 = vmatprep.subr.bf16.mxu0 %v5094_v52 }
 0xbb6   :  { %4561 = vmatpush3.bf16.msra.mxu1 %v5095_v53  ;;  %4589 = vmatpush3.bf16.msra.mxu0 %v5096_v51 }
 0xbb7   :  { %4562 = vmatprep.subr.bf16.mxu1 %v5097_v42  ;;  %4590 = vmatprep.subr.bf16.mxu0 %v5098_v2 }
 0xbba   :  { %4563 = vmatpush3.bf16.msra.mxu1 %v5099_v3  ;;  %4591 = vmatpush3.bf16.msra.mxu0 %v5100_v6 }
 0xc5c   :  { %v1622_v1 = vpop.f32.mrf.mxu1  ;;  %v1673_v43 = vpop.f32.mrf.mxu0 }
 0xc5d   :  { %v6106_v10 = vadd.f32 %v1622_v1, %v1411_v41  ;;  %v6109_v12 = vadd.f32 %v1673_v43, %v6097_v0 }
 0xc5e   :  { %v1624_v16 = vpop.f32.mrf.mxu1  ;;  %v1675_v15 = vpop.f32.mrf.mxu0 }
 0xc5f   :  { %v1690_v21 = vmul.f32 %v6106_v10, %v6106_v10  ;;  %v1692_v18 = vmul.f32 %v6109_v12, %v6109_v12  ;;  %v6116_v22 = vadd.f32 %v1624_v16, %v6100_v30  ;;  %v6119_v19 = vadd.f32 %v1675_v15, %v6104_v59 }
 0xc60   :  { %v1626_v24 = vpop.f32.mrf.mxu1  ;;  %v1677_v25 = vpop.f32.mrf.mxu0 }
 0xc61   :  { %v1702_v26 = vmul.f32 %v1690_v21, %v6106_v10  ;;  %v1704_v27 = vmul.f32 %v1692_v18, %v6109_v12  ;;  %v1691_v28 = vmul.f32 %v6116_v22, %v6116_v22  ;;  %v1693_v38 = vmul.f32 %v6119_v19, %v6119_v19 }
 0xc62   :  { %v6127_v23 = vadd.f32 %v1626_v24, %v1411_v41  ;;  %v6130_v29 = vadd.f32 %v1677_v25, %v6097_v0  ;;  %v1628_v32 = vpop.f32.mrf.mxu1  ;;  %v1679_v33 = vpop.f32.mrf.mxu0 }
 0xc63   :  { %v1714_v35 = vmul.f32 0.044715, %v1702_v26  ;;  %v1716_v36 = vmul.f32 0.044715, %v1704_v27  ;;  %v1703_v31 = vmul.f32 %v1691_v28, %v6116_v22  ;;  %v1705_v20 = vmul.f32 %v1693_v38, %v6119_v19 }
 0xc64   :  { %v1694_v37 = vmul.f32 %v6127_v23, %v6127_v23  ;;  %v1696_v39 = vmul.f32 %v6130_v29, %v6130_v29  ;;  %v6139_v40 = vadd.f32 %v1628_v32, %v6100_v30  ;;  %v6142_v44 = vadd.f32 %v1679_v33, %v6104_v59  ;;  %v1632_v54 = vpop.f32.mrf.mxu1  ;;  %v1683_v46 = vpop.f32.mrf.mxu0 }
 0xc65   :  { %v1726_v47 = vadd.f32 %v1714_v35, %v6106_v10  ;;  %v1728_v48 = vadd.f32 %v1716_v36, %v6109_v12  ;;  %v1715_v49 = vmul.f32 0.044715, %v1703_v31  ;;  %v1717_v50 = vmul.f32 0.044715, %v1705_v20 }
 0xc66   :  { %v1706_v57 = vmul.f32 %v1694_v37, %v6127_v23  ;;  %v1708_v14 = vmul.f32 %v1696_v39, %v6130_v29  ;;  %v1695_v58 = vmul.f32 %v6139_v40, %v6139_v40  ;;  %v1697_v55 = vmul.f32 %v6142_v44, %v6142_v44  ;;  %v1634_v60 = vpop.f32.mrf.mxu1  ;;  %v1685_v61 = vpop.f32.mrf.mxu0 }
 0xc67   :  { %v1738_v62 = vmul.f32 0.7978846, %v1726_v47  ;;  %v1740_v63 = vmul.f32 0.7978846, %v1728_v48  ;;  %v1727_v45 = vadd.f32 %v1715_v49, %v6116_v22  ;;  %v1729_v52 = vadd.f32 %v1717_v50, %v6119_v19 }
 0xc68   :  { %v1718_v53 = vmul.f32 0.044715, %v1706_v57  ;;  %v1720_v51 = vmul.f32 0.044715, %v1708_v14  ;;  %v1707_v42 = vmul.f32 %v1695_v58, %v6139_v40  ;;  %v1709_v2 = vmul.f32 %v1697_v55, %v6142_v44  ;;  %v1636_v3 = vpop.f32.mrf.mxu1  ;;  %v1687_v6 = vpop.f32.mrf.mxu0 }
 0xc69   :  { %5289 = vtanh.f32 %v1738_v62  ;;  %v1739_v7 = vmul.f32 0.7978846, %v1727_v45  ;;  %v1741_v1 = vmul.f32 0.7978846, %v1729_v52  ;;  %v6156_v43 = vadd.f32 %v1632_v54, %v1411_v41 }
 0xc6a   :  { %5291 = vtanh.f32 %v1740_v63  ;;  %v1730_v16 = vadd.f32 %v1718_v53, %v6127_v23  ;;  %v1732_v15 = vadd.f32 %v1720_v51, %v6130_v29  ;;  %v1719_v21 = vmul.f32 0.044715, %v1707_v42  ;;  %v1637_v18 = vpop.f32.mrf.mxu1  ;;  %v1688_v24 = vpop.f32.mrf.mxu0 }
 0xc6b   :  { %5293 = vtanh.f32 %v1739_v7  ;;  %v1721_v25 = vmul.f32 0.044715, %v1709_v2  ;;  %v1698_v26 = vmul.f32 %v6156_v43, %v6156_v43  ;;  %v6163_v27 = vadd.f32 %v1683_v46, %v6097_v0 }
 0xc6c   :  { %5295 = vtanh.f32 %v1741_v1  ;;  %v1742_v28 = vmul.f32 0.7978846, %v1730_v16  ;;  %v1744_v41 = vmul.f32 0.7978846, %v1732_v15  ;;  %v1731_v38 = vadd.f32 %v1719_v21, %v6139_v40 }
 0xc6d   :  { %v1733_v32 = vadd.f32 %v1721_v25, %v6142_v44  ;;  %v1710_v33 = vmul.f32 %v1698_v26, %v6156_v43  ;;  %v1700_v35 = vmul.f32 %v6163_v27, %v6163_v27  ;;  %v6171_v36 = vadd.f32 %v1634_v60, %v6100_v30 }
 0xc6e   :  { %5297 = vtanh.f32 %v1742_v28  ;;  %v1743_v31 = vmul.f32 0.7978846, %v1731_v38  ;;  %v6174_v0 = vadd.f32 %v1685_v61, %v6104_v59 }
 0xc6f   :  { %5299 = vtanh.f32 %v1744_v41  ;;  %v1745_v20 = vmul.f32 0.7978846, %v1733_v32  ;;  %v1722_v37 = vmul.f32 0.044715, %v1710_v33  ;;  %v1712_v39 = vmul.f32 %v1700_v35, %v6163_v27 }
 0xc70   :  { %5301 = vtanh.f32 %v1743_v31  ;;  %v1699_v54 = vmul.f32 %v6171_v36, %v6171_v36  ;;  %v1701_v46 = vmul.f32 %v6174_v0, %v6174_v0 }
 0xc71   :  { %5303 = vtanh.f32 %v1745_v20  ;;  %v1734_v30 = vadd.f32 %v1722_v37, %v6156_v43  ;;  %v1724_v47 = vmul.f32 0.044715, %v1712_v39 }
 0xc72   :  { %v1711_v48 = vmul.f32 %v1699_v54, %v6171_v36  ;;  %v1713_v59 = vmul.f32 %v1701_v46, %v6174_v0 }
 0xc73   :  { %v1746_v49 = vmul.f32 0.7978846, %v1734_v30  ;;  %v1736_v50 = vadd.f32 %v1724_v47, %v6163_v27 }
 0xc74   :  { %v1723_v57 = vmul.f32 0.044715, %v1711_v48  ;;  %v1725_v14 = vmul.f32 0.044715, %v1713_v59 }
 0xc75   :  { %5305 = vtanh.f32 %v1746_v49  ;;  %v1748_v58 = vmul.f32 0.7978846, %v1736_v50 }
 0xc76   :  { %v5290_v55 = vpop.eup %5289  ;;  %v1735_v60 = vadd.f32 %v1723_v57, %v6171_v36  ;;  %v1737_v61 = vadd.f32 %v1725_v14, %v6174_v0 }
 0xc77   :  { %v5292_v62 = vpop.eup %5291  ;;  %5307 = vtanh.f32 %v1748_v58  ;;  %v1762_v2 = vadd.f32 1.0, %v5290_v55 }
 0xc78   :  { %v5294_v63 = vpop.eup %5293  ;;  %v1747_v45 = vmul.f32 0.7978846, %v1735_v60  ;;  %v1749_v52 = vmul.f32 0.7978846, %v1737_v61  ;;  %v1764_v7 = vadd.f32 1.0, %v5292_v62 }
 0xc79   :  { %v5296_v53 = vpop.eup %5295  ;;  %v1763_v51 = vadd.f32 1.0, %v5294_v63  ;;  %v1774_v26 = vmul.f32 0.5, %v1762_v2 }
 0xc7a   :  { %5309 = vtanh.f32 %v1747_v45  ;;  %v1765_v3 = vadd.f32 1.0, %v5296_v53  ;;  %v1776_v32 = vmul.f32 0.5, %v1764_v7 }
 0xc7b   :  { %v5298_v42 = vpop.eup %5297  ;;  %5311 = vtanh.f32 %v1749_v52  ;;  %v1775_v25 = vmul.f32 0.5, %v1763_v51  ;;  %v1786_v46 = vmul.f32 %v1774_v26, %v6106_v10 }
 0xc7c   :  { %v5300_v6 = vpop.eup %5299  ;;  %v1766_v1 = vadd.f32 1.0, %v5298_v42  ;;  %v1777_v38 = vmul.f32 0.5, %v1765_v3  ;;  %v1788_v49 = vmul.f32 %v1776_v32, %v6109_v12 }
 0xc7d   :  { %v5302_v16 = vpop.eup %5301  ;;  %v1768_v15 = vadd.f32 1.0, %v5300_v6  ;;  %v1787_v39 = vmul.f32 %v1775_v25, %v6116_v22 }
 0xc7e   :  { %v5304_v21 = vpop.eup %5303  ;;  %v1778_v18 = vmul.f32 0.5, %v1766_v1  ;;  %v1767_v24 = vadd.f32 1.0, %v5302_v16  ;;  %v1789_v30 = vmul.f32 %v1777_v38, %v6119_v19 }
 0xc7f   :  { %v1780_v28 = vmul.f32 0.5, %v1768_v15  ;;  %v1769_v41 = vadd.f32 1.0, %v5304_v21  ;;  %v4370_v21 = vld [vmem:[%s6574_s14] ss:$0 sm:$0xff] }
 0xc80   :  { %v1779_v33 = vmul.f32 0.5, %v1767_v24  ;;  %v1790_v35 = vmul.f32 %v1778_v18, %v6127_v23 }
 0xc81   :  { %v1781_v31 = vmul.f32 0.5, %v1769_v41  ;;  %v1792_v37 = vmul.f32 %v1780_v28, %v6130_v29 }
 0xc82   :  { %v5306_v20 = vpop.eup %5305  ;;  %v1791_v54 = vmul.f32 %v1779_v33, %v6139_v40  ;;  %v1862_v23 = vpack.c.bf16 %v1790_v35, %v1786_v46 }
 0xc83   :  { %v1793_v47 = vmul.f32 %v1781_v31, %v6142_v44  ;;  %v1770_v48 = vadd.f32 1.0, %v5306_v20  ;;  %v1864_v58 = vpack.c.bf16 %v1792_v37, %v1788_v49 }
 0xc84   :  { %v5308_v59 = vpop.eup %5307  ;;  %v1863_v50 = vpack.c.bf16 %v1791_v54, %v1787_v39 }
 0xc85   :  { %v1865_v57 = vpack.c.bf16 %v1793_v47, %v1789_v30  ;;  %v1772_v14 = vadd.f32 1.0, %v5308_v59  ;;  %v1782_v22 = vmul.f32 0.5, %v1770_v48  ;;  %v5101_v48 = vld [vmem:[#allocation10 + $0x168] ss:$12 sps:$4 sm:$0xff]   ;;  %v5103_v59 = vld [vmem:[#allocation10 + $0x16c] ss:$12 sps:$4 sm:$0xff]  }
 0xc86   :  { %2094 = vmatprep.mubr.bf16.mxu1 %v1863_v50  ;;  %2409 = vmatprep.subr.bf16.mxu1 %v5103_v59 }
 0xc87   :  { %v5310_v29 = vpop.eup %5309  ;;  %2142 = vmatprep.mubr.bf16.mxu0 %v1865_v57  ;;  %2095 = vmatmul.mubr.bf16.vlgmr.msra.gmra.mxu1 %v1862_v23  ;;  %v1784_v19 = vmul.f32 0.5, %v1772_v14  ;;  %v1794_v61 = vmul.f32 %v1782_v22, %v6156_v43 }
 0xc88   :  { %v5312_v40 = vpop.eup %5311  ;;  %2143 = vmatmul.mubr.bf16.vlgmr.msra.gmra.mxu0 %v1864_v58  ;;  %v1771_v10 = vadd.f32 1.0, %v5310_v29  ;;  %2410 = vmatpush1.bf16.msra.mxu1 %v5101_v48 }
 0xc89   :  { %v1773_v55 = vadd.f32 1.0, %v5312_v40  ;;  %v1796_v62 = vmul.f32 %v1784_v19, %v6163_v27  ;;  %v1866_v53 = vpack.c.bf16 %v1794_v61, %v1794_v61  ;;  %v5107_v61 = vld [vmem:[#allocation10 + $0x170] ss:$12 sps:$4 sm:$0xff]  }
 0xc8a   :  { %v1783_v44 = vmul.f32 0.5, %v1771_v10  ;;  %4825 = vmatprep.subr.bf16.mxu0 %v5107_v61 }
 0xc8b   :  { %v1785_v60 = vmul.f32 0.5, %v1773_v55  ;;  %v1868_v51 = vpack.c.bf16 %v1796_v62, %v1796_v62  ;;  %4826 = vmatpush3.bf16.msra.mxu0 %v5107_v61  ;;  %v5108_v62 = vld [vmem:[#allocation10 + $0x138] ss:$12 sps:$4 sm:$0xff]  }
 0xc8c   :  { %v1795_v12 = vmul.f32 %v1783_v44, %v6171_v36  ;;  %v5106_v44 = vld [vmem:[#allocation10 + $0x154] ss:$12 sps:$4 sm:$0xff]  }
 0xc8d   :  { %v1797_v63 = vmul.f32 %v1785_v60, %v6174_v0  ;;  %v5104_v60 = vld [vmem:[#allocation10 + $0x150] ss:$12 sps:$4 sm:$0xff]   ;;  %2411 = vmatprep.subr.bf16.mxu1 %v5106_v44 }
 0xc8e   :  { %v1867_v45 = vpack.c.bf16 %v1795_v12, %v1795_v12  ;;  %2412 = vmatpush1.bf16.msra.mxu1 %v5104_v60  ;;  %v5110_v12 = vld [vmem:[#allocation10 + $0x13c] ss:$12 sps:$4 sm:$0xff]   ;;  %v6244_v60 = vld [vmem:[#allocation7] ss:$0 sm:$0xff] }
 0xc8f   :  { %v1869_v52 = vpack.c.bf16 %v1797_v63, %v1797_v63  ;;  %2413 = vmatprep.subr.bf16.mxu1 %v5110_v12  ;;  %v5111_v63 = vld [vmem:[#allocation10 + $0x158] ss:$12 sps:$4 sm:$0xff]  }
 0xc90   :  { %2102 = vmatprep.mubr.bf16.mxu1 %v1867_v45  ;;  %4827 = vmatprep.subr.bf16.mxu0 %v5111_v63  ;;  %v5114_v45 = vld [vmem:[#allocation10 + $0x124] ss:$12 sps:$4 sm:$0xff]  }
 0xc91   :  { %2150 = vmatprep.mubr.bf16.mxu0 %v1869_v52  ;;  %2103 = vmatmul.mubr.bf16.gmra.mxu1 %v1866_v53  ;;  %v5112_v52 = vld [vmem:[#allocation10 + $0x120] ss:$12 sps:$4 sm:$0xff]  }
 0xc92   :  { %2151 = vmatmul.mubr.bf16.gmra.mxu0 %v1868_v51  ;;  %2441 = vmatprep.mubr.bf16.mxu1 %v5683_v34  ;;  %v5115_v53 = vld [vmem:[#allocation10 + $0x140] ss:$12 sps:$4 sm:$0xff]  }
 0xc93   :  { %2414 = vmatpush1.bf16.msra.mxu1 %v5108_v62  ;;  %4828 = vmatpush3.bf16.msra.mxu0 %v5111_v63  ;;  %v5118_v51 = vld [vmem:[#allocation10 + $0x10c] ss:$12 sps:$4 sm:$0xff]   ;;  %v6248_v62 = vld [vmem:[#allocation7 + $0x2] ss:$0 sm:$0xff] }
 0xc94   :  { %2415 = vmatprep.subr.bf16.mxu1 %v5114_v45  ;;  %4829 = vmatprep.subr.bf16.mxu0 %v5115_v53 }
 0xc97   :  { %2416 = vmatpush1.bf16.msra.mxu1 %v5112_v52  ;;  %4830 = vmatpush3.bf16.msra.mxu0 %v5115_v53 }
 0xc98   :  { %2417 = vmatprep.subr.bf16.mxu1 %v5118_v51  ;;  %v6256_v51 = vld [vmem:[#allocation7 + $0x3] ss:$0 sm:$0xff] }
 0xd47   :  { %v4564_v42 = vpop.f32.mrf.mxu1 }
 0xd48   :  { %v4592_v2 = vpop.f32.mrf.mxu0 }
 0xd49   :  { %v4565_v3 = vpop.f32.mrf.mxu1 }
 0xd4a   :  { %v4566_v43 = vadd.f32 %v4565_v3, %v4564_v42  ;;  %v4593_v6 = vpop.f32.mrf.mxu0  ;;  %v5116_v42 = vld [vmem:[#allocation10 + $0x108] ss:$12 sps:$4 sm:$0xff]  }
 0xd4b   :  { %v4594_v36 = vadd.f32 %v4593_v6, %v4592_v2  ;;  %v4567_v7 = vpop.f32.mrf.mxu1  ;;  %v5119_v2 = vld [vmem:[#allocation10 + $0x128] ss:$12 sps:$4 sm:$0xff]   ;;  %2418 = vmatpush1.bf16.msra.mxu1 %v5116_v42  ;;  %v5123_v6 = vld [vmem:[#allocation10 + $0x110] ss:$12 sps:$4 sm:$0xff]  }
 0xd4c   :  { %v4595_v27 = vpop.f32.mrf.mxu0  ;;  %4831 = vmatprep.subr.bf16.mxu0 %v5119_v2  ;;  %v5122_v3 = vld [vmem:[#allocation10 + $0xf4] ss:$12 sps:$4 sm:$0xff]  }
 0xd4d   :  { %v2145_v1 = vadd.f32 %v4594_v36, %v4566_v43  ;;  %v4568_v0 = vpop.f32.mrf.mxu1  ;;  %4832 = vmatpush3.bf16.msra.mxu0 %v5119_v2  ;;  %v5120_v43 = vld [vmem:[#allocation10 + $0xf0] ss:$12 sps:$4 sm:$0xff]   ;;  %2419 = vmatprep.subr.bf16.mxu1 %v5122_v3 }
 0xd4e   :  { %v4569_v16 = vadd.f32 %v4568_v0, %v4567_v7  ;;  %v4596_v15 = vpop.f32.mrf.mxu0  ;;  %4833 = vmatprep.subr.bf16.mxu0 %v5123_v6  ;;  %v5126_v36 = vld [vmem:[#allocation10 + $0xdc] ss:$12 sps:$4 sm:$0xff]   ;;  %v5124_v7 = vld [vmem:[#allocation10 + $0xd8] ss:$12 sps:$4 sm:$0xff]  }
 0xd4f   :  { %v2158_v18 = vadd.f32 %v2145_v1, %v6057_v9  ;;  %v4597_v24 = vadd.f32 %v4596_v15, %v4595_v27  ;;  %2420 = vmatpush1.bf16.msra.mxu1 %v5120_v43  ;;  %v5127_v27 = vld [vmem:[#allocation10 + $0xf8] ss:$12 sps:$4 sm:$0xff]   ;;  %v5128_v1 = vld [vmem:[#allocation10 + $0xc0] ss:$12 sps:$4 sm:$0xff]   ;;  %v5132_v15 = vld [vmem:[#allocation10 + $0xc8] ss:$12 sps:$4 sm:$0xff]  }
 0xd50   :  { %2421 = vmatprep.subr.bf16.mxu1 %v5126_v36  ;;  %v5130_v0 = vld [vmem:[#allocation10 + $0xc4] ss:$12 sps:$4 sm:$0xff]  }
 0xd51   :  { %v2148_v25 = vadd.f32 %v4597_v24, %v4569_v16  ;;  %v4570_v26 = vpop.f32.mrf.mxu1  ;;  %v6204_v28 = vadd.f32 %v4370_v21, %v2158_v18  ;;  %4834 = vmatpush3.bf16.msra.mxu0 %v5123_v6  ;;  %v5131_v16 = vld [vmem:[#allocation10 + $0xe0] ss:$12 sps:$4 sm:$0xff]  }
 0xd52   :  { %v4598_v41 = vpop.f32.mrf.mxu0  ;;  %4835 = vmatprep.subr.bf16.mxu0 %v5127_v27 }
 0xd53   :  { %v2159_v38 = vadd.f32 %v2148_v25, %v6062_v11  ;;  %v4571_v32 = vpop.f32.mrf.mxu1  ;;  %2175 = vadd.xlane.f32.xlu0 %v6204_v28  ;;  %2422 = vmatpush1.bf16.msra.mxu1 %v5124_v7 }
 0xd54   :  { %v4572_v33 = vadd.f32 %v4571_v32, %v4570_v26  ;;  %v4599_v35 = vpop.f32.mrf.mxu0  ;;  %2423 = vmatprep.subr.bf16.mxu1 %v5130_v0 }
 0xd55   :  { %v4600_v31 = vadd.f32 %v4599_v35, %v4598_v41  ;;  %v4573_v20 = vpop.f32.mrf.mxu1  ;;  %v6208_v37 = vadd.f32 %v4370_v21, %v2159_v38  ;;  %4836 = vmatpush3.bf16.msra.mxu0 %v5127_v27 }
 0xd56   :  { %v4601_v39 = vpop.f32.mrf.mxu0  ;;  %4837 = vmatprep.subr.bf16.mxu0 %v5131_v16  ;;  %v4372_v20 = vld [vmem:[%s6563_s3 + $0x1] ss:$0 sm:$0xff] }
 0xd57   :  { %v2153_v54 = vadd.f32 %v4600_v31, %v4572_v33  ;;  %v4574_v9 = vpop.f32.mrf.mxu1  ;;  %2177 = vadd.xlane.f32.xlu1 %v6208_v37  ;;  %2424 = vmatpush1.bf16.msra.mxu1 %v5128_v1 }
 0xd58   :  { %v4602_v46 = vpop.f32.mrf.mxu0 }
 0xd59   :  { %v2160_v30 = vadd.f32 %v2153_v54, %v6059_v56  ;;  %4838 = vmatpush3.bf16.msra.mxu0 %v5131_v16  ;;  %v4373_v46 = vld [vmem:[#allocation8 + $0x1] ss:$0 sm:$0xff] }
 0xd5a   :  { %4839 = vmatprep.subr.bf16.mxu0 %v5132_v15 }
 0xd5b   :  { %v6212_v47 = vadd.f32 %v4370_v21, %v2160_v30 }
 0xd5d   :  { %v2179_v11 = vsel %vm226_vm0, %v6212_v47, 0.0  ;;  %4840 = vmatpush3.bf16.msra.mxu0 %v5132_v15  ;;  %v5405_v15 = vld [vmem:[#allocation7 + $0x1] ss:$0 sm:$0xff] }
 0xd5e   :  { %2180 = vadd.xlane.f32.xlu0 %v2179_v11 }
 0xddc   :  { %v2176_v49 = vpop.xlane.xlu0 %2175 }
 0xddd   :  { %v2182_v50 = vmul.f32 0.0078125, %v2176_v49 }
 0xddf   :  { %v6217_v23 = vsub.f32 %v6204_v28, %v2182_v50 }
 0xde0   :  { %v2178_v57 = vpop.xlane.xlu1 %2177 }
 0xde1   :  { %v2183_v14 = vmul.f32 0.0078125, %v2178_v57  ;;  %v2188_v56 = vmul.f32 %v6217_v23, %v6217_v23 }
 0xde3   :  { %v6222_v58 = vsub.f32 %v6208_v37, %v2183_v14  ;;  %2191 = vadd.xlane.f32.xlu1 %v2188_v56  ;;  %v4374_v56 = vld [vmem:[%s6566_s6 + $0x3] sm:$0x7] }
 0xde4   :  { %v2273_v3 = vrot.slane %v4374_v56, %v5882_v17 }
 0xde5   :  { %v2189_v29 = vmul.f32 %v6222_v58, %v6222_v58 }
 0xde7   :  { %v2181_v22 = vpop.xlane.xlu0 %2180  ;;  %2193 = vadd.xlane.f32.xlu0 %v2189_v29 }
 0xde8   :  { %v2184_v40 = vmul.f32 0.0078125, %v2181_v22 }
 0xdea   :  { %v6227_v10 = vsub.f32 %v6212_v47, %v2184_v40 }
 0xdec   :  { %v2190_v19 = vmul.f32 %v6227_v10, %v6227_v10 }
 0xdee   :  { %v2195_v55 = vsel %vm226_vm0, %v2190_v19, 0.0 }
 0xdef   :  { %2196 = vadd.xlane.f32.xlu1 %v2195_v55  ;;  %v2277_v55 = vrot.slane %v4374_v56, %v5875_v13 }
 0xe6c   :  { %v2192_v21 = vpop.xlane.xlu1 %2191 }
 0xe6d   :  { %v2198_v18 = vmul.f32 0.0078125, %v2192_v21 }
 0xe6f   :  { %v2201_v24 = vadd.f32 1e-05, %v2198_v18 }
 0xe70   :  { %v2194_v25 = vpop.xlane.xlu0 %2193 }
 0xe71   :  { %5313 = vrsqrt.f32 %v2201_v24  ;;  %v2199_v26 = vmul.f32 0.0078125, %v2194_v25 }
 0xe73   :  { %v2202_v41 = vadd.f32 1e-05, %v2199_v26 }
 0xe75   :  { %5315 = vrsqrt.f32 %v2202_v41 }
 0xe78   :  { %v2197_v38 = vpop.xlane.xlu1 %2196 }
 0xe79   :  { %v2200_v32 = vmul.f32 0.0078125, %v2197_v38 }
 0xe7b   :  { %v2203_v33 = vadd.f32 1e-05, %v2200_v32 }
 0xe7d   :  { %5317 = vrsqrt.f32 %v2203_v33 }
 0xe7e   :  { %v5314_v35 = vpop.eup %5313 }
 0xe7f   :  { %v2207_v31 = vmul.f32 %v5314_v35, %v6217_v23 }
 0xe81   :  { %v2216_v9 = vmul.f32 %v4372_v20, %v2207_v31 }
 0xe82   :  { %v5316_v39 = vpop.eup %5315 }
 0xe83   :  { %v2208_v54 = vmul.f32 %v5316_v39, %v6222_v58  ;;  %v2225_v11 = vadd.f32 %v4373_v46, %v2216_v9  ;;  %v2269_v58 = vrot.slane %v4374_v56, %v5868_v5 }
 0xe85   :  { %v2217_v30 = vmul.f32 %v4372_v20, %v2208_v54 }
 0xe87   :  { %v2226_v48 = vadd.f32 %v4373_v46, %v2217_v30 }
 0xe89   :  { %v2261_v59 = vpack.c.bf16 %v2226_v48, %v2225_v11 }
 0xe8a   :  { %v5318_v49 = vpop.eup %5317 }
 0xe8b   :  { %v2209_v50 = vmul.f32 %v5318_v49, %v6227_v10  ;;  %2442 = vmatmul.mubr.bf16.vlgmr.msra.gmra.mxu1 %v2261_v59  ;;  %4841 = vmatprep.mubr.bf16.mxu0 %v2261_v59 }
 0xe8c   :  { %2451 = vmatprep.mubr.bf16.mxu1 %v5683_v34 }
 0xe8d   :  { %v2218_v23 = vmul.f32 %v4372_v20, %v2209_v50 }
 0xe8f   :  { %v2227_v57 = vadd.f32 %v4373_v46, %v2218_v23 }
 0xe91   :  { %v2262_v14 = vpack.c.bf16 %v2227_v57, %v2227_v57 }
 0xe93   :  { %4842 = vmatmul.mubr.bf16.vlgmr.msra.gmra.mxu0 %v2262_v14  ;;  %2452 = vmatmul.mubr.bf16.gmra.mxu1 %v2262_v14 }
 0xf4b   :  { %v2443_v29 = vpop.f32.mrf.mxu1 }
 0xf4c   :  { %v2444_v40 = vadd.f32 %v2443_v29, %v2269_v58 }
 0xf4d   :  { %v2445_v22 = vpop.f32.mrf.mxu1 }
 0xf4e   :  { %v2510_v61 = vmul.f32 %v6244_v60, %v2444_v40  ;;  %v6254_v53 = vmul.f32 %v6248_v62, %v2444_v40  ;;  %v6259_v42 = vmul.f32 %v6256_v51, %v2444_v40  ;;  %v2446_v25 = vadd.f32 %v2445_v22, %v2273_v3 }
 0xf4f   :  { %v2447_v19 = vpop.f32.mrf.mxu1  ;;  %v2603_v14 = vmul.f32 %v5405_v15, %v2444_v40 }
 0xf50   :  { %v2448_v10 = vadd.f32 %v2447_v19, %v2269_v58 }
 0xf51   :  { %v2449_v44 = vpop.f32.mrf.mxu1 }
 0xf52   :  { %v2511_v12 = vmul.f32 %v6244_v60, %v2448_v10  ;;  %v6251_v63 = vmul.f32 %v6248_v62, %v2448_v10  ;;  %v6262_v2 = vmul.f32 %v6256_v51, %v2448_v10  ;;  %v2450_v0 = vadd.f32 %v2449_v44, %v2273_v3 }
 0xf53   :  { %v4843_v45 = vpop.f32.mrf.mxu0  ;;  %v2453_v52 = vpop.f32.mrf.mxu1  ;;  %v2604_v57 = vmul.f32 %v5405_v15, %v2448_v10 }
 0xf54   :  { %v6265_v43 = vadd.f32 %v4843_v45, %v2277_v55  ;;  %v2513_v6 = vpack.c.bf16 %v2511_v12, %v2510_v61  ;;  %v2813_v27 = vpack.c.bf16 %v6251_v63, %v6254_v53  ;;  %v2966_v1 = vpack.c.bf16 %v6262_v2, %v6259_v42 }
 0xf55   :  { %v2494_v36 = vpop.f32.mrf.mxu0  ;;  %v2455_v7 = vpop.f32.mrf.mxu1  ;;  %v6274_v35 = vpack.c.bf16 %v2450_v0, %v2446_v25  ;;  %v6289_v50 = vadd.f32 %v2453_v52, %v2269_v58  ;;  %v2606_v29 = vpack.c.bf16 %v2604_v57, %v2603_v14  ;;  %v6312_v0 = vld [vmem:[#allocation5] sm:$0xff] }
 0xf56   :  { %v2456_v16 = vadd.f32 %v2455_v7, %v2273_v3  ;;  %4849 = vmatprep.mubr.bf16.mxu1 %v2513_v6  ;;  %v2693_v21 = vmul.f32 %v5405_v15, %v6265_v43  ;;  %v2495_v26 = vadd.f32 %v2494_v36, %v2277_v55  ;;  %v2600_v58 = vmul.f32 %v6244_v60, %v6265_v43 }
 0xf57   :  { %v4844_v18 = vpop.f32.mrf.mxu0  ;;  %v2457_v24 = vpop.f32.mrf.mxu1  ;;  %v2512_v23 = vmul.f32 %v6244_v60, %v6289_v50  ;;  %v2605_v19 = vmul.f32 %v5405_v15, %v6289_v50  ;;  %v2900_v12 = vmul.f32 %v6248_v62, %v6265_v43 }
 0xf58   :  { %v6272_v41 = vpack.c.bf16 %v2456_v16, %v2456_v16  ;;  %v2695_v38 = vpack.c.bf16 %v2693_v21, %v2693_v21  ;;  %v2691_v39 = vmul.f32 %v5405_v15, %v2495_v26  ;;  %v3051_v9 = vmul.f32 %v6256_v51, %v2495_v26  ;;  %v6315_v21 = vld [vmem:[#allocation5 + $0x10] sm:$0x3] }
 0xf59   :  { %v2497_v32 = vpop.f32.mrf.mxu0  ;;  %v2458_v33 = vpop.f32.mrf.mxu1  ;;  %v2898_v30 = vmul.f32 %v6248_v62, %v2495_v26  ;;  %v2514_v56 = vpack.c.bf16 %v2512_v23, %v2512_v23  ;;  %v2602_v22 = vpack.c.bf16 %v2600_v58, %v2600_v58  ;;  %v2607_v10 = vpack.c.bf16 %v2605_v19, %v2605_v19 }
 0xf5a   :  { %v2498_v31 = vadd.f32 %v2497_v32, %v2277_v55  ;;  %4953 = vmatprep.subr.msk.bf16.mxu0 %vm763_vm1, %v2695_v38  ;;  %v2703_v20 = vsel %vm763_vm1, %v2695_v38, 0  ;;  %4845 = vmatprep.subr.bf16.mxu1 %v6272_v41  ;;  %v2598_v55 = vmul.f32 %v6244_v60, %v2495_v26  ;;  %v6308_v45 = vpack.c.bf16 %v2900_v12, %v2900_v12  ;;  %v6319_v26 = vld [vmem:[#allocation5 + $0x8] sm:$0xff] }
 0xf5b   :  { %4862 = vmatpush3.bf16.msra.mxu0 %v2703_v20  ;;  %4846 = vmatpush3.bf16.xpose.msra.mxu1 %v6272_v41  ;;  %v2760_v44 = vsel %vm763_vm1, %v2602_v22, 0 }
 0xf5c   :  { %4847 = vmatprep.subr.bf16.mxu1 %v6274_v35  ;;  %v2692_v54 = vmul.f32 %v5405_v15, %v2498_v31  ;;  %v3052_v46 = vmul.f32 %v6256_v51, %v2498_v31  ;;  %v2899_v11 = vmul.f32 %v6248_v62, %v2498_v31  ;;  %v2599_v40 = vmul.f32 %v6244_v60, %v2498_v31 }
 0xf5e   :  { %v2694_v48 = vpack.c.bf16 %v2692_v54, %v2691_v39  ;;  %v6285_v59 = vpack.c.bf16 %v3052_v46, %v3051_v9  ;;  %v6287_v49 = vpack.c.bf16 %v2899_v11, %v2898_v30  ;;  %v2601_v61 = vpack.c.bf16 %v2599_v40, %v2598_v55 }
 0xf60   :  { %4863 = vmatprep.subr.bf16.mxu0 %v2694_v48 }
 0xf61   :  { %4864 = vmatpush3.bf16.msra.mxu0 %v2694_v48 }
 0xf62   :  { %4877 = vmatprep.subr.bf16.mxu0 %v6272_v41 }
 0xf63   :  { %4848 = vmatpush3.bf16.xpose.msra.mxu1 %v6274_v35 }
 0xf64   :  { %4853 = vmatprep.subr.bf16.mxu1 %v6272_v41 }
 0xf6a   :  { %4850 = vmatmul.mubr.bf16.vlgmr.msra.gmra.mxu1 %v2514_v56 }
 0xf6b   :  { %4854 = vmatpush3.bf16.xpose.msra.mxu1 %v6272_v41  ;;  %4857 = vmatprep.mubr.bf16.mxu1 %v2606_v29 }
 0xf6c   :  { %4855 = vmatprep.subr.bf16.mxu1 %v6274_v35 }
 0xf73   :  { %4856 = vmatpush3.bf16.xpose.msra.mxu1 %v6274_v35 }
 0xf74   :  { %4954 = vmatprep.subr.msk.bf16.mxu1 %vm763_vm1, %v2602_v22 }
 0xf7a   :  { %4858 = vmatmul.mubr.bf16.vlgmr.msra.gmra.mxu1 %v2607_v10 }
 0xf7b   :  { %4870 = vmatpush3.bf16.msra.mxu1 %v2760_v44 }
 0xf7c   :  { %4871 = vmatprep.subr.bf16.mxu1 %v2601_v61 }
 0xf7f   :  { %4872 = vmatpush3.bf16.msra.mxu1 %v2601_v61 }
 0xf80   :  { %4955 = vmatprep.subr.msk.bf16.mxu1 %vm763_vm1, %v6308_v45 }
0x102a   :  { %v4851_v52 = vpop.f32.mrf.mxu1 }
0x102b   :  { %v2558_v40 = vadd.f32 %v6315_v21, %v4851_v52 }
0x102c   :  { %v2549_v3 = vpop.f32.mrf.mxu1 }
0x102d   :  { %v2550_v29 = vadd.f32 %v6312_v0, %v2549_v3  ;;  %v2569_v44 = vsel %vm623_vm3, %v2558_v40, -inf }
0x102e   :  { %v4852_v6 = vpop.f32.mrf.mxu1 }
0x102f   :  { %v2563_v10 = vsel %vm616_vm2, %v2550_v29, -inf }
0x1030   :  { %v2552_v36 = vpop.f32.mrf.mxu1 }
0x1031   :  { %v2553_v22 = vadd.f32 %v6319_v26, %v2552_v36 }
0x1033   :  { %v2566_v55 = vsel %vm616_vm2, %v2553_v22, -inf }
0x103a   :  { %v4859_v60 = vpop.f32.mrf.mxu1 }
0x103b   :  { %v2651_v18 = vadd.f32 %v6315_v21, %v4859_v60 }
0x103c   :  { %v2642_v7 = vpop.f32.mrf.mxu1 }
0x103d   :  { %v2643_v16 = vadd.f32 %v6312_v0, %v2642_v7  ;;  %v2662_v33 = vsel %vm623_vm3, %v2651_v18, -inf }
0x103e   :  { %v4860_v15 = vpop.f32.mrf.mxu1 }
0x103f   :  { %v2656_v24 = vsel %vm616_vm2, %v2643_v16, -inf }
0x1040   :  { %v2645_v25 = vpop.f32.mrf.mxu1  ;;  %2657 = vmax.xlane.f32.xlu0 %v2656_v24  ;;  %v3053_v24 = vmul.f32 %v6256_v51, %v6265_v43 }
0x1041   :  { %v2646_v38 = vadd.f32 %v6319_v26, %v2645_v25 }
0x1042   :  { %v3055_v25 = vpack.c.bf16 %v3053_v24, %v3053_v24 }
0x1043   :  { %v2659_v32 = vsel %vm616_vm2, %v2646_v38, -inf }
0x1044   :  { %2660 = vmax.xlane.f32.xlu1 %v2659_v32  ;;  %2663 = vmax.xlane.f32.xlu0 %v2662_v33  ;;  %v3063_v33 = vsel %vm763_vm1, %v3055_v25, 0 }
0x10c9   :  { %v2658_v31 = vpop.xlane.xlu0 %2657 }
0x10ca   :  { %v2665_v20 = vsub.f32 %v2643_v16, %v2658_v31 }
0x10cc   :  { %v2668_v39 = vmul.f32 1.442695, %v2665_v20 }
0x10cd   :  { %v2661_v54 = vpop.xlane.xlu1 %2660  ;;  %v2664_v9 = vpop.xlane.xlu0 %2663 }
0x10ce   :  { %5319 = vpow2.f32 %v2668_v39  ;;  %v2666_v46 = vsub.f32 %v2646_v38, %v2661_v54  ;;  %v2667_v30 = vsub.f32 %v2651_v18, %v2664_v9  ;;  %v2812_v38 = vmul.f32 %v6248_v62, %v6289_v50 }
0x10d0   :  { %v2670_v11 = vmul.f32 1.442695, %v2666_v46  ;;  %v2672_v48 = vmul.f32 1.442695, %v2667_v30  ;;  %v2814_v32 = vpack.c.bf16 %v2812_v38, %v2812_v38 }
0x10d2   :  { %5321 = vpow2.f32 %v2670_v11 }
0x10d3   :  { %5323 = vpow2.f32 %v2672_v48 }
0x10db   :  { %v5320_v23 = vpop.eup %5319 }
0x10dc   :  { %v2674_v57 = vsel %vm616_vm2, %v5320_v23, 0.0 }
0x10dd   :  { %2675 = vadd.xlane.f32.xlu1 %v2674_v57 }
0x10df   :  { %v5322_v14 = vpop.eup %5321 }
0x10e0   :  { %v5324_v56 = vpop.eup %5323  ;;  %v2677_v58 = vsel %vm616_vm2, %v5322_v14, 0.0 }
0x10e1   :  { %2678 = vadd.xlane.f32.xlu0 %v2677_v58  ;;  %v2680_v19 = vsel %vm623_vm3, %v5324_v56, 0.0 }
0x10e2   :  { %2681 = vadd.xlane.f32.xlu1 %v2680_v19 }
0x10e5   :  { %2564 = vmax.xlane.f32.xlu0 %v2563_v10 }
0x10e6   :  { %2567 = vmax.xlane.f32.xlu1 %v2566_v55 }
0x10e9   :  { %2570 = vmax.xlane.f32.xlu0 %v2569_v44 }
0x1166   :  { %v2676_v61 = vpop.xlane.xlu1 %2675 }
0x1167   :  { %5325 = vrcp.f32 %v2676_v61 }
0x116a   :  { %v2679_v12 = vpop.xlane.xlu0 %2678 }
0x116b   :  { %v2682_v3 = vpop.xlane.xlu1 %2681  ;;  %5327 = vrcp.f32 %v2679_v12 }
0x116c   :  { %5329 = vrcp.f32 %v2682_v3 }
0x116e   :  { %v2565_v63 = vpop.xlane.xlu0 %2564 }
0x116f   :  { %v2568_v43 = vpop.xlane.xlu1 %2567  ;;  %v2572_v31 = vsub.f32 %v2550_v29, %v2565_v63 }
0x1170   :  { %v2573_v39 = vsub.f32 %v2553_v22, %v2568_v43 }
0x1171   :  { %v2575_v62 = vmul.f32 1.442695, %v2572_v31 }
0x1172   :  { %v2571_v54 = vpop.xlane.xlu0 %2570  ;;  %v2577_v9 = vmul.f32 1.442695, %v2573_v39 }
0x1173   :  { %v2574_v46 = vsub.f32 %v2558_v40, %v2571_v54  ;;  %5331 = vpow2.f32 %v2575_v62 }
0x1174   :  { %v5326_v6 = vpop.eup %5325  ;;  %5333 = vpow2.f32 %v2577_v9 }
0x1175   :  { %v2686_v7 = vmul.f32 %v5326_v6, %v5320_v23  ;;  %v2579_v30 = vmul.f32 1.442695, %v2574_v46 }
0x1177   :  { %5335 = vpow2.f32 %v2579_v30 }
0x1178   :  { %v5328_v36 = vpop.eup %5327 }
0x1179   :  { %v5330_v60 = vpop.eup %5329  ;;  %v2687_v52 = vmul.f32 %v5328_v36, %v5322_v14 }
0x117a   :  { %v2688_v16 = vmul.f32 %v5330_v60, %v5324_v56 }
0x117b   :  { %v2689_v15 = vpack.c.bf16 %v2687_v52, %v2686_v7 }
0x117c   :  { %v2690_v18 = vpack.c.bf16 %v2688_v16, %v2688_v16 }
0x117d   :  { %4865 = vmatprep.mubr.msk.bf16.mxu0 %vm616_vm2, %v2689_v15 }
0x117e   :  { %4866 = vmatmul.mubr.msk.bf16.vlgmr.msra.gmra.mxu0 %vm616_vm2, %v2690_v18 }
0x117f   :  { %4878 = vmatpush3.bf16.xpose.msra.mxu0 %v6272_v41  ;;  %4881 = vmatprep.mubr.bf16.mxu0 %v2813_v27 }
0x1180   :  { %4879 = vmatprep.subr.bf16.mxu0 %v6274_v35  ;;  %v5332_v22 = vpop.eup %5331 }
0x1181   :  { %v5334_v10 = vpop.eup %5333  ;;  %v2581_v44 = vsel %vm616_vm2, %v5332_v22, 0.0 }
0x1182   :  { %v2584_v55 = vsel %vm616_vm2, %v5334_v10, 0.0 }
0x1184   :  { %v5336_v61 = vpop.eup %5335 }
0x1185   :  { %v2587_v12 = vsel %vm623_vm3, %v5336_v61, 0.0 }
0x1187   :  { %4880 = vmatpush3.bf16.xpose.msra.mxu0 %v6274_v35 }
0x1188   :  { %4956 = vmatprep.subr.msk.bf16.mxu0 %vm763_vm1, %v3055_v25 }
0x118e   :  { %4882 = vmatmul.mubr.bf16.vlgmr.msra.gmra.mxu0 %v2814_v32 }
0x118f   :  { %4902 = vmatpush3.bf16.msra.mxu0 %v3063_v33 }
0x1190   :  { %4903 = vmatprep.subr.bf16.mxu0 %v6285_v59 }
0x1193   :  { %4904 = vmatpush3.bf16.msra.mxu0 %v6285_v59 }
0x123e   :  { %v6349_v53 = vpop.f32.mrf.mxu0 }
0x1240   :  { %v6351_v27 = vpop.f32.mrf.mxu0 }
0x1242   :  { %v4868_v20 = vpop.f32.mrf.mxu0 }
0x1244   :  { %v6353_v11 = vpop.f32.mrf.mxu0 }
0x124e   :  { %v4883_v48 = vpop.f32.mrf.mxu0 }
0x124f   :  { %v2858_v14 = vadd.f32 %v6315_v21, %v4883_v48 }
0x1250   :  { %v2849_v59 = vpop.f32.mrf.mxu0 }
0x1251   :  { %v2850_v23 = vadd.f32 %v6312_v0, %v2849_v59  ;;  %v2869_v19 = vsel %vm623_vm3, %v2858_v14, -inf }
0x1252   :  { %v4884_v57 = vpop.f32.mrf.mxu0 }
0x1253   :  { %v2863_v56 = vsel %vm616_vm2, %v2850_v23, -inf }
0x1254   :  { %v2852_v29 = vpop.f32.mrf.mxu0  ;;  %2864 = vmax.xlane.f32.xlu1 %v2863_v56 }
0x1255   :  { %v2853_v58 = vadd.f32 %v6319_v26, %v2852_v29 }
0x1257   :  { %v2866_v40 = vsel %vm616_vm2, %v2853_v58, -inf }
0x1258   :  { %2870 = vmax.xlane.f32.xlu1 %v2869_v19  ;;  %2867 = vmax.xlane.f32.xlu0 %v2866_v40 }
0x125c   :  { %2585 = vadd.xlane.f32.xlu1 %v2584_v55  ;;  %2582 = vadd.xlane.f32.xlu0 %v2581_v44 }
0x1260   :  { %2588 = vadd.xlane.f32.xlu0 %v2587_v12 }
0x12dd   :  { %v2865_v3 = vpop.xlane.xlu1 %2864 }
0x12de   :  { %v2872_v6 = vsub.f32 %v2850_v23, %v2865_v3  ;;  %v2910_v23 = vsel %vm763_vm1, %v6308_v45, 0 }
0x12e0   :  { %v2875_v36 = vmul.f32 1.442695, %v2872_v6 }
0x12e1   :  { %v2871_v60 = vpop.xlane.xlu1 %2870  ;;  %v2868_v7 = vpop.xlane.xlu0 %2867 }
0x12e2   :  { %5337 = vpow2.f32 %v2875_v36  ;;  %v2874_v52 = vsub.f32 %v2858_v14, %v2871_v60  ;;  %v2873_v16 = vsub.f32 %v2853_v58, %v2868_v7 }
0x12e4   :  { %v2879_v15 = vmul.f32 1.442695, %v2874_v52  ;;  %v2877_v18 = vmul.f32 1.442695, %v2873_v16 }
0x12e5   :  { %v2586_v24 = vpop.xlane.xlu1 %2585  ;;  %v2583_v25 = vpop.xlane.xlu0 %2582 }
0x12e6   :  { %5339 = vpow2.f32 %v2879_v15 }
0x12e7   :  { %5341 = vpow2.f32 %v2877_v18 }
0x12e8   :  { %5343 = vrcp.f32 %v2586_v24 }
0x12e9   :  { %5345 = vrcp.f32 %v2583_v25  ;;  %v2589_v38 = vpop.xlane.xlu0 %2588 }
0x12ea   :  { %5347 = vrcp.f32 %v2589_v38 }
0x12ef   :  { %v5338_v32 = vpop.eup %5337 }
0x12f0   :  { %v2881_v33 = vsel %vm616_vm2, %v5338_v32, 0.0 }
0x12f1   :  { %2882 = vadd.xlane.f32.xlu1 %v2881_v33 }
0x12f3   :  { %v5340_v63 = vpop.eup %5339 }
0x12f4   :  { %v5342_v43 = vpop.eup %5341  ;;  %v2887_v31 = vsel %vm623_vm3, %v5340_v63, 0.0 }
0x12f5   :  { %v5344_v20 = vpop.eup %5343  ;;  %2888 = vadd.xlane.f32.xlu1 %v2887_v31  ;;  %v2884_v39 = vsel %vm616_vm2, %v5342_v43, 0.0 }
0x12f6   :  { %v5346_v54 = vpop.eup %5345  ;;  %2885 = vadd.xlane.f32.xlu0 %v2884_v39  ;;  %v2594_v62 = vmul.f32 %v5344_v20, %v5334_v10 }
0x12f7   :  { %v5348_v9 = vpop.eup %5347  ;;  %v2593_v46 = vmul.f32 %v5346_v54, %v5332_v22 }
0x12f8   :  { %v2595_v30 = vmul.f32 %v5348_v9, %v5336_v61 }
0x12f9   :  { %v2596_v48 = vpack.c.bf16 %v2594_v62, %v2593_v46 }
0x12fa   :  { %v2597_v59 = vpack.c.bf16 %v2595_v30, %v2595_v30  ;;  %v5133_v30 = vld [vmem:[#allocation11 + $0x78] sm:$0xff]  }
0x12fb   :  { %4873 = vmatprep.mubr.msk.bf16.mxu1 %vm616_vm2, %v2596_v48  ;;  %4909 = vmatprep.subr.bf16.mxu0 %v5133_v30 }
0x12fc   :  { %4874 = vmatmul.mubr.msk.bf16.vlgmr.msra.gmra.mxu1 %vm616_vm2, %v2597_v59 }
0x12fd   :  { %4886 = vmatpush3.bf16.msra.mxu1 %v2910_v23 }
0x12fe   :  { %4887 = vmatprep.subr.bf16.mxu1 %v6287_v49 }
0x1301   :  { %4888 = vmatpush3.bf16.msra.mxu1 %v6287_v49  ;;  %v2965_v49 = vmul.f32 %v6256_v51, %v6289_v50 }
0x1302   :  { %4893 = vmatprep.subr.bf16.mxu1 %v6272_v41 }
0x1303   :  { %v2967_v44 = vpack.c.bf16 %v2965_v49, %v2965_v49  ;;  %v5137_v49 = vld [vmem:[#allocation11 + $0x58] sm:$0xff]  }
0x137a   :  { %v2883_v57 = vpop.xlane.xlu1 %2882 }
0x137b   :  { %5349 = vrcp.f32 %v2883_v57 }
0x137e   :  { %v2889_v14 = vpop.xlane.xlu1 %2888 }
0x137f   :  { %5351 = vrcp.f32 %v2889_v14  ;;  %v2886_v56 = vpop.xlane.xlu0 %2885 }
0x1380   :  { %5353 = vrcp.f32 %v2886_v56 }
0x1388   :  { %v5350_v29 = vpop.eup %5349 }
0x1389   :  { %v2893_v40 = vmul.f32 %v5350_v29, %v5338_v32 }
0x138c   :  { %v5352_v58 = vpop.eup %5351 }
0x138d   :  { %v5354_v22 = vpop.eup %5353  ;;  %v2895_v19 = vmul.f32 %v5352_v58, %v5340_v63 }
0x138e   :  { %v2894_v10 = vmul.f32 %v5354_v22, %v5342_v43 }
0x138f   :  { %v2897_v45 = vpack.c.bf16 %v2895_v19, %v2895_v19 }
0x1390   :  { %v2896_v55 = vpack.c.bf16 %v2894_v10, %v2893_v40  ;;  %v5134_v10 = vld [vmem:[#allocation11 + $0x70] sm:$0xff]  }
0x1392   :  { %4889 = vmatprep.mubr.msk.bf16.mxu1 %vm616_vm2, %v2896_v55  ;;  %v5136_v55 = vld [vmem:[#allocation11 + $0x60] sm:$0xff]  }
0x1393   :  { %4890 = vmatmul.mubr.msk.bf16.vlgmr.msra.gmra.mxu1 %vm616_vm2, %v2897_v45  ;;  %v5135_v45 = vld [vmem:[#allocation11 + $0x68] sm:$0xff]  }
0x1394   :  { %4894 = vmatpush3.bf16.xpose.msra.mxu1 %v6272_v41  ;;  %4897 = vmatprep.mubr.bf16.mxu1 %v2966_v1 }
0x1395   :  { %4895 = vmatprep.subr.bf16.mxu1 %v6274_v35 }
0x139c   :  { %4896 = vmatpush3.bf16.xpose.msra.mxu1 %v6274_v35 }
0x13a3   :  { %4898 = vmatmul.mubr.bf16.vlgmr.msra.gmra.mxu1 %v2967_v44  ;;  %v5138_v44 = vld [vmem:[#allocation11 + $0x50] sm:$0xff]  }
0x13a4   :  { %3552 = vmatprep.mubr.bf16.mxu1 %v5683_v34 }
0x13bc   :  { %v4875_v61 = vpop.f32.mrf.mxu1 }
0x13bd   :  { %v2805_v41 = vadd.f32 %v4875_v61, %v6349_v53  ;;  %v5139_v61 = vld [vmem:[#allocation11 + $0x48] sm:$0xff]  }
0x13be   :  { %v2796_v12 = vpop.f32.mrf.mxu1 }
0x13bf   :  { %v2797_v2 = vadd.f32 %v2796_v12, %v6351_v27  ;;  %v5140_v12 = vld [vmem:[#allocation11 + $0x40] sm:$0xff]  }
0x13c0   :  { %v4876_v3 = vpop.f32.mrf.mxu1 }
0x13c2   :  { %v6385_v6 = vpop.f32.mrf.mxu1 }
0x1453   :  { %v4891_v42 = vpop.f32.mrf.mxu1 }
0x1454   :  { %v6389_v1 = vadd.f32 %v4891_v42, %v2805_v41  ;;  %v2800_v42 = vadd.f32 %v6385_v6, %v6353_v11 }
0x1455   :  { %v2946_v35 = vpop.f32.mrf.mxu1 }
0x1456   :  { %v6391_v36 = vadd.f32 %v2946_v35, %v2797_v2 }
0x1457   :  { %v4892_v51 = vpop.f32.mrf.mxu1 }
0x1459   :  { %v6393_v50 = vpop.f32.mrf.mxu1 }
0x145a   :  { %v2961_v35 = vadd.f32 %v6393_v50, %v2800_v42  ;;  %v5188_v42 = vld [vmem:[#allocation16 + $0x10c] ss:$16 sps:$4 sm:$0xff]  }
0x1463   :  { %v4899_v60 = vpop.f32.mrf.mxu1 }
0x1464   :  { %v3011_v15 = vadd.f32 %v6315_v21, %v4899_v60 }
0x1465   :  { %v3002_v7 = vpop.f32.mrf.mxu1 }
0x1466   :  { %v3003_v52 = vadd.f32 %v6312_v0, %v3002_v7  ;;  %v3022_v25 = vsel %vm623_vm3, %v3011_v15, -inf }
0x1467   :  { %v4900_v16 = vpop.f32.mrf.mxu1 }
0x1468   :  { %v3016_v53 = vsel %vm616_vm2, %v3003_v52, -inf }
0x1469   :  { %v3005_v18 = vpop.f32.mrf.mxu1  ;;  %3017 = vmax.xlane.f32.xlu0 %v3016_v53 }
0x146a   :  { %v3006_v27 = vadd.f32 %v6319_v26, %v3005_v18  ;;  %v4415_v18 = vld [vmem:[#allocation13 + $0x1] ss:$0 sm:$0xff] }
0x146c   :  { %v3019_v24 = vsel %vm616_vm2, %v3006_v27, -inf }
0x146d   :  { %3020 = vmax.xlane.f32.xlu1 %v3019_v24  ;;  %3023 = vmax.xlane.f32.xlu0 %v3022_v25 }
0x14f2   :  { %v3018_v38 = vpop.xlane.xlu0 %3017 }
0x14f3   :  { %v3025_v32 = vsub.f32 %v3003_v52, %v3018_v38 }
0x14f5   :  { %v3028_v33 = vmul.f32 1.442695, %v3025_v32  ;;  %v5141_v32 = vld [vmem:[#allocation16 + $0x1e0] ss:$16 sps:$4 sm:$0xff]  }
0x14f6   :  { %v3021_v63 = vpop.xlane.xlu1 %3020  ;;  %v3024_v0 = vpop.xlane.xlu0 %3023 }
0x14f7   :  { %5355 = vpow2.f32 %v3028_v33  ;;  %v3026_v43 = vsub.f32 %v3006_v27, %v3021_v63  ;;  %v3027_v21 = vsub.f32 %v3011_v15, %v3024_v0  ;;  %v5143_v33 = vld [vmem:[#allocation16 + $0x1e4] ss:$16 sps:$4 sm:$0xff]   ;;  %v5146_v63 = vld [vmem:[#allocation16 + $0x1ec] ss:$16 sps:$4 sm:$0xff]  }
0x14f8   :  { %3520 = vmatprep.subr.bf16.mxu1 %v5143_v33 }
0x14f9   :  { %v3030_v31 = vmul.f32 1.442695, %v3026_v43  ;;  %v3032_v20 = vmul.f32 1.442695, %v3027_v21  ;;  %3521 = vmatpush1.bf16.msra.mxu1 %v5141_v32 }
0x14fb   :  { %5357 = vpow2.f32 %v3030_v31 }
0x14fc   :  { %5359 = vpow2.f32 %v3032_v20 }
0x1504   :  { %v5356_v39 = vpop.eup %5355 }
0x1505   :  { %v3034_v26 = vsel %vm616_vm2, %v5356_v39, 0.0 }
0x1506   :  { %3035 = vadd.xlane.f32.xlu1 %v3034_v26 }
0x1508   :  { %v5358_v54 = vpop.eup %5357 }
0x1509   :  { %v5360_v62 = vpop.eup %5359  ;;  %v3037_v9 = vsel %vm616_vm2, %v5358_v54, 0.0 }
0x150a   :  { %3038 = vadd.xlane.f32.xlu0 %v3037_v9  ;;  %v3040_v46 = vsel %vm623_vm3, %v5360_v62, 0.0  ;;  %v5150_v9 = vld [vmem:[#allocation16 + $0x1c8] ss:$16 sps:$4 sm:$0xff]  }
0x150b   :  { %3041 = vadd.xlane.f32.xlu1 %v3040_v46  ;;  %v5152_v46 = vld [vmem:[#allocation16 + $0x1cc] ss:$16 sps:$4 sm:$0xff]  }
0x158f   :  { %v3036_v48 = vpop.xlane.xlu1 %3035 }
0x1590   :  { %5361 = vrcp.f32 %v3036_v48  ;;  %v5155_v48 = vld [vmem:[#allocation16 + $0x1a4] ss:$16 sps:$4 sm:$0xff]  }
0x1593   :  { %v3039_v59 = vpop.xlane.xlu0 %3038 }
0x1594   :  { %v3042_v23 = vpop.xlane.xlu1 %3041  ;;  %5363 = vrcp.f32 %v3039_v59  ;;  %v5156_v59 = vld [vmem:[#allocation16 + $0x1a8] ss:$16 sps:$4 sm:$0xff]  }
0x1595   :  { %5365 = vrcp.f32 %v3042_v23  ;;  %v5158_v23 = vld [vmem:[#allocation16 + $0x1ac] ss:$16 sps:$4 sm:$0xff]  }
0x159d   :  { %v5362_v57 = vpop.eup %5361 }
0x159e   :  { %v3046_v29 = vmul.f32 %v5362_v57, %v5356_v39  ;;  %v5161_v57 = vld [vmem:[#allocation16 + $0x184] ss:$16 sps:$4 sm:$0xff]  }
0x15a1   :  { %v5364_v14 = vpop.eup %5363 }
0x15a2   :  { %v5366_v56 = vpop.eup %5365  ;;  %v3047_v58 = vmul.f32 %v5364_v14, %v5358_v54  ;;  %v5147_v54 = vld [vmem:[#allocation16 + $0x1c0] ss:$16 sps:$4 sm:$0xff]   ;;  %v5164_v14 = vld [vmem:[#allocation16 + $0x18c] ss:$16 sps:$4 sm:$0xff]  }
0x15a3   :  { %v3048_v22 = vmul.f32 %v5366_v56, %v5360_v62  ;;  %v5149_v62 = vld [vmem:[#allocation16 + $0x1c4] ss:$16 sps:$4 sm:$0xff]   ;;  %v5159_v56 = vld [vmem:[#allocation16 + $0x180] ss:$16 sps:$4 sm:$0xff]  }
0x15a4   :  { %v3049_v19 = vpack.c.bf16 %v3047_v58, %v3046_v29  ;;  %3522 = vmatprep.subr.bf16.mxu1 %v5149_v62  ;;  %v5162_v29 = vld [vmem:[#allocation16 + $0x188] ss:$16 sps:$4 sm:$0xff]   ;;  %v5167_v58 = vld [vmem:[#allocation16 + $0x164] ss:$16 sps:$4 sm:$0xff]  }
0x15a5   :  { %v3050_v40 = vpack.c.bf16 %v3048_v22, %v3048_v22  ;;  %3523 = vmatpush1.bf16.msra.mxu1 %v5147_v54  ;;  %v5170_v22 = vld [vmem:[#allocation16 + $0x16c] ss:$16 sps:$4 sm:$0xff]   ;;  %v5195_v54 = vld [vmem:[#allocation17 + $0x130] sm:$0xff]  }
0x15a6   :  { %4905 = vmatprep.mubr.msk.bf16.mxu0 %vm616_vm2, %v3049_v19  ;;  %3524 = vmatprep.subr.bf16.mxu1 %v5155_v48  ;;  %v5165_v19 = vld [vmem:[#allocation16 + $0x160] ss:$16 sps:$4 sm:$0xff]  }
0x15a7   :  { %4906 = vmatmul.mubr.msk.bf16.vlgmr.msra.gmra.mxu0 %vm616_vm2, %v3050_v40  ;;  %v5168_v40 = vld [vmem:[#allocation16 + $0x168] ss:$16 sps:$4 sm:$0xff]   ;;  %v5196_v62 = vld [vmem:[#allocation17 + $0x1b0] sm:$0xff]   ;;  %v5201_v48 = vld [vmem:[#allocation17 + $0x160] sm:$0xff]  }
0x15a8   :  { %4910 = vmatpush3.bf16.msra.mxu0 %v5133_v30  ;;  %v5153_v30 = vld [vmem:[#allocation16 + $0x1a0] ss:$16 sps:$4 sm:$0xff]  }
0x15a9   :  { %4911 = vmatprep.subr.bf16.mxu0 %v5134_v10  ;;  %3525 = vmatpush1.bf16.msra.mxu1 %v5153_v30  ;;  %v5199_v30 = vld [vmem:[#allocation17 + $0x128] sm:$0xff]  }
0x15aa   :  { %3526 = vmatprep.subr.bf16.mxu1 %v5161_v57  ;;  %v5204_v57 = vld [vmem:[#allocation17 + $0x1a0] sm:$0xff]  }
0x15ac   :  { %4912 = vmatpush3.bf16.msra.mxu0 %v5134_v10  ;;  %v5173_v10 = vld [vmem:[#allocation16 + $0x144] ss:$16 sps:$4 sm:$0xff]  }
0x15ad   :  { %4913 = vmatprep.subr.bf16.mxu0 %v5135_v45  ;;  %3527 = vmatpush1.bf16.msra.mxu1 %v5159_v56  ;;  %v5206_v56 = vld [vmem:[#allocation17 + $0x1d8] sm:$0xff]  }
0x15ae   :  { %3528 = vmatprep.subr.bf16.mxu1 %v5167_v58  ;;  %v5208_v58 = vld [vmem:[#allocation17 + $0x198] sm:$0xff]  }
0x15b0   :  { %4914 = vmatpush3.bf16.msra.mxu0 %v5135_v45  ;;  %v5176_v45 = vld [vmem:[#allocation16 + $0x14c] ss:$16 sps:$4 sm:$0xff]  }
0x15b1   :  { %4915 = vmatprep.subr.bf16.mxu0 %v5136_v55  ;;  %3529 = vmatpush1.bf16.msra.mxu1 %v5165_v19  ;;  %v5210_v19 = vld [vmem:[#allocation17 + $0x1d0] sm:$0xff]  }
0x15b2   :  { %3530 = vmatprep.subr.bf16.mxu1 %v5173_v10  ;;  %v5212_v10 = vld [vmem:[#allocation17 + $0x190] sm:$0xff]  }
0x15b4   :  { %4916 = vmatpush3.bf16.msra.mxu0 %v5136_v55  ;;  %v5171_v55 = vld [vmem:[#allocation16 + $0x140] ss:$16 sps:$4 sm:$0xff]  }
0x15b5   :  { %4917 = vmatprep.subr.bf16.mxu0 %v5137_v49  ;;  %3531 = vmatpush1.bf16.msra.mxu1 %v5171_v55  ;;  %v5214_v55 = vld [vmem:[#allocation17 + $0x1c8] sm:$0xff]  }
0x15b8   :  { %4918 = vmatpush3.bf16.msra.mxu0 %v5137_v49  ;;  %v5174_v49 = vld [vmem:[#allocation16 + $0x148] ss:$16 sps:$4 sm:$0xff]  }
0x15b9   :  { %4919 = vmatprep.subr.bf16.mxu0 %v5138_v44 }
0x15bc   :  { %4920 = vmatpush3.bf16.msra.mxu0 %v5138_v44  ;;  %v5179_v44 = vld [vmem:[#allocation16 + $0x124] ss:$16 sps:$4 sm:$0xff]  }
0x15bd   :  { %4921 = vmatprep.subr.bf16.mxu0 %v5139_v61  ;;  %3532 = vmatprep.subr.bf16.mxu1 %v5179_v44  ;;  %v5216_v44 = vld [vmem:[#allocation17 + $0x188] sm:$0xff]  }
0x15c0   :  { %4922 = vmatpush3.bf16.msra.mxu0 %v5139_v61  ;;  %v5182_v61 = vld [vmem:[#allocation16 + $0x12c] ss:$16 sps:$4 sm:$0xff]  }
0x15c1   :  { %4923 = vmatprep.subr.bf16.mxu0 %v5140_v12 }
0x15c4   :  { %4924 = vmatpush3.bf16.msra.mxu0 %v5140_v12  ;;  %v5177_v12 = vld [vmem:[#allocation16 + $0x120] ss:$16 sps:$4 sm:$0xff]  }
0x15c5   :  { %3571 = vmatprep.subr.bf16.mxu0 %v5146_v63  ;;  %3533 = vmatpush1.bf16.msra.mxu1 %v5177_v12  ;;  %v5218_v12 = vld [vmem:[#allocation17 + $0x1c0] sm:$0xff]  }
0x1667   :  { %v4907_v3 = vpop.f32.mrf.mxu0 }
0x1668   :  { %v3115_v51 = vadd.f32 %v4907_v3, %v6389_v1  ;;  %v5180_v3 = vld [vmem:[#allocation16 + $0x128] ss:$16 sps:$4 sm:$0xff]  }
0x1669   :  { %v3099_v41 = vpop.f32.mrf.mxu0 }
0x166a   :  { %v3113_v7 = vadd.f32 %v3099_v41, %v6391_v36  ;;  %v3134_v15 = vpack.c.bf16 %v3115_v51, %v3115_v51  ;;  %v5185_v41 = vld [vmem:[#allocation16 + $0x104] ss:$16 sps:$4 sm:$0xff]  }
0x166b   :  { %v4908_v2 = vpop.f32.mrf.mxu0  ;;  %3534 = vmatprep.subr.bf16.mxu1 %v5185_v41  ;;  %v5220_v41 = vld [vmem:[#allocation17 + $0x180] sm:$0xff]  }
0x166c   :  { %v5183_v2 = vld [vmem:[#allocation16 + $0x100] ss:$16 sps:$4 sm:$0xff]  }
0x166d   :  { %v3102_v60 = vpop.f32.mrf.mxu0  ;;  %3535 = vmatpush1.bf16.msra.mxu1 %v5183_v2 }
0x166e   :  { %v3114_v52 = vadd.f32 %v3102_v60, %v2961_v35  ;;  %v5186_v35 = vld [vmem:[#allocation16 + $0x108] ss:$16 sps:$4 sm:$0xff]  }
0x1670   :  { %v3133_v16 = vpack.c.bf16 %v3114_v52, %v3113_v7 }
0x1672   :  { %4925 = vmatprep.mubr.bf16.mxu0 %v3133_v16 }
0x1673   :  { %4926 = vmatmul.mubr.bf16.vlgmr.msra.gmra.mxu0 %v3134_v15 }
0x1674   :  { %3603 = vmatprep.mubr.bf16.mxu0 %v5683_v34 }
0x1733   :  { %v4927_v53 = vpop.f32.mrf.mxu0 }
0x1734   :  { %v3233_v27 = vadd.f32 %v4927_v53, %v6212_v47  ;;  %v5144_v47 = vld [vmem:[#allocation16 + $0x1e8] ss:$16 sps:$4 sm:$0xff]  }
0x1735   :  { %v3217_v11 = vpop.f32.mrf.mxu0  ;;  %3572 = vmatpush1.bf16.msra.mxu0 %v5144_v47 }
0x1736   :  { %v3231_v6 = vadd.f32 %v3217_v11, %v6204_v28  ;;  %v6414_v50 = vadd.f32 %v4415_v18, %v3233_v27  ;;  %3573 = vmatprep.subr.bf16.mxu0 %v5152_v46  ;;  %v5198_v46 = vld [vmem:[#allocation17 + $0x1e8] sm:$0xff]  }
0x1737   :  { %v4928_v1 = vpop.f32.mrf.mxu0 }
0x1738   :  { %v6416_v24 = vadd.f32 %v4415_v18, %v3231_v6  ;;  %v3253_v26 = vsel %vm226_vm0, %v6414_v50, 0.0 }
0x1739   :  { %v3220_v36 = vpop.f32.mrf.mxu0  ;;  %3574 = vmatpush1.bf16.msra.mxu0 %v5150_v9  ;;  %v5197_v9 = vld [vmem:[#allocation17 + $0x168] sm:$0xff]  }
0x173a   :  { %v3232_v25 = vadd.f32 %v3220_v36, %v6208_v37  ;;  %3249 = vadd.xlane.f32.xlu0 %v6416_v24  ;;  %3575 = vmatprep.subr.bf16.mxu0 %v5158_v23  ;;  %v5203_v23 = vld [vmem:[#allocation17 + $0x120] sm:$0xff]  }
0x173c   :  { %v6420_v38 = vadd.f32 %v4415_v18, %v3232_v25  ;;  %v6442_v25 = vld [vmem:[#allocation14 + $0x1] ss:$0 sm:$0xff] }
0x173d   :  { %3576 = vmatpush1.bf16.msra.mxu0 %v5156_v59  ;;  %v5202_v59 = vld [vmem:[#allocation17 + $0x1e0] sm:$0xff]  }
0x173e   :  { %3251 = vadd.xlane.f32.xlu1 %v6420_v38  ;;  %3577 = vmatprep.subr.bf16.mxu0 %v5164_v14  ;;  %v5205_v14 = vld [vmem:[#allocation17 + $0x158] sm:$0xff]  }
0x1741   :  { %3578 = vmatpush1.bf16.msra.mxu0 %v5162_v29  ;;  %v5207_v29 = vld [vmem:[#allocation17 + $0x118] sm:$0xff]  }
0x1742   :  { %3579 = vmatprep.subr.bf16.mxu0 %v5170_v22  ;;  %v5209_v22 = vld [vmem:[#allocation17 + $0x150] sm:$0xff]  }
0x1745   :  { %3580 = vmatpush1.bf16.msra.mxu0 %v5168_v40  ;;  %v5211_v40 = vld [vmem:[#allocation17 + $0x110] sm:$0xff]  }
0x1746   :  { %3581 = vmatprep.subr.bf16.mxu0 %v5176_v45  ;;  %v5213_v45 = vld [vmem:[#allocation17 + $0x148] sm:$0xff]  }
0x1749   :  { %3582 = vmatpush1.bf16.msra.mxu0 %v5174_v49  ;;  %v5215_v49 = vld [vmem:[#allocation17 + $0x108] sm:$0xff]  }
0x174a   :  { %3583 = vmatprep.subr.bf16.mxu0 %v5182_v61  ;;  %v5217_v61 = vld [vmem:[#allocation17 + $0x140] sm:$0xff]  }
0x174d   :  { %3584 = vmatpush1.bf16.msra.mxu0 %v5180_v3  ;;  %v5219_v3 = vld [vmem:[#allocation17 + $0x100] sm:$0xff]  }
0x174e   :  { %3585 = vmatprep.subr.bf16.mxu0 %v5188_v42 }
0x1751   :  { %3586 = vmatpush1.bf16.msra.mxu0 %v5186_v35 }
0x17c3   :  { %v3250_v28 = vpop.xlane.xlu0 %3249 }
0x17c4   :  { %v3256_v0 = vmul.f32 0.0078125, %v3250_v28 }
0x17c6   :  { %v6424_v43 = vsub.f32 %v6416_v24, %v3256_v0 }
0x17c7   :  { %v3252_v37 = vpop.xlane.xlu1 %3251 }
0x17c8   :  { %v3257_v21 = vmul.f32 0.0078125, %v3252_v37  ;;  %v3262_v31 = vmul.f32 %v6424_v43, %v6424_v43 }
0x17ca   :  { %v6429_v20 = vsub.f32 %v6420_v38, %v3257_v21  ;;  %3265 = vadd.xlane.f32.xlu0 %v3262_v31  ;;  %v5190_v21 = vld [vmem:[#allocation17 + $0x1f8] sm:$0xff]  }
0x17cb   :  { %v5191_v31 = vld [vmem:[#allocation17 + $0x138] sm:$0xff]   ;;  %4684 = vmatprep.subr.bf16.mxu0 %v5190_v21 }
0x17cc   :  { %v3263_v39 = vmul.f32 %v6429_v20, %v6429_v20 }
0x17ce   :  { %3254 = vadd.xlane.f32.xlu0 %v3253_v26  ;;  %3267 = vadd.xlane.f32.xlu1 %v3263_v39  ;;  %v5193_v39 = vld [vmem:[#allocation17 + $0x170] sm:$0xff]  }
0x17cf   :  { %v5194_v26 = vld [vmem:[#allocation17 + $0x1f0] sm:$0xff]  }
0x1853   :  { %v3266_v51 = vpop.xlane.xlu0 %3265 }
0x1854   :  { %v3272_v60 = vmul.f32 0.0078125, %v3266_v51 }
0x1856   :  { %v3275_v7 = vadd.f32 1e-05, %v3272_v60 }
0x1857   :  { %v3255_v52 = vpop.xlane.xlu0 %3254  ;;  %v3268_v16 = vpop.xlane.xlu1 %3267 }
0x1858   :  { %5367 = vrsqrt.f32 %v3275_v7  ;;  %v3258_v15 = vmul.f32 0.0078125, %v3255_v52  ;;  %v3273_v53 = vmul.f32 0.0078125, %v3268_v16 }
0x185a   :  { %v6436_v18 = vsub.f32 %v6414_v50, %v3258_v15  ;;  %v3276_v27 = vadd.f32 1e-05, %v3273_v53  ;;  %v6449_v50 = vld [vmem:[%s6570_s10 + $0x1] ss:$0 sm:$0xff]  ;;  %v4419_v15 = vld [vmem:[%s6572_s12 + $0x4] sm:$0xf] }
0x185b   :  { %v6463_v53 = vrot.slane %v4419_v15, %v5868_v5 }
0x185c   :  { %5369 = vrsqrt.f32 %v3276_v27  ;;  %v3264_v11 = vmul.f32 %v6436_v18, %v6436_v18  ;;  %v6466_v27 = vrot.slane %v4419_v15, %v5875_v13 }
0x185e   :  { %v3269_v6 = vsel %vm226_vm0, %v3264_v11, 0.0  ;;  %v6469_v11 = vrot.slane %v4419_v15, %v5882_v17 }
0x185f   :  { %3270 = vadd.xlane.f32.xlu1 %v3269_v6 }
0x1865   :  { %v5368_v1 = vpop.eup %5367 }
0x1866   :  { %v3281_v36 = vmul.f32 %v5368_v1, %v6424_v43  ;;  %v5189_v43 = vld [vmem:[#allocation17 + $0x178] sm:$0xff]  }
0x1867   :  { %4656 = vmatprep.subr.bf16.mxu1 %v5189_v43 }
0x1868   :  { %v3290_v47 = vmul.f32 %v6442_v25, %v3281_v36 }
0x1869   :  { %v5370_v32 = vpop.eup %5369 }
0x186a   :  { %v3282_v33 = vmul.f32 %v5370_v32, %v6429_v20  ;;  %v3299_v28 = vadd.f32 %v6449_v50, %v3290_v47  ;;  %v5192_v20 = vld [vmem:[#allocation17 + $0x1b8] sm:$0xff]  }
0x186c   :  { %v3291_v63 = vmul.f32 %v6442_v25, %v3282_v33 }
0x186e   :  { %v3300_v0 = vadd.f32 %v6449_v50, %v3291_v63 }
0x1870   :  { %v3335_v37 = vpack.c.bf16 %v3300_v0, %v3299_v28 }
0x1872   :  { %3553 = vmatmul.mubr.bf16.vlgmr.msra.gmra.mxu1 %v3335_v37  ;;  %3604 = vmatmul.mubr.bf16.vlgmr.msra.gmra.mxu0 %v3335_v37 }
0x1873   :  { %3562 = vmatprep.mubr.bf16.mxu1 %v5683_v34  ;;  %3613 = vmatprep.mubr.bf16.mxu0 %v5683_v34  ;;  %v5200_v34 = vld [vmem:[#allocation17 + $0x1a8] sm:$0xff]  }
0x1874   :  { %4657 = vmatpush3.bf16.msra.mxu1 %v5191_v31  ;;  %4685 = vmatpush3.bf16.msra.mxu0 %v5192_v20 }
0x1875   :  { %4658 = vmatprep.subr.bf16.mxu1 %v5193_v39  ;;  %4686 = vmatprep.subr.bf16.mxu0 %v5194_v26 }
0x1878   :  { %4659 = vmatpush3.bf16.msra.mxu1 %v5195_v54  ;;  %4687 = vmatpush3.bf16.msra.mxu0 %v5196_v62 }
0x1879   :  { %4660 = vmatprep.subr.bf16.mxu1 %v5197_v9  ;;  %4688 = vmatprep.subr.bf16.mxu0 %v5198_v46 }
0x187c   :  { %4661 = vmatpush3.bf16.msra.mxu1 %v5199_v30  ;;  %4689 = vmatpush3.bf16.msra.mxu0 %v5200_v34 }
0x187d   :  { %4662 = vmatprep.subr.bf16.mxu1 %v5201_v48  ;;  %4690 = vmatprep.subr.bf16.mxu0 %v5202_v59 }
0x1880   :  { %4663 = vmatpush3.bf16.msra.mxu1 %v5203_v23  ;;  %4691 = vmatpush3.bf16.msra.mxu0 %v5204_v57 }
0x1881   :  { %4664 = vmatprep.subr.bf16.mxu1 %v5205_v14  ;;  %4692 = vmatprep.subr.bf16.mxu0 %v5206_v56 }
0x1884   :  { %4665 = vmatpush3.bf16.msra.mxu1 %v5207_v29  ;;  %4693 = vmatpush3.bf16.msra.mxu0 %v5208_v58 }
0x1885   :  { %4666 = vmatprep.subr.bf16.mxu1 %v5209_v22  ;;  %4694 = vmatprep.subr.bf16.mxu0 %v5210_v19 }
0x1888   :  { %4667 = vmatpush3.bf16.msra.mxu1 %v5211_v40  ;;  %4695 = vmatpush3.bf16.msra.mxu0 %v5212_v10 }
0x1889   :  { %4668 = vmatprep.subr.bf16.mxu1 %v5213_v45  ;;  %4696 = vmatprep.subr.bf16.mxu0 %v5214_v55 }
0x188c   :  { %4669 = vmatpush3.bf16.msra.mxu1 %v5215_v49  ;;  %4697 = vmatpush3.bf16.msra.mxu0 %v5216_v44 }
0x188d   :  { %4670 = vmatprep.subr.bf16.mxu1 %v5217_v61  ;;  %4698 = vmatprep.subr.bf16.mxu0 %v5218_v12 }
0x1890   :  { %4671 = vmatpush3.bf16.msra.mxu1 %v5219_v3  ;;  %4699 = vmatpush3.bf16.msra.mxu0 %v5220_v41 }
0x18e8   :  { %v3271_v42 = vpop.xlane.xlu1 %3270 }
0x18e9   :  { %v3274_v2 = vmul.f32 0.0078125, %v3271_v42 }
0x18eb   :  { %v3277_v35 = vadd.f32 1e-05, %v3274_v2 }
0x18ed   :  { %5371 = vrsqrt.f32 %v3277_v35 }
0x18fa   :  { %v5372_v51 = vpop.eup %5371 }
0x18fb   :  { %v3283_v60 = vmul.f32 %v5372_v51, %v6436_v18  ;;  %v6473_v18 = vrot.slane %v4419_v15, %v1422_v8 }
0x18fd   :  { %v3292_v7 = vmul.f32 %v6442_v25, %v3283_v60 }
0x18ff   :  { %v3301_v52 = vadd.f32 %v6449_v50, %v3292_v7 }
0x1901   :  { %v3336_v16 = vpack.c.bf16 %v3301_v52, %v3301_v52 }
0x1903   :  { %3563 = vmatmul.mubr.bf16.gmra.mxu1 %v3336_v16  ;;  %3614 = vmatmul.mubr.bf16.gmra.mxu0 %v3336_v16 }
0x1932   :  { %v3554_v6 = vpop.f32.mrf.mxu1  ;;  %v3605_v1 = vpop.f32.mrf.mxu0 }
0x1933   :  { %v6476_v36 = vadd.f32 %v3554_v6, %v6463_v53  ;;  %v6479_v25 = vadd.f32 %v3605_v1, %v6466_v27 }
0x1934   :  { %v3556_v5 = vpop.f32.mrf.mxu1  ;;  %v3607_v32 = vpop.f32.mrf.mxu0 }
0x1935   :  { %v3622_v13 = vmul.f32 %v6476_v36, %v6476_v36  ;;  %v3624_v17 = vmul.f32 %v6479_v25, %v6479_v25  ;;  %v6486_v4 = vadd.f32 %v3556_v5, %v6469_v11  ;;  %v6489_v8 = vadd.f32 %v3607_v32, %v6473_v18 }
0x1936   :  { %v3558_v33 = vpop.f32.mrf.mxu1  ;;  %v3609_v47 = vpop.f32.mrf.mxu0 }
0x1937   :  { %v3634_v50 = vmul.f32 %v3622_v13, %v6476_v36  ;;  %v3636_v63 = vmul.f32 %v3624_v17, %v6479_v25  ;;  %v3623_v28 = vmul.f32 %v6486_v4, %v6486_v4  ;;  %v3625_v0 = vmul.f32 %v6489_v8, %v6489_v8 }
0x1938   :  { %v6498_v37 = vadd.f32 %v3558_v33, %v6463_v53  ;;  %v6501_v43 = vadd.f32 %v3609_v47, %v6466_v27  ;;  %v3560_v21 = vpop.f32.mrf.mxu1  ;;  %v3611_v31 = vpop.f32.mrf.mxu0 }
0x1939   :  { %v3646_v20 = vmul.f32 0.044715, %v3634_v50  ;;  %v3648_v39 = vmul.f32 0.044715, %v3636_v63  ;;  %v3635_v26 = vmul.f32 %v3623_v28, %v6486_v4  ;;  %v3637_v54 = vmul.f32 %v3625_v0, %v6489_v8 }
0x193a   :  { %v3626_v62 = vmul.f32 %v6498_v37, %v6498_v37  ;;  %v3628_v9 = vmul.f32 %v6501_v43, %v6501_v43  ;;  %v6510_v46 = vadd.f32 %v3560_v21, %v6469_v11  ;;  %v6513_v30 = vadd.f32 %v3611_v31, %v6473_v18 }
0x193b   :  { %v3658_v34 = vadd.f32 %v3646_v20, %v6476_v36  ;;  %v3660_v48 = vadd.f32 %v3648_v39, %v6479_v25  ;;  %v3647_v59 = vmul.f32 0.044715, %v3635_v26  ;;  %v3649_v23 = vmul.f32 0.044715, %v3637_v54 }
0x193c   :  { %v3638_v57 = vmul.f32 %v3626_v62, %v6498_v37  ;;  %v3640_v14 = vmul.f32 %v3628_v9, %v6501_v43  ;;  %v3627_v56 = vmul.f32 %v6510_v46, %v6510_v46  ;;  %v3629_v29 = vmul.f32 %v6513_v30, %v6513_v30 }
0x193d   :  { %v3670_v58 = vmul.f32 0.7978846, %v3658_v34  ;;  %v3672_v22 = vmul.f32 0.7978846, %v3660_v48  ;;  %v3659_v19 = vadd.f32 %v3647_v59, %v6486_v4  ;;  %v3661_v40 = vadd.f32 %v3649_v23, %v6489_v8 }
0x193e   :  { %v3650_v10 = vmul.f32 0.044715, %v3638_v57  ;;  %v3652_v45 = vmul.f32 0.044715, %v3640_v14  ;;  %v3639_v55 = vmul.f32 %v3627_v56, %v6510_v46  ;;  %v3641_v49 = vmul.f32 %v3629_v29, %v6513_v30 }
0x193f   :  { %5373 = vtanh.f32 %v3670_v58  ;;  %v3671_v44 = vmul.f32 0.7978846, %v3659_v19  ;;  %v3673_v61 = vmul.f32 0.7978846, %v3661_v40 }
0x1940   :  { %5375 = vtanh.f32 %v3672_v22  ;;  %v3662_v12 = vadd.f32 %v3650_v10, %v6498_v37  ;;  %v3664_v3 = vadd.f32 %v3652_v45, %v6501_v43  ;;  %v3651_v41 = vmul.f32 0.044715, %v3639_v55 }
0x1941   :  { %5377 = vtanh.f32 %v3671_v44  ;;  %v3653_v42 = vmul.f32 0.044715, %v3641_v49 }
0x1942   :  { %5379 = vtanh.f32 %v3673_v61  ;;  %v3674_v2 = vmul.f32 0.7978846, %v3662_v12  ;;  %v3676_v35 = vmul.f32 0.7978846, %v3664_v3  ;;  %v3663_v51 = vadd.f32 %v3651_v41, %v6510_v46 }
0x1943   :  { %v3665_v60 = vadd.f32 %v3653_v42, %v6513_v30 }
0x1944   :  { %5381 = vtanh.f32 %v3674_v2  ;;  %v3675_v7 = vmul.f32 0.7978846, %v3663_v51 }
0x1945   :  { %5383 = vtanh.f32 %v3676_v35  ;;  %v3677_v52 = vmul.f32 0.7978846, %v3665_v60 }
0x1946   :  { %5385 = vtanh.f32 %v3675_v7 }
0x1947   :  { %5387 = vtanh.f32 %v3677_v52 }
0x194c   :  { %v5374_v16 = vpop.eup %5373 }
0x194d   :  { %v5376_v15 = vpop.eup %5375  ;;  %v3694_v13 = vadd.f32 1.0, %v5374_v16 }
0x194e   :  { %v5378_v6 = vpop.eup %5377  ;;  %v3696_v47 = vadd.f32 1.0, %v5376_v15 }
0x194f   :  { %v5380_v1 = vpop.eup %5379  ;;  %v3695_v5 = vadd.f32 1.0, %v5378_v6  ;;  %v3706_v39 = vmul.f32 0.5, %v3694_v13 }
0x1950   :  { %v3697_v17 = vadd.f32 1.0, %v5380_v1  ;;  %v3708_v9 = vmul.f32 0.5, %v3696_v47 }
0x1951   :  { %v5382_v32 = vpop.eup %5381  ;;  %v3707_v20 = vmul.f32 0.5, %v3695_v5  ;;  %v3718_v56 = vmul.f32 %v3706_v39, %v6476_v36 }
0x1952   :  { %v5384_v33 = vpop.eup %5383  ;;  %v3698_v50 = vadd.f32 1.0, %v5382_v32  ;;  %v3709_v62 = vmul.f32 0.5, %v3697_v17  ;;  %v3720_v22 = vmul.f32 %v3708_v9, %v6479_v25 }
0x1953   :  { %v5386_v63 = vpop.eup %5385  ;;  %v3700_v28 = vadd.f32 1.0, %v5384_v33  ;;  %v3719_v57 = vmul.f32 %v3707_v20, %v6486_v4 }
0x1954   :  { %v5388_v0 = vpop.eup %5387  ;;  %v3710_v21 = vmul.f32 0.5, %v3698_v50  ;;  %v3699_v31 = vadd.f32 1.0, %v5386_v63  ;;  %v3721_v29 = vmul.f32 %v3709_v62, %v6489_v8 }
0x1955   :  { %v3712_v26 = vmul.f32 0.5, %v3700_v28  ;;  %v3701_v54 = vadd.f32 1.0, %v5388_v0 }
0x1956   :  { %v3711_v34 = vmul.f32 0.5, %v3699_v31  ;;  %v3722_v48 = vmul.f32 %v3710_v21, %v6498_v37 }
0x1957   :  { %v3713_v59 = vmul.f32 0.5, %v3701_v54  ;;  %v3724_v23 = vmul.f32 %v3712_v26, %v6501_v43 }
0x1958   :  { %v3723_v14 = vmul.f32 %v3711_v34, %v6510_v46  ;;  %v3795_v40 = vpack.c.bf16 %v3722_v48, %v3718_v56 }
0x1959   :  { %v3725_v58 = vmul.f32 %v3713_v59, %v6513_v30  ;;  %v3797_v45 = vpack.c.bf16 %v3724_v23, %v3720_v22 }
0x195a   :  { %v3796_v19 = vpack.c.bf16 %v3723_v14, %v3719_v57 }
0x195b   :  { %v3798_v10 = vpack.c.bf16 %v3725_v58, %v3721_v29 }
0x195c   :  { %4027 = vmatprep.mubr.bf16.mxu1 %v3796_v19 }
0x195d   :  { %4074 = vmatprep.mubr.bf16.mxu0 %v3798_v10  ;;  %4028 = vmatmul.mubr.bf16.vlgmr.msra.gmra.mxu1 %v3795_v40 }
0x195e   :  { %4075 = vmatmul.mubr.bf16.vlgmr.msra.gmra.mxu0 %v3797_v45 }
0x19c3   :  { %v3564_v37 = vpop.f32.mrf.mxu1  ;;  %v3615_v4 = vpop.f32.mrf.mxu0 }
0x19c4   :  { %v3565_v43 = vadd.f32 %v3564_v37, %v6463_v53  ;;  %v3616_v36 = vadd.f32 %v3615_v4, %v6466_v27 }
0x19c5   :  { %v3566_v46 = vpop.f32.mrf.mxu1  ;;  %v3617_v8 = vpop.f32.mrf.mxu0 }
0x19c6   :  { %v3630_v55 = vmul.f32 %v3565_v43, %v3565_v43  ;;  %v3632_v30 = vmul.f32 %v3616_v36, %v3616_v36  ;;  %v3567_v25 = vadd.f32 %v3566_v46, %v6469_v11  ;;  %v3618_v49 = vadd.f32 %v3617_v8, %v6473_v18  ;;  %v4485_v8 = vld [vmem:[%s6574_s14 + $0x1] ss:$0 sm:$0xff] }
0x19c7   :  { %v3568_v44 = vpop.f32.mrf.mxu1  ;;  %v3619_v61 = vpop.f32.mrf.mxu0 }
0x19c8   :  { %v3642_v12 = vmul.f32 %v3630_v55, %v3565_v43  ;;  %v3644_v3 = vmul.f32 %v3632_v30, %v3616_v36  ;;  %v3631_v41 = vmul.f32 %v3567_v25, %v3567_v25  ;;  %v3633_v42 = vmul.f32 %v3618_v49, %v3618_v49  ;;  %v5221_v61 = vld [vmem:[#allocation19 + $0x38] sm:$0xff]  }
0x19c9   :  { %v3569_v2 = vpop.f32.mrf.mxu1  ;;  %v3620_v35 = vpop.f32.mrf.mxu0 }
0x19ca   :  { %v3654_v51 = vmul.f32 0.044715, %v3642_v12  ;;  %v3656_v53 = vmul.f32 0.044715, %v3644_v3  ;;  %v3643_v60 = vmul.f32 %v3631_v41, %v3567_v25  ;;  %v3645_v27 = vmul.f32 %v3633_v42, %v3618_v49  ;;  %v5222_v3 = vld [vmem:[#allocation19 + $0x30] sm:$0xff]  }
0x19cb   :  { %v5684_v12 = vmov 0.0  }
0x19cc   :  { %v3666_v7 = vadd.f32 %v3654_v51, %v3565_v43  ;;  %v3668_v52 = vadd.f32 %v3656_v53, %v3616_v36  ;;  %v3655_v16 = vmul.f32 0.044715, %v3643_v60  ;;  %v3657_v15 = vmul.f32 0.044715, %v3645_v27  ;;  %4929 = vmatprep.subr.bf16.mxu1 %v5684_v12 }
0x19cd   :  { %4930 = vmatpush3.bf16.msra.mxu1 %v5221_v61 }
0x19ce   :  { %v3678_v6 = vmul.f32 0.7978846, %v3666_v7  ;;  %v3680_v11 = vmul.f32 0.7978846, %v3668_v52  ;;  %v3667_v1 = vadd.f32 %v3655_v16, %v3567_v25  ;;  %v3669_v18 = vadd.f32 %v3657_v15, %v3618_v49  ;;  %4931 = vmatprep.subr.bf16.mxu1 %v5684_v12  ;;  %v5223_v15 = vld [vmem:[#allocation19 + $0x28] sm:$0xff]  }
0x19d0   :  { %5389 = vtanh.f32 %v3678_v6  ;;  %v3679_v5 = vmul.f32 0.7978846, %v3667_v1  ;;  %v3681_v32 = vmul.f32 0.7978846, %v3669_v18  ;;  %v5224_v6 = vld [vmem:[#allocation19 + $0x20] sm:$0xff]   ;;  %v5226_v1 = vld [vmem:[#allocation19 + $0x10] sm:$0xff]  }
0x19d1   :  { %5391 = vtanh.f32 %v3680_v11  ;;  %4932 = vmatpush3.bf16.msra.mxu1 %v5222_v3  ;;  %v5225_v11 = vld [vmem:[#allocation19 + $0x18] sm:$0xff]   ;;  %v5227_v18 = vld [vmem:[#allocation19 + $0x8] sm:$0xff]  }
0x19d2   :  { %5393 = vtanh.f32 %v3679_v5  ;;  %4933 = vmatprep.subr.bf16.mxu1 %v5684_v12  ;;  %v5228_v5 = vld [vmem:[#allocation19] sm:$0xff]  }
0x19d3   :  { %5395 = vtanh.f32 %v3681_v32 }
0x19d5   :  { %4934 = vmatpush3.bf16.msra.mxu1 %v5223_v15 }
0x19d6   :  { %4935 = vmatprep.subr.bf16.mxu1 %v5684_v12 }
0x19d9   :  { %4936 = vmatpush3.bf16.msra.mxu1 %v5224_v6 }
0x19da   :  { %4937 = vmatprep.subr.bf16.mxu1 %v5684_v12 }
0x19dd   :  { %v5390_v13 = vpop.eup %5389  ;;  %4938 = vmatpush3.bf16.msra.mxu1 %v5225_v11 }
0x19de   :  { %v5392_v17 = vpop.eup %5391  ;;  %v3702_v33 = vadd.f32 1.0, %v5390_v13  ;;  %4939 = vmatprep.subr.bf16.mxu1 %v5684_v12 }
0x19df   :  { %v5394_v47 = vpop.eup %5393  ;;  %v3704_v50 = vadd.f32 1.0, %v5392_v17 }
0x19e0   :  { %v5396_v63 = vpop.eup %5395  ;;  %v3703_v28 = vadd.f32 1.0, %v5394_v47  ;;  %v3714_v0 = vmul.f32 0.5, %v3702_v33  ;;  %v4486_v47 = vld [vmem:[%s6575_s15] ss:$0 sm:$0xff] }
0x19e1   :  { %v3705_v21 = vadd.f32 1.0, %v5396_v63  ;;  %v3716_v31 = vmul.f32 0.5, %v3704_v50  ;;  %4940 = vmatpush3.bf16.msra.mxu1 %v5226_v1  ;;  %v4487_v63 = vld [vmem:[%s6576_s16] ss:$0 sm:$0xff] }
0x19e2   :  { %v3715_v20 = vmul.f32 0.5, %v3703_v28  ;;  %v3726_v26 = vmul.f32 %v3714_v0, %v3565_v43  ;;  %4941 = vmatprep.subr.bf16.mxu1 %v5684_v12 }
0x19e3   :  { %v3717_v39 = vmul.f32 0.5, %v3705_v21  ;;  %v3728_v62 = vmul.f32 %v3716_v31, %v3616_v36 }
0x19e4   :  { %v3727_v54 = vmul.f32 %v3715_v20, %v3567_v25  ;;  %v3799_v59 = vpack.c.bf16 %v3726_v26, %v3726_v26 }
0x19e5   :  { %v3729_v9 = vmul.f32 %v3717_v39, %v3618_v49  ;;  %v3801_v23 = vpack.c.bf16 %v3728_v62, %v3728_v62  ;;  %4942 = vmatpush3.bf16.msra.mxu1 %v5227_v18 }
0x19e6   :  { %v3800_v34 = vpack.c.bf16 %v3727_v54, %v3727_v54  ;;  %4943 = vmatprep.subr.bf16.mxu1 %v5684_v12 }
0x19e7   :  { %v3802_v48 = vpack.c.bf16 %v3729_v9, %v3729_v9 }
0x19e8   :  { %4035 = vmatprep.mubr.bf16.mxu1 %v3800_v34 }
0x19e9   :  { %4082 = vmatprep.mubr.bf16.mxu0 %v3802_v48  ;;  %4036 = vmatmul.mubr.bf16.gmra.mxu1 %v3799_v59 }
0x19ea   :  { %4083 = vmatmul.mubr.bf16.gmra.mxu0 %v3801_v23  ;;  %4945 = vmatprep.mubr.msk.bf16.mxu1 %vm5685_vm4, %v5684_v12 }
0x19eb   :  { %4944 = vmatpush3.bf16.msra.mxu1 %v5228_v5 }
0x1a1d   :  { %v4672_v57 = vpop.f32.mrf.mxu1 }
0x1a1e   :  { %v4700_v14 = vpop.f32.mrf.mxu0 }
0x1a1f   :  { %v4673_v56 = vpop.f32.mrf.mxu1 }
0x1a20   :  { %v4674_v29 = vadd.f32 %v4673_v56, %v4672_v57  ;;  %v4701_v58 = vpop.f32.mrf.mxu0 }
0x1a21   :  { %v4702_v22 = vadd.f32 %v4701_v58, %v4700_v14  ;;  %v4675_v19 = vpop.f32.mrf.mxu1 }
0x1a22   :  { %v4703_v40 = vpop.f32.mrf.mxu0 }
0x1a23   :  { %v4077_v10 = vadd.f32 %v4702_v22, %v4674_v29  ;;  %v4676_v45 = vpop.f32.mrf.mxu1 }
0x1a24   :  { %v4677_v37 = vadd.f32 %v4676_v45, %v4675_v19  ;;  %v4704_v4 = vpop.f32.mrf.mxu0 }
0x1a25   :  { %v4705_v43 = vadd.f32 %v4704_v4, %v4703_v40  ;;  %v4089_v36 = vadd.f32 %v4077_v10, %v6416_v24 }
0x1a27   :  { %v4080_v46 = vadd.f32 %v4705_v43, %v4677_v37  ;;  %v4099_v30 = vadd.f32 %v4485_v8, %v4089_v36 }
0x1a29   :  { %v4090_v55 = vadd.f32 %v4080_v46, %v6420_v38 }
0x1a2b   :  { %v4100_v25 = vadd.f32 %v4485_v8, %v4090_v55 }
0x1a2d   :  { %v4101_v49 = vsel %vm763_vm1, %v4099_v30, %v4100_v25 }
0x1a2e   :  { %v4104_v44 = vsel %vm226_vm0, %v4101_v49, 0.0 }
0x1a2f   :  { %4105 = vadd.xlane.f32.xlu0 %v4104_v44 }
0x1aa9   :  { %v4678_v24 = vpop.f32.mrf.mxu1 }
0x1aaa   :  { %v4706_v41 = vpop.f32.mrf.mxu0 }
0x1aab   :  { %v4679_v42 = vpop.f32.mrf.mxu1 }
0x1aac   :  { %v4707_v2 = vpop.f32.mrf.mxu0 }
0x1aad   :  { %v4681_v38 = vpop.f32.mrf.mxu1 }
0x1aae   :  { %v4709_v35 = vpop.f32.mrf.mxu0 }
0x1aaf   :  { %v4682_v51 = vpop.f32.mrf.mxu1 }
0x1ab0   :  { %v4710_v53 = vpop.f32.mrf.mxu0 }
0x1ab8   :  { %v4106_v60 = vpop.xlane.xlu0 %4105 }
0x1ab9   :  { %v4107_v27 = vmul.f32 0.0078125, %v4106_v60 }
0x1abb   :  { %v4108_v7 = vsub.f32 %v4101_v49, %v4107_v27 }
0x1abd   :  { %v4109_v52 = vmul.f32 %v4108_v7, %v4108_v7 }
0x1abf   :  { %v4110_v16 = vsel %vm226_vm0, %v4109_v52, 0.0 }
0x1ac0   :  { %4111 = vadd.xlane.f32.xlu1 %v4110_v16 }
0x1b49   :  { %v4112_v32 = vpop.xlane.xlu1 %4111 }
0x1b4a   :  { %v4113_v13 = vmul.f32 0.0078125, %v4112_v32 }
0x1b4c   :  { %v4114_v17 = vadd.f32 1e-05, %v4113_v13 }
0x1b4e   :  { %5397 = vrsqrt.f32 %v4114_v17 }
0x1b5b   :  { %v5398_v33 = vpop.eup %5397 }
0x1b5c   :  { %v4116_v50 = vmul.f32 %v5398_v33, %v4108_v7 }
0x1b5e   :  { %v4123_v28 = vmul.f32 %v4486_v47, %v4116_v50 }
0x1b60   :  { %v4130_v0 = vadd.f32 %v4487_v63, %v4123_v28 }
0x1b62   :  { %v4147_v21 = vpack.c.bf16 %v4130_v0, %v4130_v0 }
0x1b64   :  { %4946 = vmatmul.mubr.bf16.vlgmr.msra.gmra.mxu1 %v4147_v21 }
0x1c24   :  { %v4230_v31 = vpop.f32.mrf.mxu1 }
0x1c25   :  { %4236 = vst [vmem:[#allocation20] sm:$0x3] %v4230_v31 }
0x1c26   :  { %v4947_v20 = vpop.f32.mrf.mxu1 }
0x1c27   :  { %5640 = shalt.err (!%p5637_p3)
}
0x1c28   :  { %4246 = dma.vmem_to_hbm [thread:$0]  %s4244_s0, 32, %s6578_s18, [#allocation4]   ;;  %v4233_v39 = vpop.f32.mrf.mxu1 }
0x1c2a   :  { %v4948_v26 = vpop.f32.mrf.mxu1 }
0x1c2b   :  { %5661 = dma.done.wait [#allocation4], 32  }
0x1c2c   :  { %5662 = vsyncadd [#allocation4], 4294967264 }
0x1c2d   :  { %4250 = vsyncpa [#allocation3], 1 }
0x1c2e   :  { %4251 = vsyncpa [#allocation6], 1 }
0x1c2f   :  { %4252 = vsyncpa [#allocation9], 1 }
0x1c30   :  { %4253 = vsyncpa [#allocation12], 1 }
0x1c31   :  { %4254 = vsyncpa [#allocation15], 1 }
0x1c32   :  { %4255 = vsyncpa [#allocation18], 1 }
0x1c33   :  { %4256 = vsyncpa [#allocation4], 1 }

</bundles_post_ra>
